<compile_context>
chip_gen: v7x
topology: tpu7x:2x2x1
jax: 0.10.0
libtpu: 0.0.40
codegen_flags: <defaults>
</compile_context>

<pallas_src>
import functools

import jax
import jax.numpy as jnp
from jax.experimental import pallas as pl
from jax.experimental.pallas import tpu as pltpu

# ----------------------------------------------------------------------------
# Synthetic model hyper-parameters.
# ----------------------------------------------------------------------------
C_IN = 2        # audio channels (Flow1dVAESeparate.channels == 2)
HIDDEN = 128    # conv1 output channels (lane-dense)
LATENT = 128    # latent dim fed to the quantizer (lane-dense)
KERNEL = 4      # conv kernel size
STRIDE = 2      # conv stride
CODEBOOK = 256  # synthetic codebook size (real cardinality is 10000)
LANE = 128


def _frames_after_conv(t):
    return (t - KERNEL) // STRIDE + 1


def _round_up(x, m):
    return ((x + m - 1) // m) * m


# ----------------------------------------------------------------------------
# Host-side (XLA) conv1 im2col: pack the (even, odd) window pair per output
# frame so the kernel sees a lane-packed [N, t_half_pad, 16] bf16 block and
# produces h directly in a deinterleaved "even|odd" 256-lane layout.
# NOTE: the (k-major, channel-minor) flatten is internally consistent with the
# synthetic weights below; real PyTorch Conv1d weights ([out, in, k]) would
# need re-flattening before use.
# ----------------------------------------------------------------------------
def _prep_cols1(x_bct, t2_pad):
    n, c, t = x_bct.shape
    t_half = t2_pad + 1                       # conv2 needs one extra h pair
    t_half_pad = _round_up(t_half, 8)
    t_need = 4 * t2_pad + 6                   # last input sample touched
    x_btc = jnp.transpose(x_bct, (0, 2, 1)).astype(jnp.float32)   # [N, T, C]
    if t_need > t:
        x_btc = jnp.pad(x_btc, ((0, 0), (0, t_need - t), (0, 0)))
    # pair j holds the conv1 windows producing h[2j] (input start 4j) and
    # h[2j+1] (input start 4j+2); each window flattened k-major/channel-minor.
    offs = jnp.array([0, 1, 2, 3, 2, 3, 4, 5], jnp.int32)
    times = jnp.arange(t_half, dtype=jnp.int32)[:, None] * 4 + offs[None, :]
    cols = x_btc[:, times, :]                                   # [N, th, 8, C]
    cols = cols.reshape(n, t_half, 2 * KERNEL * C_IN)           # [N, th, 16]
    cols = jnp.pad(cols, ((0, 0), (0, t_half_pad - t_half), (0, 0)))
    return cols.astype(jnp.bfloat16), t_half_pad


# ----------------------------------------------------------------------------
# Fused Pallas kernel: conv1 + GELU + conv2 + nearest-neighbour VQ for a block
# of `nb` stacked-batch samples (one grid step = nb samples).
# ----------------------------------------------------------------------------
def _sound2code_kernel(cols_ref, w1_ref, b1_ref, w2_ref, b2_ref, cbn2_ref,
                       cbsq_ref, codes_ref, h_ref, *, nb, t2):
    # Loop-invariant operands (loaded once per grid step).
    w1 = w1_ref[...]            # [16, 256] bf16, block-diagonal conv1 weight
    b1 = b1_ref[...]            # [1, 256] f32
    w2a = w2_ref[0]             # [256, 128] bf16 (taps k=0,1 on even|odd lanes)
    w2b = w2_ref[1]             # [256, 128] bf16 (taps k=2,3)
    b2 = b2_ref[...]            # [1, 128] f32
    cbn2 = cbn2_ref[...]        # [K, D] bf16  == -2 * codebook
    cbsq = cbsq_ref[...]        # [K, 1] f32   == ||codebook||^2

    for s in range(nb):         # static, small per-step sample loop
        # ---- conv1 (k=4, s=2): one MXU matmul on the pre-packed window pairs.
        # Output lanes 0:128 = h[2j], lanes 128:256 = h[2j+1].
        h = jnp.dot(cols_ref[s], w1, preferred_element_type=jnp.float32)
        h = jax.nn.gelu(h + b1, approximate=True)      # f32 VPU/EUP math
        h_ref[...] = h.astype(jnp.bfloat16)            # bf16 VMEM-resident h

        # ---- conv2 (k=4, s=2): two accumulating K=256 bf16 matmuls on
        # contiguous slabs of the deinterleaved h (no stride-2 gather/concat).
        z = jnp.dot(h_ref[pl.ds(0, t2), :], w2a,
                    preferred_element_type=jnp.float32)
        z = z + jnp.dot(h_ref[pl.ds(1, t2), :], w2b,
                        preferred_element_type=jnp.float32)
        z = z + b2                                     # [t2, LATENT] f32

        # ---- residual VQ with n_quantizers=1: nearest neighbour.
        # dist(z, c) = ||c||^2 - 2 z.c  (||z||^2 is frame-constant -> dropped).
        # Computed transposed ([K, t2]) so the int32 code store is lane-dense.
        dist = cbsq + jax.lax.dot_general(
            cbn2, z.astype(jnp.bfloat16), (((1,), (1,)), ((), ())),
            preferred_element_type=jnp.float32)        # [K, t2] f32
        min_d = jnp.min(dist, axis=0, keepdims=True)   # [1, t2]
        idx = jax.lax.broadcasted_iota(jnp.int32, dist.shape, 0)
        codes_ref[s] = jnp.min(jnp.where(dist <= min_d, idx, CODEBOOK),
                               axis=0, keepdims=True)  # [1, t2] int32


def _sound2code(x_bct, params):
    """x_bct: [N, C_IN, T] (PyTorch NCW) -> codes [N, 1, T_frames] int32."""
    n, c, t = x_bct.shape
    t1 = _frames_after_conv(t)
    t2 = _frames_after_conv(t1)
    t2_pad = _round_up(max(t2, LANE), LANE)      # lane-dense code store
    cols, t_half_pad = _prep_cols1(x_bct, t2_pad)

    # >= 2 parallel grid blocks keeps both v7x TensorCores busy; 1 TC on
    # v5e/v6e so a single block there would also be fine.
    n_blocks = 2 if (n % 2 == 0 and n >= 2) else 1
    nb = n // n_blocks

    kernel = functools.partial(_sound2code_kernel, nb=nb, t2=t2_pad)
    codes = pl.pallas_call(
        kernel,
        out_shape=jax.ShapeDtypeStruct((n, 1, t2_pad), jnp.int32),
        grid_spec=pltpu.PrefetchScalarGridSpec(
            num_scalar_prefetch=0,
            grid=(n_blocks,),
            in_specs=[
                pl.BlockSpec((nb, t_half_pad, 2 * KERNEL * C_IN),
                             lambda b: (b, 0, 0)),                       # cols1
                pl.BlockSpec((2 * KERNEL * C_IN, 2 * HIDDEN),
                             lambda b: (0, 0)),                          # w1 blk
                pl.BlockSpec((1, 2 * HIDDEN), lambda b: (0, 0)),         # b1
                pl.BlockSpec((2, 2 * HIDDEN, LATENT),
                             lambda b: (0, 0, 0)),                       # w2
                pl.BlockSpec((1, LATENT), lambda b: (0, 0)),             # b2
                pl.BlockSpec((CODEBOOK, LATENT), lambda b: (0, 0)),      # -2*cb
                pl.BlockSpec((CODEBOOK, 1), lambda b: (0, 0)),           # ||cb||^2
            ],
            out_specs=pl.BlockSpec((nb, 1, t2_pad), lambda b: (b, 0, 0)),
            scratch_shapes=[pltpu.VMEM((t_half_pad, 2 * HIDDEN),
                                       jnp.bfloat16)],                   # h
        ),
        compiler_params=pltpu.CompilerParams(
            dimension_semantics=("parallel",),
        ),
    )(cols, params["w1_block"], params["b1_packed"], params["w2_stacked"],
      params["b2"], params["cb_neg2"], params["cb_sq"])
    return codes[:, :, :t2]


@jax.jit
def flow1dvae_separate_encode(x_vocal, x_bgm, params):
    """Flow1dVAESeparate.encode: two waveforms -> (codes_vocal, codes_bgm)."""
    # Stack both branches along batch so one kernel launch covers everything
    # (one encoder model, as in the real Tango sound2code).
    x_all = jnp.concatenate([x_vocal, x_bgm], axis=0)
    codes_all = _sound2code(x_all, params)
    b = x_vocal.shape[0]
    return codes_all[:b], codes_all[b:]


# ----------------------------------------------------------------------------
# Deterministic synthetic parameters, pre-packed into the kernel layout.
# ----------------------------------------------------------------------------
def init_params(key):
    k1, k2, k3, k4, k5 = jax.random.split(key, 5)
    w1 = (jax.random.normal(k1, (KERNEL * C_IN, HIDDEN), jnp.float32)
          * 0.35).astype(jnp.bfloat16)
    b1 = jax.random.normal(k2, (1, HIDDEN), jnp.float32) * 0.05
    w2 = (jax.random.normal(k3, (KERNEL * HIDDEN, LATENT), jnp.float32)
          * (1.0 / jnp.sqrt(KERNEL * HIDDEN))).astype(jnp.bfloat16)
    b2 = jax.random.normal(k4, (1, LATENT), jnp.float32) * 0.05
    codebook = jax.random.normal(k5, (CODEBOOK, LATENT), jnp.float32)

    kc = KERNEL * C_IN
    # Block-diagonal conv1 weight: even window -> lanes 0:128, odd -> 128:256.
    w1_block = jnp.zeros((2 * kc, 2 * HIDDEN), jnp.bfloat16)
    w1_block = w1_block.at[:kc, :HIDDEN].set(w1).at[kc:, HIDDEN:].set(w1)
    return dict(
        w1_block=w1_block,
        b1_packed=jnp.concatenate([b1, b1], axis=-1),        # [1, 256]
        w2_stacked=w2.reshape(2, 2 * HIDDEN, LATENT),         # [2, 256, 128]
        b2=b2,
        cb_neg2=(-2.0 * codebook).astype(jnp.bfloat16),       # folded -2, bf16
        cb_sq=jnp.sum(codebook * codebook, axis=-1, keepdims=True),  # [K,1] f32
    )


# ----------------------------------------------------------------------------
# Pure-JAX reference (mirrors the kernel's bf16/f32 math) for correctness.
# ----------------------------------------------------------------------------
def _ref_sound2code(x_bct, p):
    n, c, t = x_bct.shape
    t1 = _frames_after_conv(t)
    t2 = _frames_after_conv(t1)
    t2_pad = _round_up(max(t2, LANE), LANE)
    cols, _ = _prep_cols1(x_bct, t2_pad)
    h = jax.nn.gelu(
        jnp.einsum("ntk,kh->nth", cols, p["w1_block"],
                   preferred_element_type=jnp.float32) + p["b1_packed"],
        approximate=True).astype(jnp.bfloat16)
    z = (jnp.einsum("ntk,kd->ntd", h[:, :t2_pad], p["w2_stacked"][0],
                    preferred_element_type=jnp.float32)
         + jnp.einsum("ntk,kd->ntd", h[:, 1:t2_pad + 1], p["w2_stacked"][1],
                      preferred_element_type=jnp.float32)
         + p["b2"])
    dist = (p["cb_sq"][None]
            + jnp.einsum("kd,ntd->nkt", p["cb_neg2"], z.astype(jnp.bfloat16),
                         preferred_element_type=jnp.float32))   # [N, K, t2_pad]
    codes = jnp.argmin(dist, axis=1).astype(jnp.int32)[:, None, :]
    return codes[:, :, :t2], dist[:, :, :t2]


if __name__ == "__main__":
    key = jax.random.PRNGKey(0)
    k_v, k_b, k_p = jax.random.split(key, 3)

    B, T = 2, 518                               # 518 -> 258 -> 128 code frames
    T1 = _frames_after_conv(T)
    T2 = _frames_after_conv(T1)                 # = 128 (lane-dense codes)

    x_vocal = jax.random.normal(k_v, (B, C_IN, T), jnp.float32)
    x_bgm = jax.random.normal(k_b, (B, C_IN, T), jnp.float32)
    params = init_params(k_p)

    codes_vocal, codes_bgm = flow1dvae_separate_encode(x_vocal, x_bgm, params)
    jax.block_until_ready((codes_vocal, codes_bgm))

    assert codes_vocal.shape == (B, 1, T2)
    assert codes_bgm.shape == (B, 1, T2)
    assert codes_vocal.dtype == jnp.int32

    # Correctness vs. the pure-JAX reference.
    x_all = jnp.concatenate([x_vocal, x_bgm], axis=0)
    ref_codes, ref_dist = _ref_sound2code(x_all, params)
    codes_all = jnp.concatenate([codes_vocal, codes_bgm], axis=0)

    match = float(jnp.mean((codes_all == ref_codes).astype(jnp.float32)))
    assert match >= 0.98, f"code match rate too low: {match}"

    # The kernel's codes must be (near-)optimal under the reference distances
    # (robust to last-ULP ties between the MXU and XLA dot paths).
    d_pick = jnp.take_along_axis(ref_dist, codes_all, axis=1)     # [N,1,T2]
    d_min = jnp.min(ref_dist, axis=1, keepdims=True)
    assert bool(jnp.all(d_pick <= d_min + 1e-2 + 1e-4 * jnp.abs(d_min)))

    print("KERNEL_OK")
</pallas_src>

<mosaic_0001>
module attributes {stable_mosaic.version = 11 : i64} {
  func.func @_sound2code_kernel(%arg0: i32, %arg1: memref<2x136x16xbf16, #tpu.memory_space<vmem>>, %arg2: memref<16x256xbf16, #tpu.memory_space<vmem>>, %arg3: memref<1x256xf32, #tpu.memory_space<vmem>>, %arg4: memref<2x256x128xbf16, #tpu.memory_space<vmem>>, %arg5: memref<1x128xf32, #tpu.memory_space<vmem>>, %arg6: memref<256x128xbf16, #tpu.memory_space<vmem>>, %arg7: memref<256x1xf32, #tpu.memory_space<vmem>>, %arg8: memref<2x1x128xi32, #tpu.memory_space<vmem>>, %arg9: memref<136x256xbf16, #tpu.memory_space<vmem>>) attributes {dimension_semantics = [#tpu.dimension_semantics<parallel>], iteration_bounds = array<i64: 2>, scalar_prefetch = 0 : i64, scratch_operands = 1 : i64, tpu.core_type = #tpu.core_type<tc>, window_params = [{transform_indices = @transform_0, window_bounds = array<i64: 2, 136, 16>}, {pipeline_mode = #tpu.pipeline_mode<synchronous>, transform_indices = @transform_1, window_bounds = array<i64: 16, 256>}, {pipeline_mode = #tpu.pipeline_mode<synchronous>, transform_indices = @transform_2, window_bounds = array<i64: 1, 256>}, {pipeline_mode = #tpu.pipeline_mode<synchronous>, transform_indices = @transform_3, window_bounds = array<i64: 2, 256, 128>}, {pipeline_mode = #tpu.pipeline_mode<synchronous>, transform_indices = @transform_4, window_bounds = array<i64: 1, 128>}, {pipeline_mode = #tpu.pipeline_mode<synchronous>, transform_indices = @transform_5, window_bounds = array<i64: 256, 128>}, {pipeline_mode = #tpu.pipeline_mode<synchronous>, transform_indices = @transform_6, window_bounds = array<i64: 256, 1>}, {transform_indices = @transform_7, window_bounds = array<i64: 2, 1, 128>}]} {
    %c0 = arith.constant 0 : index
    %c0_0 = arith.constant 0 : index
    %0 = vector.load %arg2[%c0, %c0_0] : memref<16x256xbf16, #tpu.memory_space<vmem>>, vector<16x256xbf16>
    %c0_1 = arith.constant 0 : index
    %c0_2 = arith.constant 0 : index
    %1 = vector.load %arg3[%c0_1, %c0_2] : memref<1x256xf32, #tpu.memory_space<vmem>>, vector<1x256xf32>
    %c0_3 = arith.constant 0 : index
    %c0_4 = arith.constant 0 : index
    %c0_5 = arith.constant 0 : index
    %2 = vector.load %arg4[%c0_3, %c0_4, %c0_5] : memref<2x256x128xbf16, #tpu.memory_space<vmem>>, vector<1x256x128xbf16>
    %3 = vector.shape_cast %2 : vector<1x256x128xbf16> to vector<256x128xbf16>
    %c1 = arith.constant 1 : index
    %c0_6 = arith.constant 0 : index
    %c0_7 = arith.constant 0 : index
    %4 = vector.load %arg4[%c1, %c0_6, %c0_7] : memref<2x256x128xbf16, #tpu.memory_space<vmem>>, vector<1x256x128xbf16>
    %5 = vector.shape_cast %4 : vector<1x256x128xbf16> to vector<256x128xbf16>
    %c0_8 = arith.constant 0 : index
    %c0_9 = arith.constant 0 : index
    %6 = vector.load %arg5[%c0_8, %c0_9] : memref<1x128xf32, #tpu.memory_space<vmem>>, vector<1x128xf32>
    %c0_10 = arith.constant 0 : index
    %c0_11 = arith.constant 0 : index
    %7 = vector.load %arg6[%c0_10, %c0_11] : memref<256x128xbf16, #tpu.memory_space<vmem>>, vector<256x128xbf16>
    %c0_12 = arith.constant 0 : index
    %c0_13 = arith.constant 0 : index
    %8 = vector.load %arg7[%c0_12, %c0_13] : memref<256x1xf32, #tpu.memory_space<vmem>>, vector<256x1xf32>
    %c0_14 = arith.constant 0 : index
    %c0_15 = arith.constant 0 : index
    %c0_16 = arith.constant 0 : index
    %9 = vector.load %arg1[%c0_14, %c0_15, %c0_16] : memref<2x136x16xbf16, #tpu.memory_space<vmem>>, vector<1x136x16xbf16>
    %10 = vector.shape_cast %9 : vector<1x136x16xbf16> to vector<136x16xbf16>
    %cst = arith.constant dense<0.000000e+00> : vector<136x256xf32>
    %11 = tpu.matmul %10, %0, %cst {dimension_numbers = #tpu.dot_dimension_numbers<[1], [0], [0], [1], [0, 0, 1, 1], [], []>} : vector<136x16xbf16>, vector<16x256xbf16>, vector<136x256xf32> -> vector<136x256xf32>
    %12 = vector.broadcast %1 : vector<1x256xf32> to vector<136x256xf32>
    %13 = arith.addf %11, %12 : vector<136x256xf32>
    %14 = arith.mulf %13, %13 : vector<136x256xf32>
    %15 = arith.mulf %13, %14 : vector<136x256xf32>
    %cst_17 = arith.constant 4.471500e-02 : f32
    %16 = vector.broadcast %cst_17 : f32 to vector<136x256xf32>
    %17 = arith.mulf %16, %15 : vector<136x256xf32>
    %18 = arith.addf %13, %17 : vector<136x256xf32>
    %cst_18 = arith.constant 0.797884583 : f32
    %19 = vector.broadcast %cst_18 : f32 to vector<136x256xf32>
    %20 = arith.mulf %19, %18 : vector<136x256xf32>
    %21 = math.tanh %20 : vector<136x256xf32>
    %cst_19 = arith.constant 1.000000e+00 : f32
    %22 = vector.broadcast %cst_19 : f32 to vector<136x256xf32>
    %23 = arith.addf %22, %21 : vector<136x256xf32>
    %cst_20 = arith.constant 5.000000e-01 : f32
    %24 = vector.broadcast %cst_20 : f32 to vector<136x256xf32>
    %25 = arith.mulf %24, %23 : vector<136x256xf32>
    %26 = arith.mulf %13, %25 : vector<136x256xf32>
    %27 = arith.truncf %26 : vector<136x256xf32> to vector<136x256xbf16>
    %c0_21 = arith.constant 0 : index
    %c0_22 = arith.constant 0 : index
    %28 = vector.load %arg9[%c0_21, %c0_22] : memref<136x256xbf16, #tpu.memory_space<vmem>>, vector<136x256xbf16>
    tpu.vector_store %arg9[%c0_21, %c0_22], %27 {strides = array<i32>} : memref<136x256xbf16, #tpu.memory_space<vmem>>, vector<136x256xbf16>,
    %c0_23 = arith.constant 0 : index
    %c0_24 = arith.constant 0 : index
    %29 = vector.load %arg9[%c0_23, %c0_24] : memref<136x256xbf16, #tpu.memory_space<vmem>>, vector<128x256xbf16>
    %cst_25 = arith.constant dense<0.000000e+00> : vector<128x128xf32>
    %30 = tpu.matmul %29, %3, %cst_25 {dimension_numbers = #tpu.dot_dimension_numbers<[1], [0], [0], [1], [0, 0, 1, 1], [], []>} : vector<128x256xbf16>, vector<256x128xbf16>, vector<128x128xf32> -> vector<128x128xf32>
    %c1_26 = arith.constant 1 : index
    %c0_27 = arith.constant 0 : index
    %31 = vector.load %arg9[%c1_26, %c0_27] : memref<136x256xbf16, #tpu.memory_space<vmem>>, vector<128x256xbf16>
    %cst_28 = arith.constant dense<0.000000e+00> : vector<128x128xf32>
    %32 = tpu.matmul %31, %5, %cst_28 {dimension_numbers = #tpu.dot_dimension_numbers<[1], [0], [0], [1], [0, 0, 1, 1], [], []>} : vector<128x256xbf16>, vector<256x128xbf16>, vector<128x128xf32> -> vector<128x128xf32>
    %33 = arith.addf %30, %32 : vector<128x128xf32>
    %34 = vector.broadcast %6 : vector<1x128xf32> to vector<128x128xf32>
    %35 = arith.addf %33, %34 : vector<128x128xf32>
    %36 = arith.truncf %35 : vector<128x128xf32> to vector<128x128xbf16>
    %cst_29 = arith.constant dense<0.000000e+00> : vector<256x128xf32>
    %37 = tpu.matmul %7, %36, %cst_29 {dimension_numbers = #tpu.dot_dimension_numbers<[1], [1], [0], [0], [0, 0, 1, 0], [], []>} : vector<256x128xbf16>, vector<128x128xbf16>, vector<256x128xf32> -> vector<256x128xf32>
    %38 = vector.broadcast %8 : vector<256x1xf32> to vector<256x128xf32>
    %39 = arith.addf %38, %37 : vector<256x128xf32>
    %cst_30 = arith.constant dense<0x7F800000> : vector<128xf32>
    %40 = vector.multi_reduction <minimumf>, %39, %cst_30 [0] : vector<256x128xf32> to vector<128xf32>
    %41 = vector.shape_cast %40 : vector<128xf32> to vector<1x128xf32>
    %42 = tpu.iota {dimensions = array<i32: 0>} : vector<256x128xi32>
    %43 = vector.broadcast %41 : vector<1x128xf32> to vector<256x128xf32>
    %44 = arith.cmpf ole, %39, %43 : vector<256x128xf32>
    %c256_i32 = arith.constant 256 : i32
    %45 = vector.broadcast %c256_i32 : i32 to vector<256x128xi32>
    %46 = arith.select %44, %42, %45 : vector<256x128xi1>, vector<256x128xi32>
    %cst_31 = arith.constant dense<2147483647> : vector<128xi32>
    %47 = vector.multi_reduction <minsi>, %46, %cst_31 [0] : vector<256x128xi32> to vector<128xi32>
    %48 = vector.shape_cast %47 : vector<128xi32> to vector<1x128xi32>
    %c0_32 = arith.constant 0 : index
    %c0_33 = arith.constant 0 : index
    %c0_34 = arith.constant 0 : index
    %49 = vector.load %arg8[%c0_32, %c0_33, %c0_34] : memref<2x1x128xi32, #tpu.memory_space<vmem>>, vector<1x1x128xi32>
    %50 = vector.shape_cast %49 : vector<1x1x128xi32> to vector<1x128xi32>
    %51 = vector.shape_cast %48 : vector<1x128xi32> to vector<1x1x128xi32>
    tpu.vector_store %arg8[%c0_32, %c0_33, %c0_34], %51 {strides = array<i32>} : memref<2x1x128xi32, #tpu.memory_space<vmem>>, vector<1x1x128xi32>,
    %c1_35 = arith.constant 1 : index
    %c0_36 = arith.constant 0 : index
    %c0_37 = arith.constant 0 : index
    %52 = vector.load %arg1[%c1_35, %c0_36, %c0_37] : memref<2x136x16xbf16, #tpu.memory_space<vmem>>, vector<1x136x16xbf16>
    %53 = vector.shape_cast %52 : vector<1x136x16xbf16> to vector<136x16xbf16>
    %cst_38 = arith.constant dense<0.000000e+00> : vector<136x256xf32>
    %54 = tpu.matmul %53, %0, %cst_38 {dimension_numbers = #tpu.dot_dimension_numbers<[1], [0], [0], [1], [0, 0, 1, 1], [], []>} : vector<136x16xbf16>, vector<16x256xbf16>, vector<136x256xf32> -> vector<136x256xf32>
    %55 = vector.broadcast %1 : vector<1x256xf32> to vector<136x256xf32>
    %56 = arith.addf %54, %55 : vector<136x256xf32>
    %57 = arith.mulf %56, %56 : vector<136x256xf32>
    %58 = arith.mulf %56, %57 : vector<136x256xf32>
    %cst_39 = arith.constant 4.471500e-02 : f32
    %59 = vector.broadcast %cst_39 : f32 to vector<136x256xf32>
    %60 = arith.mulf %59, %58 : vector<136x256xf32>
    %61 = arith.addf %56, %60 : vector<136x256xf32>
    %cst_40 = arith.constant 0.797884583 : f32
    %62 = vector.broadcast %cst_40 : f32 to vector<136x256xf32>
    %63 = arith.mulf %62, %61 : vector<136x256xf32>
    %64 = math.tanh %63 : vector<136x256xf32>
    %cst_41 = arith.constant 1.000000e+00 : f32
    %65 = vector.broadcast %cst_41 : f32 to vector<136x256xf32>
    %66 = arith.addf %65, %64 : vector<136x256xf32>
    %cst_42 = arith.constant 5.000000e-01 : f32
    %67 = vector.broadcast %cst_42 : f32 to vector<136x256xf32>
    %68 = arith.mulf %67, %66 : vector<136x256xf32>
    %69 = arith.mulf %56, %68 : vector<136x256xf32>
    %70 = arith.truncf %69 : vector<136x256xf32> to vector<136x256xbf16>
    %c0_43 = arith.constant 0 : index
    %c0_44 = arith.constant 0 : index
    %71 = vector.load %arg9[%c0_43, %c0_44] : memref<136x256xbf16, #tpu.memory_space<vmem>>, vector<136x256xbf16>
    tpu.vector_store %arg9[%c0_43, %c0_44], %70 {strides = array<i32>} : memref<136x256xbf16, #tpu.memory_space<vmem>>, vector<136x256xbf16>,
    %c0_45 = arith.constant 0 : index
    %c0_46 = arith.constant 0 : index
    %72 = vector.load %arg9[%c0_45, %c0_46] : memref<136x256xbf16, #tpu.memory_space<vmem>>, vector<128x256xbf16>
    %cst_47 = arith.constant dense<0.000000e+00> : vector<128x128xf32>
    %73 = tpu.matmul %72, %3, %cst_47 {dimension_numbers = #tpu.dot_dimension_numbers<[1], [0], [0], [1], [0, 0, 1, 1], [], []>} : vector<128x256xbf16>, vector<256x128xbf16>, vector<128x128xf32> -> vector<128x128xf32>
    %c1_48 = arith.constant 1 : index
    %c0_49 = arith.constant 0 : index
    %74 = vector.load %arg9[%c1_48, %c0_49] : memref<136x256xbf16, #tpu.memory_space<vmem>>, vector<128x256xbf16>
    %cst_50 = arith.constant dense<0.000000e+00> : vector<128x128xf32>
    %75 = tpu.matmul %74, %5, %cst_50 {dimension_numbers = #tpu.dot_dimension_numbers<[1], [0], [0], [1], [0, 0, 1, 1], [], []>} : vector<128x256xbf16>, vector<256x128xbf16>, vector<128x128xf32> -> vector<128x128xf32>
    %76 = arith.addf %73, %75 : vector<128x128xf32>
    %77 = vector.broadcast %6 : vector<1x128xf32> to vector<128x128xf32>
    %78 = arith.addf %76, %77 : vector<128x128xf32>
    %79 = arith.truncf %78 : vector<128x128xf32> to vector<128x128xbf16>
    %cst_51 = arith.constant dense<0.000000e+00> : vector<256x128xf32>
    %80 = tpu.matmul %7, %79, %cst_51 {dimension_numbers = #tpu.dot_dimension_numbers<[1], [1], [0], [0], [0, 0, 1, 0], [], []>} : vector<256x128xbf16>, vector<128x128xbf16>, vector<256x128xf32> -> vector<256x128xf32>
    %81 = vector.broadcast %8 : vector<256x1xf32> to vector<256x128xf32>
    %82 = arith.addf %81, %80 : vector<256x128xf32>
    %cst_52 = arith.constant dense<0x7F800000> : vector<128xf32>
    %83 = vector.multi_reduction <minimumf>, %82, %cst_52 [0] : vector<256x128xf32> to vector<128xf32>
    %84 = vector.shape_cast %83 : vector<128xf32> to vector<1x128xf32>
    %85 = tpu.iota {dimensions = array<i32: 0>} : vector<256x128xi32>
    %86 = vector.broadcast %84 : vector<1x128xf32> to vector<256x128xf32>
    %87 = arith.cmpf ole, %82, %86 : vector<256x128xf32>
    %c256_i32_53 = arith.constant 256 : i32
    %88 = vector.broadcast %c256_i32_53 : i32 to vector<256x128xi32>
    %89 = arith.select %87, %85, %88 : vector<256x128xi1>, vector<256x128xi32>
    %cst_54 = arith.constant dense<2147483647> : vector<128xi32>
    %90 = vector.multi_reduction <minsi>, %89, %cst_54 [0] : vector<256x128xi32> to vector<128xi32>
    %91 = vector.shape_cast %90 : vector<128xi32> to vector<1x128xi32>
    %c1_55 = arith.constant 1 : index
    %c0_56 = arith.constant 0 : index
    %c0_57 = arith.constant 0 : index
    %92 = vector.load %arg8[%c1_55, %c0_56, %c0_57] : memref<2x1x128xi32, #tpu.memory_space<vmem>>, vector<1x1x128xi32>
    %93 = vector.shape_cast %92 : vector<1x1x128xi32> to vector<1x128xi32>
    %94 = vector.shape_cast %91 : vector<1x128xi32> to vector<1x1x128xi32>
    tpu.vector_store %arg8[%c1_55, %c0_56, %c0_57], %94 {strides = array<i32>} : memref<2x1x128xi32, #tpu.memory_space<vmem>>, vector<1x1x128xi32>,
    return
  }
  func.func @transform_0(%arg0: i32) -> (i32, i32, i32) {
    %c0_i32 = arith.constant 0 : i32
    %c0_i32_0 = arith.constant 0 : i32
    %c0_i32_1 = arith.constant 0 : i32
    return %arg0, %c0_i32, %c0_i32_0 : i32, i32, i32
  }
  func.func @transform_1(%arg0: i32) -> (i32, i32) {
    %c0_i32 = arith.constant 0 : i32
    %c0_i32_0 = arith.constant 0 : i32
    %c0_i32_1 = arith.constant 0 : i32
    return %c0_i32, %c0_i32_0 : i32, i32
  }
  func.func @transform_2(%arg0: i32) -> (i32, i32) {
    %c0_i32 = arith.constant 0 : i32
    %c0_i32_0 = arith.constant 0 : i32
    %c0_i32_1 = arith.constant 0 : i32
    return %c0_i32, %c0_i32_0 : i32, i32
  }
  func.func @transform_3(%arg0: i32) -> (i32, i32, i32) {
    %c0_i32 = arith.constant 0 : i32
    %c0_i32_0 = arith.constant 0 : i32
    %c0_i32_1 = arith.constant 0 : i32
    %c0_i32_2 = arith.constant 0 : i32
    return %c0_i32, %c0_i32_0, %c0_i32_1 : i32, i32, i32
  }
  func.func @transform_4(%arg0: i32) -> (i32, i32) {
    %c0_i32 = arith.constant 0 : i32
    %c0_i32_0 = arith.constant 0 : i32
    %c0_i32_1 = arith.constant 0 : i32
    return %c0_i32, %c0_i32_0 : i32, i32
  }
  func.func @transform_5(%arg0: i32) -> (i32, i32) {
    %c0_i32 = arith.constant 0 : i32
    %c0_i32_0 = arith.constant 0 : i32
    %c0_i32_1 = arith.constant 0 : i32
    return %c0_i32, %c0_i32_0 : i32, i32
  }
  func.func @transform_6(%arg0: i32) -> (i32, i32) {
    %c0_i32 = arith.constant 0 : i32
    %c0_i32_0 = arith.constant 0 : i32
    %c0_i32_1 = arith.constant 0 : i32
    return %c0_i32, %c0_i32_0 : i32, i32
  }
  func.func @transform_7(%arg0: i32) -> (i32, i32, i32) {
    %c0_i32 = arith.constant 0 : i32
    %c0_i32_0 = arith.constant 0 : i32
    %c0_i32_1 = arith.constant 0 : i32
    return %arg0, %c0_i32, %c0_i32_0 : i32, i32, i32
  }
}

</mosaic_0001>

<bundles_post_ra>
// kernel: flow1dvae_separate_encode.1
= control target key start
LH: loop header
LB: loop body
LE: loop exit
PB: predicated region body
PF: predicated region fallthrough
CT: control target
= control target key end

     0   :  { %s5120_s24 = smov 0   ;;  %s7483_s0 = inlined_call_operand.vmem [shape: bf16[4,136,16], index: 0, kind: input, shape index: {}]   ;;  %s7484_s1 = inlined_call_operand.vmem [shape: bf16[16,256], index: 1, kind: input, shape index: {}]   ;;  %s7485_s2 = inlined_call_operand.vmem [shape: f32[1,256], index: 2, kind: input, shape index: {}]   ;;  %s7486_s3 = inlined_call_operand.vmem [shape: bf16[2,256,128], index: 3, kind: input, shape index: {}]   ;;  %s7487_s4 = inlined_call_operand.vmem [shape: f32[1,128], index: 4, kind: input, shape index: {}]   ;;  %s7488_s5 = inlined_call_operand.vmem [shape: bf16[256,128], index: 5, kind: input, shape index: {}]   ;;  %s7489_s6 = inlined_call_operand.vmem [shape: f32[256,1], index: 6, kind: input, shape index: {}]   ;;  %s7490_s7 = inlined_call_operand.vmem [shape: s32[4,1,128], index: 7, kind: output, shape index: {}]  }
   0x1 LB: > { %s4085_s25 = sadd.s32 4294967295, %s5077_s24   ;;  %p4089_p0 = scmp.ge.s32.totalorder %s5077_s24, 1  ;;  %s5077_s24 = sphi %s5120_s24, %s17_s24  }
   0x2   : > { %p239_p1 = scmp.lt.s32.totalorder %s5077_s24, 3 }
   0x4   : > { %p240_p2 = pnand %p4089_p0, %p239_p1 }
   0x6   : > { %243 = sbr.rel (%p240_p2) target bundleno = 1337 (0x539), region = 48 }
   0xd   : > { %v5131_v0 = vld [vmem:[%s7484_s1 + $0x4] ss:$8 sps:$4 sm:$0xff]   ;;  %s4090_s28 = sshll.u32 %s4085_s25, 1  ;;  %v4782_v1 = vld [vmem:[%s7484_s1] ss:$8 sps:$4 sm:$0xff]   ;;  %v5079_v2 = vmov 0   ;;  %v435_v44 = vlaneseq }
   0xe   : > { %558 = vmatprep.mubr.bf16.mxu0 %v5079_v2  ;;  %p272_p3 = scmp.lt.s32.totalorder %s4090_s28, 3  ;;  %4778 = vset.pattern.permute.xlu0 %v5079_v2  ;;  %v4792_v3 = vld [vmem:[%s7486_s3 + $0x40] sm:$0xff]   ;;  %vm498_vm0 = vcmask 130048   ;;  %v4794_v5 = vld [vmem:[%s7486_s3 + $0x48] sm:$0xff]   ;;  %v4796_v16 = vld [vmem:[%s7486_s3 + $0x50] sm:$0xff]  }
   0xf   : > { %526 = vmatprep.subr.bf16.mxu0 %v5131_v0  ;;  %4779 = vset.pattern.permute.xlu1 %v5079_v2  ;;  %v4793_v4 = vld [vmem:[%s7486_s3] sm:$0xff]   ;;  %v4795_v7 = vld [vmem:[%s7486_s3 + $0x8] sm:$0xff]   ;;  %v4797_v17 = vld [vmem:[%s7486_s3 + $0x10] sm:$0xff]   ;;  %v5271_v45 = vshrl.u32 %v435_v44, 7  ;;  %vm1176_vm1 = vsmask.f32 7424 }
  0x10   : > { %527 = vmatpush1.bf16.msra.mxu0 %v4782_v1  ;;  %s7739_s28 = smov (!%p272_p3, %s4090_s28), 3  ;;  %v4798_v18 = vld [vmem:[%s7486_s3 + $0x58] sm:$0xff]   ;;  %v4800_v20 = vld [vmem:[%s7486_s3 + $0x60] sm:$0xff]   ;;  %v4804_v24 = vld [vmem:[%s7486_s3 + $0xc8] sm:$0xff]  }
  0x11   : > { %4432 = vmatprep.subr.bf16.mxu0 %v4792_v3  ;;  %s4768_s10 = smul.u32 68, %s7739_s28  ;;  %v4799_v19 = vld [vmem:[%s7486_s3 + $0x18] sm:$0xff]   ;;  %v4802_v21 = vld [vmem:[%s7486_s3 + $0xc0] sm:$0xff]   ;;  %v4805_v25 = vld [vmem:[%s7486_s3 + $0x88] sm:$0xff]   ;;  %v437_v46 = vsub.s32 0, %v5271_v45  ;;  %v441_v48 = vsub.s32 1, %v5271_v45  ;;  %s7097_s21 = scalar_lea.vmem %s7490_s7, %s7739_s28 }
  0x12   : > { %v4803_v22 = vld [vmem:[%s7486_s3 + $0x80] sm:$0xff]   ;;  %4368 = vmatprep.subr.bf16.mxu1 %v4802_v21  ;;  %v4806_v26 = vld [vmem:[%s7486_s3 + $0x68] sm:$0xff]   ;;  %v4808_v28 = vld [vmem:[%s7486_s3 + $0xd0] sm:$0xff]  }
  0x13   : > { %s5155_s17 = scalar_lea.vmem %s7483_s0, %s4768_s10  ;;  %v4801_v23 = vld [vmem:[%s7486_s3 + $0x20] sm:$0xff]   ;;  %4369 = vmatpush3.bf16.msra.mxu1 %v4803_v22  ;;  %v4807_v27 = vld [vmem:[%s7486_s3 + $0x28] sm:$0xff]   ;;  %v4809_v29 = vld [vmem:[%s7486_s3 + $0x90] sm:$0xff]  }
  0x14   : > { %v4783_v6 = vld [vmem:[%s5155_s17] sm:$0xff]   ;;  %v4784_v8 = vld [vmem:[%s5155_s17 + $0x8] sm:$0xff]   ;;  %v4785_v9 = vld [vmem:[%s5155_s17 + $0x10] sm:$0xff]   ;;  %4370 = vmatprep.subr.bf16.mxu1 %v4804_v24 }
  0x15   : > { %4136 = vmatmul.mubr.msk.bf16.vlgmr.msra.gmra.mrb[0].mxu0 %vm498_vm0, %v4783_v6  ;;  %v4786_v10 = vld [vmem:[%s5155_s17 + $0x18] sm:$0xff]   ;;  %v4787_v11 = vld [vmem:[%s5155_s17 + $0x20] sm:$0xff]   ;;  %v4788_v12 = vld [vmem:[%s5155_s17 + $0x28] sm:$0xff]  }
  0x16   : > { %568 = vmatprep.mubr.bf16.mxu0 %v5079_v2  ;;  %4433 = vmatpush3.bf16.msra.mxu0 %v4793_v4  ;;  %v4789_v13 = vld [vmem:[%s5155_s17 + $0x30] sm:$0xff]   ;;  %v4790_v14 = vld [vmem:[%s5155_s17 + $0x38] sm:$0xff]   ;;  %v4791_v15 = vld [vmem:[%s5155_s17 + $0x40] ss:$0 sps:$4 sm:$0xff]  }
  0x17   : > { %4434 = vmatprep.subr.bf16.mxu0 %v4794_v5  ;;  %4371 = vmatpush3.bf16.msra.mxu1 %v4805_v25  ;;  %v4810_v30 = vld [vmem:[%s7486_s3 + $0x70] sm:$0xff]   ;;  %v4811_v31 = vld [vmem:[%s7486_s3 + $0xd8] sm:$0xff]   ;;  %v4815_v35 = vld [vmem:[%s7486_s3 + $0xe0] sm:$0xff]  }
  0x18   : > { %4372 = vmatprep.subr.bf16.mxu1 %v4808_v28  ;;  %v4812_v32 = vld [vmem:[%s7486_s3 + $0x30] sm:$0xff]   ;;  %v4813_v33 = vld [vmem:[%s7486_s3 + $0x98] sm:$0xff]   ;;  %v4817_v37 = vld [vmem:[%s7486_s3 + $0xa0] sm:$0xff]  }
  0x19   : > { %v4814_v34 = vld [vmem:[%s7486_s3 + $0x78] sm:$0xff]   ;;  %v4818_v38 = vld [vmem:[%s7486_s3 + $0xe8] sm:$0xff]   ;;  %v4820_v40 = vld [vmem:[%s7486_s3 + $0xf0] sm:$0xff]  }
  0x1a   : > { %4435 = vmatpush3.bf16.msra.mxu0 %v4795_v7  ;;  %v4816_v36 = vld [vmem:[%s7486_s3 + $0x38] sm:$0xff]   ;;  %v4819_v39 = vld [vmem:[%s7486_s3 + $0xa8] sm:$0xff]   ;;  %v4821_v41 = vld [vmem:[%s7486_s3 + $0xb0] sm:$0xff]  }
  0x1b   : > { %4436 = vmatprep.subr.bf16.mxu0 %v4796_v16  ;;  %4373 = vmatpush3.bf16.msra.mxu1 %v4809_v29  ;;  %v4822_v42 = vld [vmem:[%s7486_s3 + $0xf8] sm:$0xff]   ;;  %v286_v47 = vld [vmem:[%s7485_s2] sm:$0x3] }
  0x1c   : > { %4374 = vmatprep.subr.bf16.mxu1 %v4811_v31  ;;  %v4823_v43 = vld [vmem:[%s7486_s3 + $0xb8] sm:$0xff]   ;;  %v5278_v49 = vrot.slane %v286_v47, %v437_v46  ;;  %v5280_v50 = vrot.slane %v286_v47, %v441_v48 }
  0x1d   : > { %4137 = vmatmul.mubr.msk.bf16.gmra.mrb[4].mxu0 %vm498_vm0, %v4784_v8 }
  0x1e   : > { %578 = vmatprep.mubr.bf16.mxu0 %v5079_v2  ;;  %4437 = vmatpush3.bf16.msra.mxu0 %v4797_v17 }
  0x1f   : > { %4438 = vmatprep.subr.bf16.mxu0 %v4798_v18  ;;  %4375 = vmatpush3.bf16.msra.mxu1 %v4813_v33 }
  0x20   : > { %4376 = vmatprep.subr.bf16.mxu1 %v4815_v35 }
  0x22   : > { %4439 = vmatpush3.bf16.msra.mxu0 %v4799_v19 }
  0x23   : > { %4440 = vmatprep.subr.bf16.mxu0 %v4800_v20  ;;  %4377 = vmatpush3.bf16.msra.mxu1 %v4817_v37 }
  0x24   : > { %4378 = vmatprep.subr.bf16.mxu1 %v4818_v38 }
  0x25   : > { %4138 = vmatmul.mubr.msk.bf16.gmra.mrb[8].mxu0 %vm498_vm0, %v4785_v9 }
  0x26   : > { %588 = vmatprep.mubr.bf16.mxu0 %v5079_v2  ;;  %4441 = vmatpush3.bf16.msra.mxu0 %v4801_v23 }
  0x27   : > { %4442 = vmatprep.subr.bf16.mxu0 %v4806_v26  ;;  %4379 = vmatpush3.bf16.msra.mxu1 %v4819_v39 }
  0x28   : > { %4380 = vmatprep.subr.bf16.mxu1 %v4820_v40 }
  0x2a   : > { %4443 = vmatpush3.bf16.msra.mxu0 %v4807_v27 }
  0x2b   : > { %4444 = vmatprep.subr.bf16.mxu0 %v4810_v30  ;;  %4381 = vmatpush3.bf16.msra.mxu1 %v4821_v41 }
  0x2c   : > { %4382 = vmatprep.subr.bf16.mxu1 %v4822_v42 }
  0x2d   : > { %4139 = vmatmul.mubr.msk.bf16.gmra.mrb[12].mxu0 %vm498_vm0, %v4786_v10 }
  0x2e   : > { %598 = vmatprep.mubr.bf16.mxu0 %v5079_v2  ;;  %4445 = vmatpush3.bf16.msra.mxu0 %v4812_v32 }
  0x2f   : > { %4446 = vmatprep.subr.bf16.mxu0 %v4814_v34  ;;  %4383 = vmatpush3.bf16.msra.mxu1 %v4823_v43 }
  0x32   : > { %4447 = vmatpush3.bf16.msra.mxu0 %v4816_v36 }
  0x33   : > { %2568 = vmatprep.subr.bf16.mxu0 %v5131_v0 }
  0x35   : > { %4140 = vmatmul.mubr.msk.bf16.gmra.mrb[16].mxu0 %vm498_vm0, %v4787_v11 }
  0x36   : > { %608 = vmatprep.mubr.bf16.mxu0 %v5079_v2 }
  0x3d   : > { %4141 = vmatmul.mubr.msk.bf16.gmra.mrb[20].mxu0 %vm498_vm0, %v4788_v12 }
  0x3e   : > { %618 = vmatprep.mubr.bf16.mxu0 %v5079_v2 }
  0x45   : > { %4142 = vmatmul.mubr.msk.bf16.gmra.mrb[24].mxu0 %vm498_vm0, %v4789_v13 }
  0x46   : > { %628 = vmatprep.mubr.bf16.mxu0 %v5079_v2 }
  0x4d   : > { %4143 = vmatmul.mubr.msk.bf16.gmra.mrb[28].mxu0 %vm498_vm0, %v4790_v14 }
  0x4e   : > { %638 = vmatprep.mubr.bf16.mxu0 %v5079_v2 }
  0x55   : > { %4144 = vmatmul.mubr.msk.bf16.gmra.mrb[32].mxu0 %vm498_vm0, %v4791_v15 }
  0xe8   : > { %v560_v51 = vpop.f32.mrb[0].mxu0 }
  0xe9   : > { %v5283_v52 = vadd.f32 %v560_v51, %v5278_v49  ;;  %v562_v53 = vpop.f32.mrb[1].mxu0 }
  0xea   : > { %v5286_v54 = vadd.f32 %v562_v53, %v5280_v50  ;;  %v564_v55 = vpop.f32.mrb[2].mxu0 }
  0xeb   : > { %v647_v56 = vmul.f32 %v5283_v52, %v5283_v52  ;;  %v5291_v57 = vadd.f32 %v564_v55, %v5278_v49  ;;  %v566_v58 = vpop.f32.mrb[3].mxu0 }
  0xec   : > { %v648_v59 = vmul.f32 %v5286_v54, %v5286_v54  ;;  %v5296_v60 = vadd.f32 %v566_v58, %v5280_v50 }
  0xed   : > { %v681_v61 = vmul.f32 %v647_v56, %v5283_v52  ;;  %v649_v62 = vmul.f32 %v5291_v57, %v5291_v57 }
  0xee   : > { %v682_v63 = vmul.f32 %v648_v59, %v5286_v54  ;;  %v650_v0 = vmul.f32 %v5296_v60, %v5296_v60 }
  0xef   : > { %v715_v1 = vmul.f32 0.044715, %v681_v61  ;;  %v683_v3 = vmul.f32 %v649_v62, %v5291_v57 }
  0xf0   : > { %v716_v4 = vmul.f32 0.044715, %v682_v63  ;;  %v684_v5 = vmul.f32 %v650_v0, %v5296_v60  ;;  %v570_v6 = vpop.f32.mrb[4].mxu0 }
  0xf1   : > { %v749_v7 = vadd.f32 %v715_v1, %v5283_v52  ;;  %v717_v8 = vmul.f32 0.044715, %v683_v3  ;;  %v5308_v9 = vadd.f32 %v570_v6, %v5278_v49  ;;  %v572_v10 = vpop.f32.mrb[5].mxu0 }
  0xf2   : > { %v750_v11 = vadd.f32 %v716_v4, %v5286_v54  ;;  %v718_v12 = vmul.f32 0.044715, %v684_v5  ;;  %v5312_v13 = vadd.f32 %v572_v10, %v5280_v50  ;;  %v574_v14 = vpop.f32.mrb[6].mxu0 }
  0xf3   : > { %v783_v15 = vmul.f32 0.7978846, %v749_v7  ;;  %v751_v16 = vadd.f32 %v717_v8, %v5291_v57  ;;  %v651_v17 = vmul.f32 %v5308_v9, %v5308_v9  ;;  %v5318_v18 = vadd.f32 %v574_v14, %v5278_v49  ;;  %v576_v19 = vpop.f32.mrb[7].mxu0 }
  0xf4   : > { %v784_v20 = vmul.f32 0.7978846, %v750_v11  ;;  %v752_v21 = vadd.f32 %v718_v12, %v5296_v60  ;;  %v652_v22 = vmul.f32 %v5312_v13, %v5312_v13  ;;  %v5324_v23 = vadd.f32 %v576_v19, %v5280_v50 }
  0xf5   : > { %4853 = vtanh.f32 %v783_v15  ;;  %v785_v24 = vmul.f32 0.7978846, %v751_v16  ;;  %v685_v25 = vmul.f32 %v651_v17, %v5308_v9  ;;  %v653_v26 = vmul.f32 %v5318_v18, %v5318_v18 }
  0xf6   : > { %4855 = vtanh.f32 %v784_v20  ;;  %v786_v27 = vmul.f32 0.7978846, %v752_v21  ;;  %v686_v28 = vmul.f32 %v652_v22, %v5312_v13  ;;  %v654_v29 = vmul.f32 %v5324_v23, %v5324_v23 }
  0xf7   : > { %4857 = vtanh.f32 %v785_v24  ;;  %v719_v30 = vmul.f32 0.044715, %v685_v25  ;;  %v687_v31 = vmul.f32 %v653_v26, %v5318_v18 }
  0xf8   : > { %4859 = vtanh.f32 %v786_v27  ;;  %v720_v32 = vmul.f32 0.044715, %v686_v28  ;;  %v688_v33 = vmul.f32 %v654_v29, %v5324_v23  ;;  %v580_v34 = vpop.f32.mrb[8].mxu0 }
  0xf9   : > { %v753_v35 = vadd.f32 %v719_v30, %v5308_v9  ;;  %v721_v36 = vmul.f32 0.044715, %v687_v31  ;;  %v5336_v37 = vadd.f32 %v580_v34, %v5278_v49  ;;  %v582_v38 = vpop.f32.mrb[9].mxu0 }
  0xfa   : > { %v754_v39 = vadd.f32 %v720_v32, %v5312_v13  ;;  %v722_v40 = vmul.f32 0.044715, %v688_v33  ;;  %v5340_v41 = vadd.f32 %v582_v38, %v5280_v50  ;;  %v584_v42 = vpop.f32.mrb[10].mxu0 }
  0xfb   : > { %v787_v43 = vmul.f32 0.7978846, %v753_v35  ;;  %v755_v44 = vadd.f32 %v721_v36, %v5318_v18  ;;  %v655_v46 = vmul.f32 %v5336_v37, %v5336_v37  ;;  %v5346_v47 = vadd.f32 %v584_v42, %v5278_v49  ;;  %v586_v48 = vpop.f32.mrb[11].mxu0 }
  0xfc   : > { %v788_v51 = vmul.f32 0.7978846, %v754_v39  ;;  %v756_v53 = vadd.f32 %v722_v40, %v5324_v23  ;;  %v656_v55 = vmul.f32 %v5340_v41, %v5340_v41  ;;  %v5352_v56 = vadd.f32 %v586_v48, %v5280_v50 }
  0xfd   : > { %4861 = vtanh.f32 %v787_v43  ;;  %v789_v58 = vmul.f32 0.7978846, %v755_v44  ;;  %v689_v59 = vmul.f32 %v655_v46, %v5336_v37  ;;  %v657_v61 = vmul.f32 %v5346_v47, %v5346_v47 }
  0xfe   : > { %4863 = vtanh.f32 %v788_v51  ;;  %v790_v62 = vmul.f32 0.7978846, %v756_v53  ;;  %v690_v63 = vmul.f32 %v656_v55, %v5340_v41  ;;  %v658_v0 = vmul.f32 %v5352_v56, %v5352_v56 }
  0xff   : > { %v4854_v1 = vpop.eup %4853  ;;  %4865 = vtanh.f32 %v789_v58  ;;  %v723_v3 = vmul.f32 0.044715, %v689_v59  ;;  %v691_v4 = vmul.f32 %v657_v61, %v5346_v47 }
 0x100   : > { %v4856_v5 = vpop.eup %4855  ;;  %v851_v6 = vadd.f32 1.0, %v4854_v1  ;;  %4867 = vtanh.f32 %v790_v62  ;;  %v724_v7 = vmul.f32 0.044715, %v690_v63  ;;  %v692_v8 = vmul.f32 %v658_v0, %v5352_v56  ;;  %v590_v10 = vpop.f32.mrb[12].mxu0 }
 0x101   : > { %v4858_v11 = vpop.eup %4857  ;;  %v852_v12 = vadd.f32 1.0, %v4856_v5  ;;  %v757_v14 = vadd.f32 %v723_v3, %v5336_v37  ;;  %v725_v15 = vmul.f32 0.044715, %v691_v4  ;;  %v5364_v16 = vadd.f32 %v590_v10, %v5278_v49  ;;  %v592_v17 = vpop.f32.mrb[13].mxu0 }
 0x102   : > { %v4860_v19 = vpop.eup %4859  ;;  %v885_v20 = vmul.f32 0.5, %v851_v6  ;;  %v853_v21 = vadd.f32 1.0, %v4858_v11  ;;  %v758_v22 = vadd.f32 %v724_v7, %v5340_v41  ;;  %v726_v24 = vmul.f32 0.044715, %v692_v8  ;;  %v594_v25 = vpop.f32.mrb[14].mxu0 }
 0x103   : > { %v886_v26 = vmul.f32 0.5, %v852_v12  ;;  %v854_v27 = vadd.f32 1.0, %v4860_v19  ;;  %v791_v28 = vmul.f32 0.7978846, %v757_v14  ;;  %v759_v29 = vadd.f32 %v725_v15, %v5346_v47  ;;  %v596_v30 = vpop.f32.mrb[15].mxu0 }
 0x104   : > { %v5369_v31 = vmul.f32 %v885_v20, %v5283_v52  ;;  %v887_v32 = vmul.f32 0.5, %v853_v21  ;;  %v792_v33 = vmul.f32 0.7978846, %v758_v22  ;;  %v760_v34 = vadd.f32 %v726_v24, %v5352_v56 }
 0x105   : > { %v5373_v35 = vmul.f32 %v886_v26, %v5286_v54  ;;  %v888_v36 = vmul.f32 0.5, %v854_v27  ;;  %4869 = vtanh.f32 %v791_v28  ;;  %v793_v38 = vmul.f32 0.7978846, %v759_v29 }
 0x106   : > { %v5376_v39 = vmul.f32 %v887_v32, %v5291_v57  ;;  %4871 = vtanh.f32 %v792_v33  ;;  %v794_v40 = vmul.f32 0.7978846, %v760_v34  ;;  %v659_v42 = vmul.f32 %v5364_v16, %v5364_v16 }
 0x107   : > { %v4862_v52 = vpop.eup %4861  ;;  %v5381_v43 = vmul.f32 %v888_v36, %v5296_v60  ;;  %4873 = vtanh.f32 %v793_v38  ;;  %v5384_v44 = vadd.f32 %v592_v17, %v5280_v50  ;;  %v5388_v57 = vadd.f32 %v594_v25, %v5278_v49 }
 0x108   : > { %v4864_v54 = vpop.eup %4863  ;;  %v855_v46 = vadd.f32 1.0, %v4862_v52  ;;  %4875 = vtanh.f32 %v794_v40  ;;  %v693_v48 = vmul.f32 %v659_v42, %v5364_v16  ;;  %v600_v51 = vpop.f32.mrb[16].mxu0  ;;  %v5393_v60 = vadd.f32 %v596_v30, %v5280_v50 }
 0x109   : > { %v4866_v53 = vpop.eup %4865  ;;  %v856_v55 = vadd.f32 1.0, %v4864_v54  ;;  %v660_v58 = vmul.f32 %v5384_v44, %v5384_v44  ;;  %v602_v59 = vpop.f32.mrb[17].mxu0  ;;  %v661_v1 = vmul.f32 %v5388_v57, %v5388_v57 }
 0x10a   : > { %v4868_v61 = vpop.eup %4867  ;;  %v889_v62 = vmul.f32 0.5, %v855_v46  ;;  %v857_v63 = vadd.f32 1.0, %v4866_v53  ;;  %v727_v0 = vmul.f32 0.044715, %v693_v48  ;;  %v604_v3 = vpop.f32.mrb[18].mxu0  ;;  %v662_v7 = vmul.f32 %v5393_v60, %v5393_v60 }
 0x10b   : > { %v890_v4 = vmul.f32 0.5, %v856_v55  ;;  %v858_v5 = vadd.f32 1.0, %v4868_v61  ;;  %v694_v6 = vmul.f32 %v660_v58, %v5384_v44  ;;  %v606_v8 = vpop.f32.mrb[19].mxu0  ;;  %v695_v14 = vmul.f32 %v661_v1, %v5388_v57 }
 0x10c   : > { %v5401_v10 = vmul.f32 %v889_v62, %v5308_v9  ;;  %v891_v11 = vmul.f32 0.5, %v857_v63  ;;  %v761_v12 = vadd.f32 %v727_v0, %v5364_v16  ;;  %v696_v20 = vmul.f32 %v662_v7, %v5393_v60 }
 0x10d   : > { %v5406_v15 = vmul.f32 %v890_v4, %v5312_v13  ;;  %v892_v17 = vmul.f32 0.5, %v858_v5  ;;  %v728_v19 = vmul.f32 0.044715, %v694_v6  ;;  %v729_v24 = vmul.f32 0.044715, %v695_v14 }
 0x10e   : > { %v5410_v21 = vmul.f32 %v891_v11, %v5318_v18  ;;  %v795_v22 = vmul.f32 0.7978846, %v761_v12  ;;  %v5413_v9 = vadd.f32 %v600_v51, %v5278_v49  ;;  %v730_v13 = vmul.f32 0.044715, %v696_v20 }
 0x10f   : > { %v4870_v25 = vpop.eup %4869  ;;  %v5416_v26 = vmul.f32 %v892_v17, %v5324_v23  ;;  %v762_v27 = vadd.f32 %v728_v19, %v5384_v44  ;;  %v763_v30 = vadd.f32 %v729_v24, %v5388_v57  ;;  %v5431_v4 = vadd.f32 %v602_v59, %v5280_v50 }
 0x110   : > { %v4872_v28 = vpop.eup %4871  ;;  %v859_v29 = vadd.f32 1.0, %v4870_v25  ;;  %4877 = vtanh.f32 %v795_v22  ;;  %v663_v18 = vmul.f32 %v5413_v9, %v5413_v9  ;;  %v610_v32 = vpop.f32.mrb[20].mxu0  ;;  %v764_v38 = vadd.f32 %v730_v13, %v5393_v60 }
 0x111   : > { %v4874_v33 = vpop.eup %4873  ;;  %v860_v34 = vadd.f32 1.0, %v4872_v28  ;;  %v796_v36 = vmul.f32 0.7978846, %v762_v27  ;;  %v612_v40 = vpop.f32.mrb[21].mxu0  ;;  %v797_v54 = vmul.f32 0.7978846, %v763_v30  ;;  %v5438_v7 = vadd.f32 %v604_v3, %v5278_v49 }
 0x112   : > { %v4876_v23 = vpop.eup %4875  ;;  %v893_v42 = vmul.f32 0.5, %v859_v29  ;;  %v861_v52 = vadd.f32 1.0, %v4874_v33  ;;  %v697_v46 = vmul.f32 %v663_v18, %v5413_v9  ;;  %v614_v48 = vpop.f32.mrb[22].mxu0  ;;  %v798_v55 = vmul.f32 0.7978846, %v764_v38 }
 0x113   : > { %v894_v51 = vmul.f32 0.5, %v860_v34  ;;  %v862_v53 = vadd.f32 1.0, %v4876_v23  ;;  %4879 = vtanh.f32 %v796_v36  ;;  %v616_v58 = vpop.f32.mrb[23].mxu0  ;;  %v5449_v59 = vadd.f32 %v610_v32, %v5278_v49 }
 0x114   : > { %v5425_v61 = vmul.f32 %v893_v42, %v5336_v37  ;;  %v895_v62 = vmul.f32 0.5, %v861_v52  ;;  %4881 = vtanh.f32 %v797_v54  ;;  %v731_v63 = vmul.f32 0.044715, %v697_v46 }
 0x115   : > { %v5428_v0 = vmul.f32 %v894_v51, %v5340_v41  ;;  %v896_v1 = vmul.f32 0.5, %v862_v53  ;;  %4883 = vtanh.f32 %v798_v55  ;;  %v5441_v37 = vadd.f32 %v606_v8, %v5280_v50 }
 0x116   : > { %v5434_v5 = vmul.f32 %v895_v62, %v5346_v47  ;;  %v765_v6 = vadd.f32 %v731_v63, %v5413_v9  ;;  %v664_v41 = vmul.f32 %v5431_v4, %v5431_v4  ;;  %v665_v47 = vmul.f32 %v5438_v7, %v5438_v7 }
 0x117   : > { %v5444_v11 = vmul.f32 %v896_v1, %v5352_v56  ;;  %v666_v3 = vmul.f32 %v5441_v37, %v5441_v37  ;;  %v5456_v14 = vadd.f32 %v612_v40, %v5280_v50  ;;  %v667_v17 = vmul.f32 %v5449_v59, %v5449_v59 }
 0x118   : > { %v799_v12 = vmul.f32 0.7978846, %v765_v6  ;;  %v5458_v8 = vpop.f32.mrb[24].mxu0  ;;  %v698_v56 = vmul.f32 %v664_v41, %v5431_v4  ;;  %v5464_v19 = vadd.f32 %v614_v48, %v5278_v49  ;;  %v699_v24 = vmul.f32 %v665_v47, %v5438_v7 }
 0x119   : > { %v5466_v20 = vpop.f32.mrb[25].mxu0  ;;  %v700_v25 = vmul.f32 %v666_v3, %v5441_v37  ;;  %v668_v27 = vmul.f32 %v5456_v14, %v5456_v14  ;;  %v701_v30 = vmul.f32 %v667_v17, %v5449_v59  ;;  %v5477_v38 = vadd.f32 %v616_v58, %v5280_v50 }
 0x11a   : > { %v4878_v22 = vpop.eup %4877  ;;  %4885 = vtanh.f32 %v799_v12  ;;  %v624_v13 = vpop.f32.mrb[26].mxu0  ;;  %v732_v29 = vmul.f32 0.044715, %v698_v56  ;;  %v669_v18 = vmul.f32 %v5464_v19, %v5464_v19  ;;  %v733_v33 = vmul.f32 0.044715, %v699_v24 }
 0x11b   : > { %v863_v28 = vadd.f32 1.0, %v4878_v22  ;;  %v626_v32 = vpop.f32.mrb[27].mxu0  ;;  %v734_v34 = vmul.f32 0.044715, %v700_v25  ;;  %v702_v36 = vmul.f32 %v668_v27, %v5456_v14  ;;  %v735_v52 = vmul.f32 0.044715, %v701_v30 }
 0x11c   : > { %v766_v42 = vadd.f32 %v732_v29, %v5431_v4  ;;  %v703_v54 = vmul.f32 %v669_v18, %v5464_v19  ;;  %v767_v51 = vadd.f32 %v733_v33, %v5438_v7  ;;  %v670_v18 = vmul.f32 %v5477_v38, %v5477_v38 }
 0x11d   : > { %v4880_v40 = vpop.eup %4879  ;;  %v897_v23 = vmul.f32 0.5, %v863_v28  ;;  %v768_v53 = vadd.f32 %v734_v34, %v5441_v37  ;;  %v736_v55 = vmul.f32 0.044715, %v702_v36  ;;  %v769_v6 = vadd.f32 %v735_v52, %v5449_v59 }
 0x11e   : > { %v4882_v46 = vpop.eup %4881  ;;  %v864_v48 = vadd.f32 1.0, %v4880_v40  ;;  %v800_v1 = vmul.f32 0.7978846, %v766_v42  ;;  %v801_v47 = vmul.f32 0.7978846, %v767_v51  ;;  %v5507_v42 = vpack.c.bf16 %v5376_v39, %v5369_v31 }
 0x11f   : > { %v4884_v62 = vpop.eup %4883  ;;  %v5484_v63 = vmul.f32 %v897_v23, %v5364_v16  ;;  %v865_v58 = vadd.f32 1.0, %v4882_v46  ;;  %v802_v3 = vmul.f32 0.7978846, %v768_v53  ;;  %v803_v17 = vmul.f32 0.7978846, %v769_v6 }
 0x120   : > { %v898_v41 = vmul.f32 0.5, %v864_v48  ;;  %v866_v12 = vadd.f32 1.0, %v4884_v62  ;;  %4887 = vtanh.f32 %v800_v1  ;;  %v770_v22 = vadd.f32 %v736_v55, %v5456_v14  ;;  %v630_v24 = vpop.f32.mrb[28].mxu0 }
 0x121   : > { %v899_v56 = vmul.f32 0.5, %v865_v58  ;;  %4889 = vtanh.f32 %v801_v47  ;;  %v737_v16 = vmul.f32 0.044715, %v703_v54  ;;  %v632_v28 = vpop.f32.mrb[29].mxu0  ;;  %v5511_v54 = vpack.c.bf16 %v5381_v43, %v5373_v35 }
 0x122   : > { %v5489_v25 = vmul.f32 %v898_v41, %v5384_v44  ;;  %v900_v27 = vmul.f32 0.5, %v866_v12  ;;  %4891 = vtanh.f32 %v802_v3  ;;  %v804_v30 = vmul.f32 0.7978846, %v770_v22  ;;  %v5496_v33 = vpop.f32.mrb[30].mxu0 }
 0x123   : > { %v5492_v29 = vmul.f32 %v899_v56, %v5388_v57  ;;  %4893 = vtanh.f32 %v803_v17  ;;  %v771_v44 = vadd.f32 %v737_v16, %v5464_v19  ;;  %v5502_v40 = vpop.f32.mrb[31].mxu0  ;;  %v704_v57 = vmul.f32 %v670_v18, %v5477_v38  ;;  %1730 = vmatprep.mubr.bf16.mxu0 %v5511_v54  ;;  %v4989_v56 = vld [vmem:[%s7484_s1] ss:$8 sps:$4 sm:$0xff]  }
 0x124   : > { %v4886_v34 = vpop.eup %4885  ;;  %v5499_v36 = vmul.f32 %v900_v27, %v5393_v60  ;;  %4895 = vtanh.f32 %v804_v30  ;;  %v5515_v60 = vadd.f32 %v5458_v8, %v5278_v49  ;;  %v5519_v51 = vadd.f32 %v5466_v20, %v5280_v50  ;;  %1731 = vmatmul.mubr.bf16.vlgmr.msra.gmra.mrb[36].mxu0 %v5507_v42  ;;  %v4990_v27 = vld [vmem:[%s7486_s3 + $0x40] sm:$0xff]  }
 0x125   : > { %v867_v23 = vadd.f32 1.0, %v4886_v34  ;;  %v805_v52 = vmul.f32 0.7978846, %v771_v44  ;;  %v738_v48 = vmul.f32 0.044715, %v704_v57  ;;  %v5522_v53 = vadd.f32 %v624_v13, %v5278_v49  ;;  %2569 = vmatpush1.bf16.msra.mxu0 %v4989_v56 }
 0x126   : > { %v671_v31 = vmul.f32 %v5515_v60, %v5515_v60  ;;  %v5528_v35 = vadd.f32 %v626_v32, %v5280_v50  ;;  %v5532_v39 = vpack.c.bf16 %v5416_v26, %v5406_v15  ;;  %v672_v13 = vmul.f32 %v5519_v51, %v5519_v51  ;;  %4584 = vmatprep.subr.bf16.mxu0 %v4990_v27 }
 0x127   : > { %v901_v46 = vmul.f32 0.5, %v867_v23  ;;  %4897 = vtanh.f32 %v805_v52  ;;  %v772_v20 = vadd.f32 %v738_v48, %v5477_v38  ;;  %v673_v32 = vmul.f32 %v5522_v53, %v5522_v53 }
 0x128   : > { %v5534_v43 = vpop.f32.mrb[32].mxu0  ;;  %v705_v15 = vmul.f32 %v671_v31, %v5515_v60  ;;  %v674_v26 = vmul.f32 %v5528_v35, %v5528_v35  ;;  %1738 = vmatprep.mubr.bf16.mxu0 %v5532_v39  ;;  %v5556_v62 = vadd.f32 %v630_v24, %v5278_v49  ;;  %v706_v41 = vmul.f32 %v672_v13, %v5519_v51 }
 0x129   : > { %v5537_v8 = vmul.f32 %v901_v46, %v5413_v9  ;;  %v5545_v55 = vpop.f32.mrb[33].mxu0  ;;  %v5553_v9 = vpack.c.bf16 %v5410_v21, %v5401_v10  ;;  %v806_v6 = vmul.f32 0.7978846, %v772_v20  ;;  %v707_v12 = vmul.f32 %v673_v32, %v5522_v53 }
 0x12a   : > { %v644_v58 = vpop.f32.mrb[34].mxu0  ;;  %v4888_v1 = vpop.eup %4887  ;;  %v5561_v47 = vadd.f32 %v632_v28, %v5280_v50  ;;  %v739_v17 = vmul.f32 0.044715, %v705_v15  ;;  %v708_v22 = vmul.f32 %v674_v26, %v5528_v35  ;;  %v675_v24 = vmul.f32 %v5556_v62, %v5556_v62 }
 0x12b   : > { %v645_v3 = vpop.f32.mrb[35].mxu0  ;;  %v4890_v10 = vpop.eup %4889  ;;  %v868_v21 = vadd.f32 1.0, %v4888_v1  ;;  %4899 = vtanh.f32 %v806_v6  ;;  %v740_v30 = vmul.f32 0.044715, %v706_v41  ;;  %v741_v18 = vmul.f32 0.044715, %v707_v12 }
 0x12c   : > { %v4892_v16 = vpop.eup %4891  ;;  %v869_v28 = vadd.f32 1.0, %v4890_v10  ;;  %v773_v57 = vadd.f32 %v739_v17, %v5515_v60  ;;  %v742_v52 = vmul.f32 0.044715, %v708_v22  ;;  %1739 = vmatmul.mubr.bf16.gmra.mrb[40].mxu0 %v5553_v9  ;;  %v709_v22 = vmul.f32 %v675_v24, %v5556_v62 }
 0x12d   : > { %v4894_v34 = vpop.eup %4893  ;;  %v902_v44 = vmul.f32 0.5, %v868_v21  ;;  %v870_v23 = vadd.f32 1.0, %v4892_v16  ;;  %v774_v20 = vadd.f32 %v740_v30, %v5519_v51  ;;  %v775_v13 = vadd.f32 %v741_v18, %v5522_v53 }
 0x12e   : > { %v4896_v46 = vpop.eup %4895  ;;  %v903_v48 = vmul.f32 0.5, %v869_v28  ;;  %v871_v31 = vadd.f32 1.0, %v4894_v34  ;;  %v807_v58 = vmul.f32 0.7978846, %v773_v57  ;;  %v5597_v28 = vadd.f32 %v5496_v33, %v5278_v49 }
 0x12f   : > { %v5576_v32 = vmul.f32 %v902_v44, %v5431_v4  ;;  %v904_v15 = vmul.f32 0.5, %v870_v23  ;;  %v872_v26 = vadd.f32 1.0, %v4896_v46  ;;  %v808_v41 = vmul.f32 0.7978846, %v774_v20 }
 0x130   : > { %v5579_v1 = vmul.f32 %v903_v48, %v5438_v7  ;;  %v905_v6 = vmul.f32 0.5, %v871_v31  ;;  %v809_v12 = vmul.f32 0.7978846, %v775_v13  ;;  %4901 = vtanh.f32 %v807_v58 }
 0x131   : > { %v4898_v3 = vpop.eup %4897  ;;  %v5583_v56 = vmul.f32 %v904_v15, %v5441_v37  ;;  %v906_v10 = vmul.f32 0.5, %v872_v26  ;;  %4903 = vtanh.f32 %v808_v41  ;;  %v776_v7 = vadd.f32 %v742_v52, %v5528_v35 }
 0x132   : > { %v5586_v4 = vmul.f32 %v905_v6, %v5449_v59  ;;  %v873_v21 = vadd.f32 1.0, %v4898_v3  ;;  %4905 = vtanh.f32 %v809_v12  ;;  %v676_v37 = vmul.f32 %v5561_v47, %v5561_v47 }
 0x133   : > { %v5590_v17 = vmul.f32 %v906_v10, %v5456_v14  ;;  %v810_v16 = vmul.f32 0.7978846, %v776_v7  ;;  %v743_v59 = vmul.f32 0.044715, %v709_v22  ;;  %v1190_v30 = vshrl.u32 %v5511_v54, 16 }
 0x134   : > { %v907_v27 = vmul.f32 0.5, %v873_v21  ;;  %v1192_v18 = vshll.u32 %v5511_v54, 16  ;;  %v710_v24 = vmul.f32 %v676_v37, %v5561_v47  ;;  %v677_v44 = vmul.f32 %v5597_v28, %v5597_v28 }
 0x135   : > { %v4900_v34 = vpop.eup %4899  ;;  %4907 = vtanh.f32 %v810_v16  ;;  %v777_v57 = vadd.f32 %v743_v59, %v5556_v62  ;;  %v1197_v52 = vshll.u32 %v5532_v39, 16  ;;  %v5612_v54 = vadd.f32 %v5502_v40, %v5280_v50 }
 0x136   : > { %v5602_v14 = vmul.f32 %v907_v27, %v5464_v19  ;;  %v874_v23 = vadd.f32 1.0, %v4900_v34  ;;  %v1194_v33 = vrot.slane %v1192_v18, 1  ;;  %v744_v46 = vmul.f32 0.044715, %v710_v24 }
 0x137   : > { %v711_v48 = vmul.f32 %v677_v44, %v5597_v28  ;;  %v1178_v19 = vshrl.u32 %v5507_v42, 16  ;;  %v811_v20 = vmul.f32 0.7978846, %v777_v57  ;;  %v1199_v15 = vrot.slane %v1197_v52, 1 }
 0x138   : > { %v908_v31 = vmul.f32 0.5, %v874_v23  ;;  %v1195_v13 = vor.u32 %v1194_v33, %v1190_v30  ;;  %v778_v26 = vadd.f32 %v744_v46, %v5561_v47  ;;  %v678_v6 = vmul.f32 %v5612_v54, %v5612_v54 }
 0x139   : > { %v745_v58 = vmul.f32 0.044715, %v711_v48  ;;  %v1180_v41 = vshll.u32 %v5507_v42, 16  ;;  %4909 = vtanh.f32 %v811_v20  ;;  %v1185_v10 = vshll.u32 %v5553_v9, 16 }
 0x13a   : > { %v4902_v12 = vpop.eup %4901  ;;  %v5620_v3 = vmul.f32 %v908_v31, %v5477_v38  ;;  %v1200_v40 = vsel %vm1176_vm1, %v1195_v13, %v1199_v15  ;;  %v812_v22 = vmul.f32 0.7978846, %v778_v26  ;;  %v712_v16 = vmul.f32 %v678_v6, %v5612_v54 }
 0x13b   : > { %v4904_v21 = vpop.eup %4903  ;;  %v875_v7 = vadd.f32 1.0, %v4902_v12  ;;  %v779_v27 = vadd.f32 %v745_v58, %v5597_v28  ;;  %1457 = vmatprep.mubr.bf16.mxu1 %v1200_v40  ;;  %v1182_v42 = vrot.slane %v1180_v41, 1  ;;  %v1187_v30 = vrot.slane %v1185_v10, 1 }
 0x13c   : > { %v4906_v37 = vpop.eup %4905  ;;  %v876_v59 = vadd.f32 1.0, %v4904_v21  ;;  %4911 = vtanh.f32 %v812_v22  ;;  %v746_v44 = vmul.f32 0.044715, %v712_v16  ;;  %v5043_v57 = vpack.c.bf16 %v5444_v11, %v5428_v0 }
 0x13d   : > { %v909_v18 = vmul.f32 0.5, %v875_v7  ;;  %v877_v38 = vadd.f32 1.0, %v4906_v37  ;;  %v813_v34 = vmul.f32 0.7978846, %v779_v27  ;;  %v1183_v23 = vor.u32 %v1182_v42, %v1178_v19 }
 0x13e   : > { %v910_v24 = vmul.f32 0.5, %v876_v59  ;;  %v5044_v48 = vpack.c.bf16 %v5434_v5, %v5425_v61  ;;  %v780_v13 = vadd.f32 %v746_v44, %v5612_v54  ;;  %1746 = vmatprep.mubr.bf16.mxu0 %v5043_v57  ;;  %v5643_v11 = vadd.f32 %v5534_v43, %v5278_v49 }
 0x13f   : > { %v4908_v33 = vpop.eup %4907  ;;  %v5629_v52 = vmul.f32 %v909_v18, %v5515_v60  ;;  %v911_v46 = vmul.f32 0.5, %v877_v38  ;;  %4913 = vtanh.f32 %v813_v34  ;;  %v1188_v19 = vsel %vm1176_vm1, %v1183_v23, %v1187_v30 }
 0x140   : > { %v5634_v31 = vmul.f32 %v910_v24, %v5519_v51  ;;  %v878_v20 = vadd.f32 1.0, %v4908_v33  ;;  %1458 = vmatmul.mubr.bf16.vlgmr.msra.gmra.mrb[0].mxu1 %v1188_v19  ;;  %1747 = vmatmul.mubr.bf16.gmra.mrb[44].mxu0 %v5044_v48  ;;  %v5647_v61 = vadd.f32 %v5545_v55, %v5280_v50  ;;  %v1209_v5 = vshrl.u32 %v5532_v39, 16 }
 0x141   : > { %v5639_v0 = vmul.f32 %v911_v46, %v5522_v53  ;;  %v814_v51 = vmul.f32 0.7978846, %v780_v13  ;;  %v1213_v26 = vshll.u32 %v5043_v57, 16  ;;  %v679_v58 = vmul.f32 %v5643_v11, %v5643_v11 }
 0x142   : > { %v912_v60 = vmul.f32 0.5, %v878_v20  ;;  %v680_v53 = vmul.f32 %v5647_v61, %v5647_v61  ;;  %v1211_v6 = vor.u32 %v1209_v5, %v1199_v15  ;;  %v1201_v41 = vshrl.u32 %v5553_v9, 16 }
 0x143   : > { %v4910_v43 = vpop.eup %4909  ;;  %4915 = vtanh.f32 %v814_v51  ;;  %v1215_v55 = vrot.slane %v1213_v26, 1  ;;  %v1205_v40 = vshll.u32 %v5044_v48, 16  ;;  %v713_v10 = vmul.f32 %v679_v58, %v5643_v11 }
 0x144   : > { %v5656_v12 = vmul.f32 %v912_v60, %v5528_v35  ;;  %v879_v39 = vadd.f32 1.0, %v4910_v43  ;;  %v714_v21 = vmul.f32 %v680_v53, %v5647_v61  ;;  %v1203_v7 = vor.u32 %v1201_v41, %v1187_v30 }
 0x145   : > { %v1216_v22 = vsel %vm1176_vm1, %v1211_v6, %v1215_v55  ;;  %v1207_v27 = vrot.slane %v1205_v40, 1  ;;  %v5045_v15 = vpack.c.bf16 %v5499_v36, %v5489_v25  ;;  %v747_v37 = vmul.f32 0.044715, %v713_v10 }
 0x146   : > { %v4912_v9 = vpop.eup %4911  ;;  %v913_v16 = vmul.f32 0.5, %v879_v39  ;;  %v748_v35 = vmul.f32 0.044715, %v714_v21  ;;  %1465 = vmatprep.mubr.bf16.mxu1 %v1216_v22  ;;  %v5046_v59 = vpack.c.bf16 %v5492_v29, %v5484_v63  ;;  %v1225_v38 = vshrl.u32 %v5043_v57, 16 }
 0x147   : > { %v880_v42 = vadd.f32 1.0, %v4912_v9  ;;  %v1208_v18 = vsel %vm1176_vm1, %v1203_v7, %v1207_v27  ;;  %1754 = vmatprep.mubr.bf16.mxu0 %v5045_v15  ;;  %v1229_v30 = vshll.u32 %v5045_v15, 16  ;;  %v781_v25 = vadd.f32 %v747_v37, %v5643_v11 }
 0x148   : > { %v5667_v24 = vmul.f32 %v913_v16, %v5556_v62  ;;  %v782_v36 = vadd.f32 %v748_v35, %v5647_v61  ;;  %1466 = vmatmul.mubr.bf16.gmra.mrb[4].mxu1 %v1208_v18  ;;  %1755 = vmatmul.mubr.bf16.gmra.mrb[48].mxu0 %v5046_v59  ;;  %v1217_v44 = vshrl.u32 %v5044_v48, 16  ;;  %v1227_v63 = vor.u32 %v1225_v38, %v1215_v55 }
 0x149   : > { %v4914_v34 = vpop.eup %4913  ;;  %v914_v23 = vmul.f32 0.5, %v880_v42  ;;  %v1231_v29 = vrot.slane %v1229_v30, 1  ;;  %v815_v46 = vmul.f32 0.7978846, %v781_v25  ;;  %v1221_v57 = vshll.u32 %v5046_v59, 16 }
 0x14a   : > { %v881_v33 = vadd.f32 1.0, %v4914_v34  ;;  %v816_v20 = vmul.f32 0.7978846, %v782_v36  ;;  %v1219_v13 = vor.u32 %v1217_v44, %v1207_v27  ;;  %v5047_v60 = vpack.c.bf16 %v5583_v56, %v5576_v32 }
 0x14b   : > { %v948_v19 = vmul.f32 %v914_v23, %v5561_v47  ;;  %v1232_v62 = vsel %vm1176_vm1, %v1227_v63, %v1231_v29  ;;  %4917 = vtanh.f32 %v815_v46  ;;  %v1223_v51 = vrot.slane %v1221_v57, 1 }
 0x14c   : > { %v915_v5 = vmul.f32 0.5, %v881_v33  ;;  %1473 = vmatprep.mubr.bf16.mxu1 %v1232_v62  ;;  %v5048_v48 = vpack.c.bf16 %v5579_v1, %v5537_v8  ;;  %v1241_v26 = vshrl.u32 %v5045_v15, 16  ;;  %4919 = vtanh.f32 %v816_v20  ;;  %1762 = vmatprep.mubr.bf16.mxu0 %v5047_v60 }
 0x14d   : > { %v4916_v58 = vpop.eup %4915  ;;  %v1245_v6 = vshll.u32 %v5047_v60, 16  ;;  %v1224_v41 = vsel %vm1176_vm1, %v1219_v13, %v1223_v51  ;;  %v1233_v55 = vshrl.u32 %v5046_v59, 16  ;;  %v5049_v56 = vpack.c.bf16 %v5620_v3, %v5590_v17 }
 0x14e   : > { %v949_v53 = vmul.f32 %v915_v5, %v5597_v28  ;;  %v882_v47 = vadd.f32 1.0, %v4916_v58  ;;  %v1243_v43 = vor.u32 %v1241_v26, %v1231_v29  ;;  %v1237_v32 = vshll.u32 %v5048_v48, 16 }
 0x14f   : > { %v1247_v40 = vrot.slane %v1245_v6, 1  ;;  %v5050_v8 = vpack.c.bf16 %v5602_v14, %v5586_v4  ;;  %v1235_v28 = vor.u32 %v1233_v55, %v1223_v51  ;;  %v1257_v39 = vshrl.u32 %v5047_v60, 16 }
 0x150   : > { %v916_v1 = vmul.f32 0.5, %v882_v47  ;;  %1474 = vmatmul.mubr.bf16.gmra.mrb[8].mxu1 %v1224_v41  ;;  %1763 = vmatmul.mubr.bf16.gmra.mrb[52].mxu0 %v5048_v48  ;;  %v1249_v10 = vshrl.u32 %v5048_v48, 16  ;;  %v1239_v7 = vrot.slane %v1237_v32, 1  ;;  %v1261_v22 = vshll.u32 %v5049_v56, 16 }
 0x151   : > { %v1248_v21 = vsel %vm1176_vm1, %v1243_v43, %v1247_v40  ;;  %1770 = vmatprep.mubr.bf16.mxu0 %v5049_v56  ;;  %v1253_v27 = vshll.u32 %v5050_v8, 16  ;;  %v1259_v9 = vor.u32 %v1257_v39, %v1247_v40  ;;  %v5051_v17 = vpack.c.bf16 %v5656_v12, %v5634_v31  ;;  %v4824_v43 = vld [vmem:[%s5155_s17 + $0x44] sm:$0xff]  }
 0x152   : > { %v950_v15 = vmul.f32 %v916_v1, %v5612_v54  ;;  %1481 = vmatprep.mubr.bf16.mxu1 %v1248_v21  ;;  %v5052_v4 = vpack.c.bf16 %v5639_v0, %v5629_v52  ;;  %v1240_v14 = vsel %vm1176_vm1, %v1235_v28, %v1239_v7  ;;  %v1263_v3 = vrot.slane %v1261_v22, 1  ;;  %v4991_v28 = vld [vmem:[%s7486_s3] sm:$0xff]   ;;  %v4827_v21 = vld [vmem:[%s5155_s17 + $0x4c] sm:$0xff]  }
 0x153   : > { %v1251_v16 = vor.u32 %v1249_v10, %v1239_v7  ;;  %v1255_v37 = vrot.slane %v1253_v27, 1  ;;  %v1273_v35 = vshrl.u32 %v5049_v56, 16  ;;  %v1277_v59 = vshll.u32 %v5051_v17, 16  ;;  %v4992_v10 = vld [vmem:[%s7486_s3 + $0x48] sm:$0xff]   ;;  %v4994_v27 = vld [vmem:[%s7486_s3 + $0x50] sm:$0xff]  }
 0x154   : > { %v1264_v42 = vsel %vm1176_vm1, %v1259_v9, %v1263_v3  ;;  %v1265_v54 = vshrl.u32 %v5050_v8, 16  ;;  %v1269_v38 = vshll.u32 %v5052_v4, 16  ;;  %v5053_v31 = vpack.c.bf16 %v950_v15, %v948_v19  ;;  %v4993_v22 = vld [vmem:[%s7486_s3 + $0x8] sm:$0xff]   ;;  %v4995_v15 = vld [vmem:[%s7486_s3 + $0x10] sm:$0xff]   ;;  %v4996_v9 = vld [vmem:[%s7486_s3 + $0x58] sm:$0xff]  }
 0x155   : > { %v1256_v18 = vsel %vm1176_vm1, %v1251_v16, %v1255_v37  ;;  %v4918_v30 = vpop.eup %4917  ;;  %v1275_v34 = vor.u32 %v1273_v35, %v1263_v3  ;;  %v1279_v25 = vrot.slane %v1277_v59, 1  ;;  %v5054_v44 = vpack.c.bf16 %v949_v53, %v5667_v24  ;;  %v4999_v3 = vld [vmem:[%s7486_s3 + $0x20] sm:$0xff]   ;;  %v5000_v16 = vld [vmem:[%s7486_s3 + $0x68] sm:$0xff]   ;;  %v5002_v59 = vld [vmem:[%s7486_s3 + $0x70] sm:$0xff]  }
 0x156   : > { %v4920_v12 = vpop.eup %4919  ;;  %v883_v36 = vadd.f32 1.0, %v4918_v30  ;;  %v1267_v52 = vor.u32 %v1265_v54, %v1255_v37  ;;  %v1271_v0 = vrot.slane %v1269_v38, 1  ;;  %v1289_v63 = vshrl.u32 %v5051_v17, 16  ;;  %v4829_v37 = vld [vmem:[%s5155_s17 + $0x5c] sm:$0xff]   ;;  %v5001_v35 = vld [vmem:[%s7486_s3 + $0x28] sm:$0xff]  }
 0x157   : > { %v884_v23 = vadd.f32 1.0, %v4920_v12  ;;  %v1280_v33 = vsel %vm1176_vm1, %v1275_v34, %v1279_v25  ;;  %v1293_v29 = vshll.u32 %v5053_v31, 16  ;;  %v1281_v13 = vshrl.u32 %v5052_v4, 16  ;;  %v4830_v54 = vld [vmem:[%s5155_s17 + $0x64] sm:$0xff]   ;;  %v5005_v38 = vld [vmem:[%s7486_s3 + $0x38] sm:$0xff]   ;;  %v4831_v30 = vld [vmem:[%s5155_s17 + $0x6c] sm:$0xff]  }
 0x158   : > { %1482 = vmatmul.mubr.bf16.gmra.mrb[12].mxu1 %v1240_v14  ;;  %1771 = vmatmul.mubr.bf16.gmra.mrb[56].mxu0 %v5050_v8  ;;  %v917_v46 = vmul.f32 0.5, %v883_v36  ;;  %v1272_v20 = vsel %vm1176_vm1, %v1267_v52, %v1271_v0  ;;  %v1285_v57 = vshll.u32 %v5054_v44, 16  ;;  %v1291_v5 = vor.u32 %v1289_v63, %v1279_v25  ;;  %v4998_v14 = vld [vmem:[%s7486_s3 + $0x60] sm:$0xff]   ;;  %v4832_v34 = vld [vmem:[%s5155_s17 + $0x74] sm:$0xff]  }
 0x159   : > { %1489 = vmatprep.mubr.bf16.mxu1 %v1264_v42  ;;  %1778 = vmatprep.mubr.bf16.mxu0 %v5051_v17  ;;  %v918_v19 = vmul.f32 0.5, %v884_v23  ;;  %v1295_v62 = vrot.slane %v1293_v29, 1  ;;  %v1283_v24 = vor.u32 %v1281_v13, %v1271_v0  ;;  %v1297_v8 = vshrl.u32 %v5054_v44, 16  ;;  %v4828_v17 = vld [vmem:[%s5155_s17 + $0x54] sm:$0xff]   ;;  %v4833_v25 = vld [vmem:[%s5155_s17 + $0x7c] sm:$0xff]  }
 0x15a   : > { %v951_v60 = vmul.f32 %v917_v46, %v5643_v11  ;;  %v1287_v51 = vrot.slane %v1285_v57, 1  ;;  %v5003_v42 = vld [vmem:[%s7486_s3 + $0x30] sm:$0xff]   ;;  %v4835_v12 = vld [vmem:[%s7488_s5] sm:$0xff]  }
 0x15b   : > { %v952_v48 = vmul.f32 %v918_v19, %v5647_v61  ;;  %v1296_v26 = vsel %vm1176_vm1, %v1291_v5, %v1295_v62  ;;  %v1305_v61 = vshrl.u32 %v5053_v31, 16 }
 0x15c   : > { %v1288_v58 = vsel %vm1176_vm1, %v1283_v24, %v1287_v51  ;;  %v1299_v39 = vor.u32 %v1297_v8, %v1287_v51 }
 0x15d   : > { %v4350_v53 = vpack.c.bf16 %v952_v48, %v951_v60  ;;  %v1307_v55 = vor.u32 %v1305_v61, %v1295_v62 }
 0x15f   : > { %1073 = vst [vmem:[#allocation2 + $0x80] sm:$0xff] %v4350_v53 }
 0x160   : > { %1490 = vmatmul.mubr.bf16.gmra.mrb[16].mxu1 %v1256_v18  ;;  %1779 = vmatmul.mubr.bf16.gmra.mrb[60].mxu0 %v5052_v4  ;;  %v4997_v4 = vld [vmem:[%s7486_s3 + $0x18] sm:$0xff]  }
 0x161   : > { %1497 = vmatprep.mubr.bf16.mxu1 %v1280_v33  ;;  %1786 = vmatprep.mubr.bf16.mxu0 %v5053_v31  ;;  %v5004_v18 = vld [vmem:[%s7486_s3 + $0x78] sm:$0xff]   ;;  %v4834_v31 = vld [vmem:[%s5155_s17 + $0x84] ss:$0 sps:$4 sm:$0xff]  }
 0x166   : > { %v1106_v6 = vld [vmem:[#allocation2 + $0x80] sm:$0x11] }
 0x167   : > { %v4179_v47 = vcombine.high %v1106_v6, %v1106_v6  ;;  %v4178_v11 = vcombine.low %v1106_v6, %v1106_v6 }
 0x168   : > { %1498 = vmatmul.mubr.bf16.gmra.mrb[20].mxu1 %v1272_v20  ;;  %1787 = vmatmul.mubr.bf16.gmra.mrb[64].mxu0 %v5054_v44 }
 0x169   : > { %1505 = vmatprep.mubr.bf16.mxu1 %v1296_v26  ;;  %2600 = vmatprep.mubr.bf16.mxu0 %v5079_v2  ;;  %v1309_v41 = vshll.u32 %v4179_v47, 16  ;;  %v1301_v32 = vshll.u32 %v4178_v11, 16  ;;  %v5779_v11 = vld [vmem:[%s7487_s4] ss:$0 sm:$0xff] }
 0x16b   : > { %v1311_v40 = vrot.slane %v1309_v41, 1  ;;  %v1303_v1 = vrot.slane %v1301_v32, 1 }
 0x16d   : > { %v1312_v56 = vsel %vm1176_vm1, %v1307_v55, %v1311_v40  ;;  %v1304_v7 = vsel %vm1176_vm1, %v1299_v39, %v1303_v1 }
 0x170   : > { %1506 = vmatmul.mubr.bf16.gmra.mrb[24].mxu1 %v1288_v58  ;;  %4271 = vmatmul.mubr.msk.bf16.vlgmr.msra.gmra.mrb[68].mxu0 %vm498_vm0, %v4824_v43 }
 0x171   : > { %1513 = vmatprep.mubr.bf16.mxu1 %v1312_v56  ;;  %2610 = vmatprep.mubr.bf16.mxu0 %v5079_v2 }
 0x172   : > { %4585 = vmatpush3.bf16.msra.mxu0 %v4991_v28 }
 0x173   : > { %4586 = vmatprep.subr.bf16.mxu0 %v4992_v10 }
 0x176   : > { %4587 = vmatpush3.bf16.msra.mxu0 %v4993_v22 }
 0x177   : > { %4588 = vmatprep.subr.bf16.mxu0 %v4994_v27 }
 0x178   : > { %1514 = vmatmul.mubr.bf16.gmra.mrb[28].mxu1 %v1304_v7  ;;  %4272 = vmatmul.mubr.msk.bf16.gmra.mrb[72].mxu0 %vm498_vm0, %v4827_v21 }
 0x179   : > { %2620 = vmatprep.mubr.bf16.mxu0 %v5079_v2  ;;  %4688 = vmatprep.mubr.bf16.mxu1 %v4835_v12 }
 0x17a   : > { %4589 = vmatpush3.bf16.msra.mxu0 %v4995_v15 }
 0x17b   : > { %4590 = vmatprep.subr.bf16.mxu0 %v4996_v9 }
 0x17e   : > { %4591 = vmatpush3.bf16.msra.mxu0 %v4997_v4 }
 0x17f   : > { %4592 = vmatprep.subr.bf16.mxu0 %v4998_v14 }
 0x180   : > { %4273 = vmatmul.mubr.msk.bf16.gmra.mrb[76].mxu0 %vm498_vm0, %v4828_v17 }
 0x181   : > { %2630 = vmatprep.mubr.bf16.mxu0 %v5079_v2 }
 0x182   : > { %4593 = vmatpush3.bf16.msra.mxu0 %v4999_v3 }
 0x183   : > { %4594 = vmatprep.subr.bf16.mxu0 %v5000_v16 }
 0x186   : > { %4595 = vmatpush3.bf16.msra.mxu0 %v5001_v35 }
 0x187   : > { %4596 = vmatprep.subr.bf16.mxu0 %v5002_v59 }
 0x188   : > { %4274 = vmatmul.mubr.msk.bf16.gmra.mrb[80].mxu0 %vm498_vm0, %v4829_v37 }
 0x189   : > { %2640 = vmatprep.mubr.bf16.mxu0 %v5079_v2 }
 0x18a   : > { %4597 = vmatpush3.bf16.msra.mxu0 %v5003_v42 }
 0x18b   : > { %4598 = vmatprep.subr.bf16.mxu0 %v5004_v18 }
 0x18e   : > { %4599 = vmatpush3.bf16.msra.mxu0 %v5005_v38 }
 0x190   : > { %4275 = vmatmul.mubr.msk.bf16.gmra.mrb[84].mxu0 %vm498_vm0, %v4830_v54 }
 0x191   : > { %2650 = vmatprep.mubr.bf16.mxu0 %v5079_v2 }
 0x198   : > { %4276 = vmatmul.mubr.msk.bf16.gmra.mrb[88].mxu0 %vm498_vm0, %v4831_v30 }
 0x199   : > { %2660 = vmatprep.mubr.bf16.mxu0 %v5079_v2 }
 0x1a0   : > { %4277 = vmatmul.mubr.msk.bf16.gmra.mrb[92].mxu0 %vm498_vm0, %v4832_v34 }
 0x1a1   : > { %2670 = vmatprep.mubr.bf16.mxu0 %v5079_v2 }
 0x1a8   : > { %4278 = vmatmul.mubr.msk.bf16.gmra.mrb[96].mxu0 %vm498_vm0, %v4833_v25 }
 0x1a9   : > { %2680 = vmatprep.mubr.bf16.mxu0 %v5079_v2 }
 0x1b0   : > { %4279 = vmatmul.mubr.msk.bf16.gmra.mrb[100].mxu0 %vm498_vm0, %v4834_v31 }
 0x1f7   : > { %v4448_v36 = vpop.f32.mrb[36].mxu0 }
 0x1f8   : > { %v4449_v52 = vpop.f32.mrb[37].mxu0 }
 0x1f9   : > { %v4450_v0 = vadd.f32 %v4449_v52, %v4448_v36  ;;  %v4451_v44 = vpop.f32.mrb[38].mxu0 }
 0x1fa   : > { %v4452_v23 = vpop.f32.mrb[39].mxu0 }
 0x1fb   : > { %v4453_v33 = vadd.f32 %v4452_v23, %v4451_v44 }
 0x1ff   : > { %v4454_v63 = vpop.f32.mrb[40].mxu0 }
 0x200   : > { %v4455_v29 = vpop.f32.mrb[41].mxu0 }
 0x201   : > { %v4456_v46 = vadd.f32 %v4455_v29, %v4454_v63  ;;  %v4457_v20 = vpop.f32.mrb[42].mxu0 }
 0x202   : > { %v4458_v13 = vpop.f32.mrb[43].mxu0 }
 0x203   : > { %v4459_v2 = vadd.f32 %v4458_v13, %v4457_v20 }
 0x213   : > { %v4384_v57 = vpop.f32.mrb[0].mxu1  ;;  %v4460_v19 = vpop.f32.mrb[44].mxu0 }
 0x214   : > { %v4385_v5 = vpop.f32.mrb[1].mxu1  ;;  %v4461_v62 = vpop.f32.mrb[45].mxu0 }
 0x215   : > { %v4386_v60 = vadd.f32 %v4385_v5, %v4384_v57  ;;  %v4387_v24 = vpop.f32.mrb[2].mxu1  ;;  %v4462_v51 = vadd.f32 %v4461_v62, %v4460_v19  ;;  %v4463_v48 = vpop.f32.mrb[46].mxu0 }
 0x216   : > { %v4388_v26 = vpop.f32.mrb[3].mxu1  ;;  %v4464_v58 = vpop.f32.mrb[47].mxu0 }
 0x217   : > { %v1733_v53 = vadd.f32 %v4450_v0, %v4386_v60  ;;  %v4389_v6 = vadd.f32 %v4388_v26, %v4387_v24  ;;  %v4465_v47 = vadd.f32 %v4464_v58, %v4463_v48 }
 0x219   : > { %v1736_v61 = vadd.f32 %v4453_v33, %v4389_v6  ;;  %v1801_v41 = vadd.f32 %v5779_v11, %v1733_v53 }
 0x21b   : > { %v1802_v43 = vadd.f32 %v5779_v11, %v1736_v61  ;;  %v4390_v55 = vpop.f32.mrb[4].mxu1  ;;  %v4466_v40 = vpop.f32.mrb[48].mxu0 }
 0x21c   : > { %v4391_v32 = vpop.f32.mrb[5].mxu1  ;;  %v4467_v56 = vpop.f32.mrb[49].mxu0 }
 0x21d   : > { %v4392_v8 = vadd.f32 %v4391_v32, %v4390_v55  ;;  %v4393_v1 = vpop.f32.mrb[6].mxu1  ;;  %v4468_v28 = vadd.f32 %v4467_v56, %v4466_v40  ;;  %v1817_v39 = vpack.c.bf16 %v1802_v43, %v1801_v41  ;;  %v4469_v10 = vpop.f32.mrb[50].mxu0 }
 0x21e   : > { %v4394_v21 = vpop.f32.mrb[7].mxu1  ;;  %v4470_v7 = vpop.f32.mrb[51].mxu0 }
 0x21f   : > { %v1741_v22 = vadd.f32 %v4456_v46, %v4392_v8  ;;  %v4395_v27 = vadd.f32 %v4394_v21, %v4393_v1  ;;  %4672 = vmatprep.subr.bf16.mxu1 %v1817_v39  ;;  %v4471_v15 = vadd.f32 %v4470_v7, %v4469_v10 }
 0x220   : > { %4673 = vmatpush3.bf16.xpose.msra.mxu1 %v1817_v39 }
 0x221   : > { %v1744_v9 = vadd.f32 %v4459_v2, %v4395_v27  ;;  %v1803_v17 = vadd.f32 %v5779_v11, %v1741_v22 }
 0x223   : > { %v1804_v4 = vadd.f32 %v5779_v11, %v1744_v9  ;;  %v4396_v14 = vpop.f32.mrb[8].mxu1  ;;  %v4472_v3 = vpop.f32.mrb[52].mxu0 }
 0x224   : > { %v4397_v16 = vpop.f32.mrb[9].mxu1  ;;  %v4473_v37 = vpop.f32.mrb[53].mxu0 }
 0x225   : > { %v4398_v35 = vadd.f32 %v4397_v16, %v4396_v14  ;;  %v4399_v59 = vpop.f32.mrb[10].mxu1  ;;  %v4474_v42 = vadd.f32 %v4473_v37, %v4472_v3  ;;  %v1818_v18 = vpack.c.bf16 %v1804_v4, %v1803_v17  ;;  %v4475_v54 = vpop.f32.mrb[54].mxu0 }
 0x226   : > { %v4400_v38 = vpop.f32.mrb[11].mxu1  ;;  %v4476_v30 = vpop.f32.mrb[55].mxu0 }
 0x227   : > { %v1749_v34 = vadd.f32 %v4462_v51, %v4398_v35  ;;  %v4401_v25 = vadd.f32 %v4400_v38, %v4399_v59  ;;  %4674 = vmatprep.subr.bf16.mxu1 %v1818_v18  ;;  %v4477_v31 = vadd.f32 %v4476_v30, %v4475_v54  ;;  %v385_v59 = vld [vmem:[%s7489_s6] sm:$0xff]  ;;  %v386_v54 = vld [vmem:[%s7489_s6 + $0x8] sm:$0xff]  ;;  %v388_v38 = vld [vmem:[%s7489_s6 + $0x18] sm:$0xff] }
 0x228   : > { %4675 = vmatpush3.bf16.xpose.msra.mxu1 %v1818_v18  ;;  %2084 = vperm.xlu0 %4778, %v385_v59  }
 0x229   : > { %v1752_v12 = vadd.f32 %v4465_v47, %v4401_v25  ;;  %v1805_v36 = vadd.f32 %v5779_v11, %v1749_v34 }
 0x22b   : > { %v1806_v52 = vadd.f32 %v5779_v11, %v1752_v12  ;;  %v4402_v0 = vpop.f32.mrb[12].mxu1  ;;  %v4478_v44 = vpop.f32.mrb[56].mxu0 }
 0x22c   : > { %v4403_v23 = vpop.f32.mrb[13].mxu1  ;;  %v4479_v33 = vpop.f32.mrb[57].mxu0  ;;  %2089 = vperm.xlu0 %4778, %v386_v54  }
 0x22d   : > { %v4404_v63 = vadd.f32 %v4403_v23, %v4402_v0  ;;  %v4405_v29 = vpop.f32.mrb[14].mxu1  ;;  %v4480_v46 = vadd.f32 %v4479_v33, %v4478_v44  ;;  %v1819_v20 = vpack.c.bf16 %v1806_v52, %v1805_v36  ;;  %v4481_v13 = vpop.f32.mrb[58].mxu0 }
 0x22e   : > { %v4406_v2 = vpop.f32.mrb[15].mxu1  ;;  %v4482_v57 = vpop.f32.mrb[59].mxu0 }
 0x22f   : > { %v1757_v19 = vadd.f32 %v4468_v28, %v4404_v63  ;;  %v4407_v5 = vadd.f32 %v4406_v2, %v4405_v29  ;;  %4676 = vmatprep.subr.bf16.mxu1 %v1819_v20  ;;  %v4483_v62 = vadd.f32 %v4482_v57, %v4481_v13  ;;  %v389_v2 = vld [vmem:[%s7489_s6 + $0x20] sm:$0xff] }
 0x230   : > { %4677 = vmatpush3.bf16.xpose.msra.mxu1 %v1819_v20  ;;  %2104 = vperm.xlu0 %4778, %v389_v2   ;;  %v396_v2 = vld [vmem:[%s7489_s6 + $0x58] sm:$0xff] }
 0x231   : > { %v1760_v60 = vadd.f32 %v4471_v15, %v4407_v5  ;;  %v1807_v24 = vadd.f32 %v5779_v11, %v1757_v19 }
 0x233   : > { %v1808_v51 = vadd.f32 %v5779_v11, %v1760_v60  ;;  %v4408_v48 = vpop.f32.mrb[16].mxu1  ;;  %v4484_v26 = vpop.f32.mrb[60].mxu0  ;;  %v390_v60 = vld [vmem:[%s7489_s6 + $0x28] sm:$0xff] }
 0x234   : > { %v4409_v58 = vpop.f32.mrb[17].mxu1  ;;  %v4485_v53 = vpop.f32.mrb[61].mxu0 }
 0x235   : > { %v4410_v6 = vadd.f32 %v4409_v58, %v4408_v48  ;;  %v4411_v47 = vpop.f32.mrb[18].mxu1  ;;  %v4486_v61 = vadd.f32 %v4485_v53, %v4484_v26  ;;  %v1820_v41 = vpack.c.bf16 %v1808_v51, %v1807_v24  ;;  %v4487_v43 = vpop.f32.mrb[62].mxu0 }
 0x236   : > { %v4412_v55 = vpop.f32.mrb[19].mxu1  ;;  %v4488_v40 = vpop.f32.mrb[63].mxu0 }
 0x237   : > { %v1765_v32 = vadd.f32 %v4474_v42, %v4410_v6  ;;  %v4413_v56 = vadd.f32 %v4412_v55, %v4411_v47  ;;  %4678 = vmatprep.subr.bf16.mxu1 %v1820_v41  ;;  %v4489_v8 = vadd.f32 %v4488_v40, %v4487_v43  ;;  %v387_v42 = vld [vmem:[%s7489_s6 + $0x10] sm:$0xff] }
 0x238   : > { %4679 = vmatpush3.bf16.xpose.msra.mxu1 %v1820_v41  ;;  %2094 = vperm.xlu1 %4779, %v387_v42   ;;  %v391_v47 = vld [vmem:[%s7489_s6 + $0x30] sm:$0xff]  ;;  %v393_v42 = vld [vmem:[%s7489_s6 + $0x40] sm:$0xff] }
 0x239   : > { %v1768_v1 = vadd.f32 %v4477_v31, %v4413_v56  ;;  %v1809_v28 = vadd.f32 %v5779_v11, %v1765_v32  ;;  %v392_v56 = vld [vmem:[%s7489_s6 + $0x38] sm:$0xff]  ;;  %2114 = vperm.xlu0 %4778, %v391_v47  }
 0x23b   : > { %v1810_v39 = vadd.f32 %v5779_v11, %v1768_v1  ;;  %v4414_v10 = vpop.f32.mrb[20].mxu1  ;;  %v4490_v21 = vpop.f32.mrb[64].mxu0 }
 0x23c   : > { %v4415_v7 = vpop.f32.mrb[21].mxu1  ;;  %v4491_v22 = vpop.f32.mrb[65].mxu0  ;;  %2099 = vperm.xlu1 %4779, %v388_v38  }
 0x23d   : > { %v4416_v27 = vadd.f32 %v4415_v7, %v4414_v10  ;;  %v4417_v15 = vpop.f32.mrb[22].mxu1  ;;  %v5791_v9 = vadd.f32 %v4491_v22, %v4490_v21  ;;  %v1821_v17 = vpack.c.bf16 %v1810_v39, %v1809_v28  ;;  %v4493_v4 = vpop.f32.mrb[66].mxu0  ;;  %2124 = vperm.xlu0 %4778, %v393_v42  }
 0x23e   : > { %v4418_v14 = vpop.f32.mrb[23].mxu1  ;;  %v4494_v3 = vpop.f32.mrb[67].mxu0 }
 0x23f   : > { %v1773_v16 = vadd.f32 %v4480_v46, %v4416_v27  ;;  %v4419_v37 = vadd.f32 %v4418_v14, %v4417_v15  ;;  %4680 = vmatprep.subr.bf16.mxu1 %v1821_v17  ;;  %v5793_v35 = vadd.f32 %v4494_v3, %v4493_v4 }
 0x240   : > { %4681 = vmatpush3.bf16.xpose.msra.mxu1 %v1821_v17  ;;  %2109 = vperm.xlu1 %4779, %v390_v60  }
 0x241   : > { %v1776_v18 = vadd.f32 %v4483_v62, %v4419_v37  ;;  %v1811_v30 = vadd.f32 %v5779_v11, %v1773_v16 }
 0x243   : > { %v1812_v34 = vadd.f32 %v5779_v11, %v1776_v18  ;;  %v4420_v25 = vpop.f32.mrb[24].mxu1  ;;  %v2602_v31 = vpop.f32.mrb[68].mxu0 }
 0x244   : > { %v4421_v12 = vpop.f32.mrb[25].mxu1  ;;  %v5810_v36 = vadd.f32 %v2602_v31, %v5278_v49  ;;  %v2604_v52 = vpop.f32.mrb[69].mxu0  ;;  %2119 = vperm.xlu1 %4779, %v392_v56   ;;  %v398_v56 = vld [vmem:[%s7489_s6 + $0x68] sm:$0xff] }
 0x245   : > { %v4422_v0 = vadd.f32 %v4421_v12, %v4420_v25  ;;  %v4423_v44 = vpop.f32.mrb[26].mxu1  ;;  %v1822_v23 = vpack.c.bf16 %v1812_v34, %v1811_v30  ;;  %v5813_v33 = vadd.f32 %v2604_v52, %v5280_v50  ;;  %v2606_v63 = vpop.f32.mrb[70].mxu0  ;;  %v394_v34 = vld [vmem:[%s7489_s6 + $0x48] sm:$0xff] }
 0x246   : > { %v4424_v29 = vpop.f32.mrb[27].mxu1  ;;  %v2689_v46 = vmul.f32 %v5810_v36, %v5810_v36  ;;  %v5818_v20 = vadd.f32 %v2606_v63, %v5278_v49  ;;  %v2608_v13 = vpop.f32.mrb[71].mxu0  ;;  %v395_v63 = vld [vmem:[%s7489_s6 + $0x50] sm:$0xff] }
 0x247   : > { %v1781_v57 = vadd.f32 %v4486_v61, %v4422_v0  ;;  %v4425_v19 = vadd.f32 %v4424_v29, %v4423_v44  ;;  %4682 = vmatprep.subr.bf16.mxu1 %v1822_v23  ;;  %v2690_v5 = vmul.f32 %v5813_v33, %v5813_v33  ;;  %v5826_v62 = vadd.f32 %v2608_v13, %v5280_v50 }
 0x248   : > { %v2723_v24 = vmul.f32 %v2689_v46, %v5810_v36  ;;  %4683 = vmatpush3.bf16.xpose.msra.mxu1 %v1822_v23  ;;  %v2691_v51 = vmul.f32 %v5818_v20, %v5818_v20  ;;  %2129 = vperm.xlu1 %4779, %v394_v34  }
 0x249   : > { %v1784_v48 = vadd.f32 %v4489_v8, %v4425_v19  ;;  %v2724_v26 = vmul.f32 %v2690_v5, %v5813_v33  ;;  %v2692_v58 = vmul.f32 %v5826_v62, %v5826_v62  ;;  %v1813_v61 = vadd.f32 %v5779_v11, %v1781_v57  ;;  %2134 = vperm.xlu0 %4778, %v395_v63  }
 0x24a   : > { %v2757_v53 = vmul.f32 0.044715, %v2723_v24  ;;  %v2725_v6 = vmul.f32 %v2691_v51, %v5818_v20 }
 0x24b   : > { %v1814_v41 = vadd.f32 %v5779_v11, %v1784_v48  ;;  %v2758_v43 = vmul.f32 0.044715, %v2724_v26  ;;  %v2726_v55 = vmul.f32 %v2692_v58, %v5826_v62  ;;  %v4426_v40 = vpop.f32.mrb[28].mxu1  ;;  %v2612_v32 = vpop.f32.mrb[72].mxu0 }
 0x24c   : > { %v2791_v8 = vadd.f32 %v2757_v53, %v5810_v36  ;;  %v2759_v1 = vmul.f32 0.044715, %v2725_v6  ;;  %v4427_v28 = vpop.f32.mrb[29].mxu1  ;;  %v5849_v39 = vadd.f32 %v2612_v32, %v5278_v49  ;;  %v2614_v10 = vpop.f32.mrb[73].mxu0  ;;  %2139 = vperm.xlu1 %4779, %v396_v2  }
 0x24d   : > { %v2792_v21 = vadd.f32 %v2758_v43, %v5813_v33  ;;  %v2760_v7 = vmul.f32 0.044715, %v2726_v55  ;;  %v4428_v22 = vadd.f32 %v4427_v28, %v4426_v40  ;;  %v4429_v27 = vpop.f32.mrb[30].mxu1  ;;  %v1823_v15 = vpack.c.bf16 %v1814_v41, %v1813_v61  ;;  %v2616_v17 = vpop.f32.mrb[74].mxu0  ;;  %v397_v41 = vld [vmem:[%s7489_s6 + $0x60] sm:$0xff] }
 0x24e   : > { %v2825_v4 = vmul.f32 0.7978846, %v2791_v8  ;;  %v2793_v14 = vadd.f32 %v2759_v1, %v5818_v20  ;;  %v4430_v3 = vpop.f32.mrb[31].mxu1  ;;  %v2693_v16 = vmul.f32 %v5849_v39, %v5849_v39  ;;  %v5856_v37 = vadd.f32 %v2614_v10, %v5280_v50  ;;  %v2618_v59 = vpop.f32.mrb[75].mxu0  ;;  %2144 = vperm.xlu0 %4778, %v397_v41   ;;  %v5007_v41 = vld [vmem:[%s7486_s3 + $0x80] sm:$0xff]  }
 0x24f   : > { %v2826_v18 = vmul.f32 0.7978846, %v2792_v21  ;;  %v2794_v54 = vadd.f32 %v2760_v7, %v5826_v62  ;;  %v1789_v38 = vadd.f32 %v5791_v9, %v4428_v22  ;;  %v4431_v30 = vadd.f32 %v4430_v3, %v4429_v27  ;;  %4684 = vmatprep.subr.bf16.mxu1 %v1823_v15  ;;  %v5006_v27 = vld [vmem:[%s7486_s3 + $0xc0] sm:$0xff]  }
 0x250   : > { %4921 = vtanh.f32 %v2825_v4  ;;  %v2827_v25 = vmul.f32 0.7978846, %v2793_v14  ;;  %v2727_v31 = vmul.f32 %v2693_v16, %v5849_v39  ;;  %v2694_v12 = vmul.f32 %v5856_v37, %v5856_v37  ;;  %4685 = vmatpush3.bf16.xpose.msra.mxu1 %v1823_v15  ;;  %2149 = vperm.xlu1 %4779, %v398_v56   ;;  %v399_v14 = vld [vmem:[%s7489_s6 + $0x70] sm:$0xff] }
 0x251   : > { %4923 = vtanh.f32 %v2826_v18  ;;  %v2828_v52 = vmul.f32 0.7978846, %v2794_v54  ;;  %v1792_v0 = vadd.f32 %v5793_v35, %v4431_v30  ;;  %v5872_v23 = vadd.f32 %v2616_v17, %v5278_v49  ;;  %v400_v30 = vld [vmem:[%s7489_s6 + $0x78] sm:$0xff] }
 0x252   : > { %4925 = vtanh.f32 %v2827_v25  ;;  %v2761_v9 = vmul.f32 0.044715, %v2727_v31  ;;  %v2728_v44 = vmul.f32 %v2694_v12, %v5856_v37  ;;  %v1815_v29 = vadd.f32 %v5779_v11, %v1789_v38  ;;  %v4836_v38 = vld [vmem:[%s7488_s5 + $0x8] sm:$0xff]   ;;  %2154 = vperm.xlu0 %4778, %v399_v14  }
 0x253   : > { %4927 = vtanh.f32 %v2828_v52  ;;  %v1816_v46 = vadd.f32 %v5779_v11, %v1792_v0  ;;  %v5880_v35 = vadd.f32 %v2618_v59, %v5280_v50  ;;  %v2622_v13 = vpop.f32.mrb[76].mxu0  ;;  %v2695_v5 = vmul.f32 %v5872_v23, %v5872_v23 }
 0x254   : > { %v2795_v57 = vadd.f32 %v2761_v9, %v5849_v39  ;;  %v2762_v19 = vmul.f32 0.044715, %v2728_v44  ;;  %v5889_v60 = vadd.f32 %v2622_v13, %v5278_v49  ;;  %v2624_v24 = vpop.f32.mrb[77].mxu0  ;;  %v4837_v9 = vld [vmem:[%s7488_s5 + $0x10] sm:$0xff]   ;;  %2159 = vperm.xlu1 %4779, %v400_v30  }
 0x255   : > { %v2696_v11 = vmul.f32 %v5880_v35, %v5880_v35  ;;  %v1824_v51 = vpack.c.bf16 %v1816_v46, %v1815_v29  ;;  %v5894_v48 = vadd.f32 %v2624_v24, %v5280_v50  ;;  %v2626_v26 = vpop.f32.mrb[78].mxu0  ;;  %v2729_v6 = vmul.f32 %v2695_v5, %v5872_v23 }
 0x256   : > { %v2829_v58 = vmul.f32 0.7978846, %v2795_v57  ;;  %v2796_v53 = vadd.f32 %v2762_v19, %v5856_v37  ;;  %v2697_v47 = vmul.f32 %v5889_v60, %v5889_v60  ;;  %v2628_v61 = vpop.f32.mrb[79].mxu0  ;;  %v5907_v40 = vadd.f32 %v2626_v26, %v5278_v49 }
 0x257   : > { %v2730_v43 = vmul.f32 %v2696_v11, %v5880_v35  ;;  %4686 = vmatprep.subr.bf16.mxu1 %v1824_v51  ;;  %v2698_v55 = vmul.f32 %v5894_v48, %v5894_v48  ;;  %v5910_v32 = vadd.f32 %v2628_v61, %v5280_v50  ;;  %v2763_v1 = vmul.f32 0.044715, %v2729_v6  ;;  %v401_v11 = vld [vmem:[%s7489_s6 + $0x80] sm:$0xff] }
 0x258   : > { %4929 = vtanh.f32 %v2829_v58  ;;  %v2830_v8 = vmul.f32 0.7978846, %v2796_v53  ;;  %v2731_v28 = vmul.f32 %v2697_v47, %v5889_v60  ;;  %4687 = vmatpush3.bf16.xpose.msra.mxu1 %v1824_v51  ;;  %v2699_v7 = vmul.f32 %v5907_v40, %v5907_v40  ;;  %v402_v53 = vld [vmem:[%s7489_s6 + $0x88] sm:$0xff]  ;;  %2164 = vperm.xlu0 %4778, %v401_v11  }
 0x259   : > { %v2764_v10 = vmul.f32 0.044715, %v2730_v43  ;;  %v2732_v21 = vmul.f32 %v2698_v55, %v5894_v48  ;;  %v2700_v22 = vmul.f32 %v5910_v32, %v5910_v32  ;;  %4520 = vmatprep.subr.bf16.mxu1 %v5006_v27  ;;  %v2797_v17 = vadd.f32 %v2763_v1, %v5872_v23  ;;  %2169 = vperm.xlu1 %4779, %v402_v53  }
 0x25a   : > { %v4922_v15 = vpop.eup %4921  ;;  %4931 = vtanh.f32 %v2830_v8  ;;  %v2765_v4 = vmul.f32 0.044715, %v2731_v28  ;;  %v2733_v18 = vmul.f32 %v2699_v7, %v5907_v40 }
 0x25b   : > { %v4924_v3 = vpop.eup %4923  ;;  %v2893_v16 = vadd.f32 1.0, %v4922_v15  ;;  %v2798_v59 = vadd.f32 %v2764_v10, %v5880_v35  ;;  %v2766_v42 = vmul.f32 0.044715, %v2732_v21  ;;  %v2632_v54 = vpop.f32.mrb[80].mxu0  ;;  %v2831_v31 = vmul.f32 0.7978846, %v2797_v17 }
 0x25c   : > { %v4926_v34 = vpop.eup %4925  ;;  %v2894_v25 = vadd.f32 1.0, %v4924_v3  ;;  %v2799_v12 = vadd.f32 %v2765_v4, %v5889_v60  ;;  %v2734_v52 = vmul.f32 %v2700_v22, %v5910_v32  ;;  %v2634_v0 = vpop.f32.mrb[81].mxu0  ;;  %v2767_v61 = vmul.f32 0.044715, %v2733_v18  ;;  %v403_v10 = vld [vmem:[%s7489_s6 + $0x90] sm:$0xff]  ;;  %v4838_v15 = vld [vmem:[%s7488_s5 + $0x18] sm:$0xff]  }
 0x25d   : > { %v4928_v44 = vpop.eup %4927  ;;  %v2927_v63 = vmul.f32 0.5, %v2893_v16  ;;  %v2895_v29 = vadd.f32 1.0, %v4926_v34  ;;  %v2832_v46 = vmul.f32 0.7978846, %v2798_v59  ;;  %v2800_v13 = vadd.f32 %v2766_v42, %v5894_v48  ;;  %v2636_v2 = vpop.f32.mrb[82].mxu0  ;;  %v404_v17 = vld [vmem:[%s7489_s6 + $0x98] sm:$0xff]  ;;  %2174 = vperm.xlu0 %4778, %v403_v10  }
 0x25e   : > { %v2928_v57 = vmul.f32 0.5, %v2894_v25  ;;  %v2896_v19 = vadd.f32 1.0, %v4928_v44  ;;  %4933 = vtanh.f32 %v2831_v31  ;;  %v2833_v5 = vmul.f32 0.7978846, %v2799_v12  ;;  %v2638_v24 = vpop.f32.mrb[83].mxu0  ;;  %v5009_v18 = vld [vmem:[%s7486_s3 + $0x88] sm:$0xff]   ;;  %2179 = vperm.xlu1 %4779, %v404_v17  }
 0x25f   : > { %v5946_v51 = vmul.f32 %v2927_v63, %v5810_v36  ;;  %v2929_v26 = vmul.f32 0.5, %v2895_v29  ;;  %4935 = vtanh.f32 %v2832_v46  ;;  %v2834_v58 = vmul.f32 0.7978846, %v2800_v13  ;;  %4689 = vmatmul.mubr.bf16.vlgmr.msra.gmra.mrb[32].mxu1 %v4836_v38  ;;  %v5010_v12 = vld [vmem:[%s7486_s3 + $0xd0] sm:$0xff]   ;;  %v405_v63 = vld [vmem:[%s7489_s6 + $0xa0] sm:$0xff]  ;;  %v408_v17 = vld [vmem:[%s7489_s6 + $0xb8] sm:$0xff] }
 0x260   : > { %v5952_v6 = vmul.f32 %v2928_v57, %v5813_v33  ;;  %v2930_v47 = vmul.f32 0.5, %v2896_v19  ;;  %4937 = vtanh.f32 %v2833_v5  ;;  %4521 = vmatpush3.bf16.msra.mxu1 %v5007_v41  ;;  %4692 = vmatprep.mubr.bf16.mxu1 %v4837_v9  ;;  %v2768_v43 = vmul.f32 0.044715, %v2734_v52  ;;  %v5008_v33 = vld [vmem:[%s7486_s3 + $0xc8] sm:$0xff]   ;;  %v407_v10 = vld [vmem:[%s7489_s6 + $0xb0] sm:$0xff] }
 0x261   : > { %v5958_v36 = vmul.f32 %v2929_v26, %v5818_v20  ;;  %4939 = vtanh.f32 %v2834_v58  ;;  %v5961_v55 = vadd.f32 %v2632_v54, %v5278_v49  ;;  %4522 = vmatprep.subr.bf16.mxu1 %v5008_v33  ;;  %v2801_v20 = vadd.f32 %v2767_v61, %v5907_v40  ;;  %v4839_v54 = vld [vmem:[%s7488_s5 + $0x20] sm:$0xff]   ;;  %v4840_v41 = vld [vmem:[%s7488_s5 + $0x28] sm:$0xff]   ;;  %2184 = vperm.xlu0 %4778, %v405_v63  }
 0x262   : > { %v4930_v56 = vpop.eup %4929  ;;  %v4351_v8 = vpack.c.bf16 %v5952_v6, %v5946_v51  ;;  %v5969_v1 = vmul.f32 %v2930_v47, %v5826_v62  ;;  %v5973_v28 = vadd.f32 %v2634_v0, %v5280_v50  ;;  %v2802_v7 = vadd.f32 %v2768_v43, %v5910_v32  ;;  %v5012_v43 = vld [vmem:[%s7486_s3 + $0xd8] sm:$0xff]  }
 0x263   : > { %v2897_v21 = vadd.f32 1.0, %v4930_v56  ;;  %v2701_v22 = vmul.f32 %v5961_v55, %v5961_v55  ;;  %v5982_v27 = vadd.f32 %v2636_v2, %v5278_v49  ;;  %v2642_v62 = vpop.f32.mrb[84].mxu0  ;;  %v2835_v3 = vmul.f32 0.7978846, %v2801_v20  ;;  %v406_v2 = vld [vmem:[%s7489_s6 + $0xa8] sm:$0xff] }
 0x264   : > { %v4932_v4 = vpop.eup %4931  ;;  %3099 = vst [vmem:[#allocation2] sm:$0xff] %v4351_v8  ;;  %v5992_v14 = vpack.c.bf16 %v5969_v1, %v5958_v36  ;;  %v2702_v16 = vmul.f32 %v5973_v28, %v5973_v28  ;;  %v5997_v59 = vadd.f32 %v2638_v24, %v5280_v50  ;;  %v2644_v42 = vpop.f32.mrb[85].mxu0  ;;  %4523 = vmatpush3.bf16.msra.mxu1 %v5009_v18  ;;  %v2836_v34 = vmul.f32 0.7978846, %v2802_v7 }
 0x265   : > { %v2931_v38 = vmul.f32 0.5, %v2897_v21  ;;  %v2898_v30 = vadd.f32 1.0, %v4932_v4  ;;  %v2735_v25 = vmul.f32 %v2701_v22, %v5961_v55  ;;  %v6006_v31 = vpop.f32.mrb[86].mxu0  ;;  %4524 = vmatprep.subr.bf16.mxu1 %v5010_v12  ;;  %4941 = vtanh.f32 %v2835_v3  ;;  %2189 = vperm.xlu1 %4779, %v406_v2  }
 0x266   : > { %v2736_v52 = vmul.f32 %v2702_v16, %v5973_v28  ;;  %v2703_v0 = vmul.f32 %v5982_v27, %v5982_v27  ;;  %v2704_v9 = vmul.f32 %v5997_v59, %v5997_v59  ;;  %v6016_v44 = vpop.f32.mrb[87].mxu0  ;;  %4943 = vtanh.f32 %v2836_v34  ;;  %2194 = vperm.xlu0 %4778, %v407_v10  }
 0x267   : > { %v6022_v29 = vmul.f32 %v2931_v38, %v5849_v39  ;;  %v2932_v46 = vmul.f32 0.5, %v2898_v30  ;;  %v2769_v13 = vmul.f32 0.044715, %v2735_v25  ;;  %4693 = vmatmul.mubr.bf16.gmra.mrb[36].mxu1 %v4838_v15  ;;  %v6030_v11 = vadd.f32 %v2642_v62, %v5278_v49  ;;  %v5011_v39 = vld [vmem:[%s7486_s3 + $0x90] sm:$0xff]   ;;  %v5013_v38 = vld [vmem:[%s7486_s3 + $0x98] sm:$0xff]  }
 0x268   : > { %v4934_v57 = vpop.eup %4933  ;;  %v2770_v19 = vmul.f32 0.044715, %v2736_v52  ;;  %v2737_v5 = vmul.f32 %v2703_v0, %v5982_v27  ;;  %v2738_v24 = vmul.f32 %v2704_v9, %v5997_v59  ;;  %4696 = vmatprep.mubr.bf16.mxu1 %v4839_v54  ;;  %4525 = vmatpush3.bf16.msra.mxu1 %v5011_v39  ;;  %v6040_v61 = vadd.f32 %v2644_v42, %v5280_v50  ;;  %v4841_v54 = vld [vmem:[%s7488_s5 + $0x30] sm:$0xff]   ;;  %v5014_v52 = vld [vmem:[%s7486_s3 + $0xe0] sm:$0xff]  }
 0x269   : > { %v4936_v26 = vpop.eup %4935  ;;  %v6036_v58 = vmul.f32 %v2932_v46, %v5856_v37  ;;  %v2899_v53 = vadd.f32 1.0, %v4934_v57  ;;  %v2803_v47 = vadd.f32 %v2769_v13, %v5961_v55  ;;  %4526 = vmatprep.subr.bf16.mxu1 %v5012_v43  ;;  %2199 = vperm.xlu1 %4779, %v408_v17   ;;  %v409_v46 = vld [vmem:[%s7489_s6 + $0xc0] sm:$0xff]  ;;  %v2705_v57 = vmul.f32 %v6030_v11, %v6030_v11 }
 0x26a   : > { %v4938_v33 = vpop.eup %4937  ;;  %v2900_v56 = vadd.f32 1.0, %v4936_v26  ;;  %v2804_v37 = vadd.f32 %v2770_v19, %v5973_v28  ;;  %v2771_v8 = vmul.f32 0.044715, %v2737_v5  ;;  %v2772_v20 = vmul.f32 0.044715, %v2738_v24  ;;  %v410_v19 = vld [vmem:[%s7489_s6 + $0xc8] sm:$0xff]  ;;  %2204 = vperm.xlu0 %4778, %v409_v46  }
 0x26b   : > { %v4940_v21 = vpop.eup %4939  ;;  %v2933_v7 = vmul.f32 0.5, %v2899_v53  ;;  %v2901_v22 = vadd.f32 1.0, %v4938_v33  ;;  %v2837_v62 = vmul.f32 0.7978846, %v2803_v47  ;;  %v2652_v15 = vpop.f32.mrb[88].mxu0  ;;  %v5015_v39 = vld [vmem:[%s7486_s3 + $0xa0] sm:$0xff]   ;;  %v2739_v47 = vmul.f32 %v2705_v57, %v6030_v11 }
 0x26c   : > { %v2934_v4 = vmul.f32 0.5, %v2900_v56  ;;  %v2902_v3 = vadd.f32 1.0, %v4940_v21  ;;  %v2838_v16 = vmul.f32 0.7978846, %v2804_v37  ;;  %v2805_v42 = vadd.f32 %v2771_v8, %v5982_v27  ;;  %v2654_v18 = vpop.f32.mrb[89].mxu0  ;;  %4527 = vmatpush3.bf16.msra.mxu1 %v5013_v38  ;;  %v4842_v56 = vld [vmem:[%s7488_s5 + $0x38] sm:$0xff]  }
 0x26d   : > { %v6063_v30 = vmul.f32 %v2933_v7, %v5872_v23  ;;  %v2935_v34 = vmul.f32 0.5, %v2901_v22  ;;  %4945 = vtanh.f32 %v2837_v62  ;;  %v2806_v25 = vadd.f32 %v2772_v20, %v5997_v59  ;;  %v6066_v12 = vpop.f32.mrb[90].mxu0  ;;  %4528 = vmatprep.subr.bf16.mxu1 %v5014_v52  ;;  %2209 = vperm.xlu1 %4779, %v410_v19   ;;  %v411_v37 = vld [vmem:[%s7489_s6 + $0xd0] sm:$0xff]  ;;  %v412_v8 = vld [vmem:[%s7489_s6 + $0xd8] sm:$0xff] }
 0x26e   : > { %v6072_v0 = vmul.f32 %v2934_v4, %v5880_v35  ;;  %v2936_v9 = vmul.f32 0.5, %v2902_v3  ;;  %4947 = vtanh.f32 %v2838_v16  ;;  %v2839_v63 = vmul.f32 0.7978846, %v2805_v42  ;;  %v6074_v23 = vpop.f32.mrb[91].mxu0  ;;  %v4843_v16 = vld [vmem:[%s7488_s5 + $0x40] sm:$0xff]   ;;  %2214 = vperm.xlu0 %4778, %v411_v37  }
 0x26f   : > { %v6080_v13 = vmul.f32 %v2935_v34, %v5889_v60  ;;  %v2840_v2 = vmul.f32 0.7978846, %v2806_v25  ;;  %v2706_v35 = vmul.f32 %v6040_v61, %v6040_v61  ;;  %4697 = vmatmul.mubr.bf16.gmra.mrb[40].mxu1 %v4840_v41  ;;  %v4942_v5 = vpop.eup %4941  ;;  %v6094_v60 = vadd.f32 %v6006_v31, %v5278_v49  ;;  %v5018_v25 = vld [vmem:[%s7486_s3 + $0xf0] sm:$0xff]  }
 0x270   : > { %v6090_v24 = vmul.f32 %v2936_v9, %v5894_v48  ;;  %4949 = vtanh.f32 %v2839_v63  ;;  %4700 = vmatprep.mubr.bf16.mxu1 %v4841_v54  ;;  %4529 = vmatpush3.bf16.msra.mxu1 %v5015_v39  ;;  %v4944_v26 = vpop.eup %4943  ;;  %v2903_v53 = vadd.f32 1.0, %v4942_v5  ;;  %v5016_v48 = vld [vmem:[%s7486_s3 + $0xe8] sm:$0xff]   ;;  %v6108_v33 = vadd.f32 %v6016_v44, %v5280_v50 }
 0x271   : > { %4951 = vtanh.f32 %v2840_v2  ;;  %v2740_v41 = vmul.f32 %v2706_v35, %v6040_v61  ;;  %4530 = vmatprep.subr.bf16.mxu1 %v5016_v48  ;;  %v2904_v31 = vadd.f32 1.0, %v4944_v26  ;;  %v2707_v43 = vmul.f32 %v6094_v60, %v6094_v60  ;;  %2219 = vperm.xlu1 %4779, %v412_v8   ;;  %v414_v39 = vld [vmem:[%s7489_s6 + $0xe8] sm:$0xff] }
 0x272   : > { %v2937_v20 = vmul.f32 0.5, %v2903_v53  ;;  %v2773_v10 = vmul.f32 0.044715, %v2739_v47  ;;  %v6120_v7 = vadd.f32 %v2652_v15, %v5278_v49  ;;  %v2708_v17 = vmul.f32 %v6108_v33, %v6108_v33  ;;  %v5017_v15 = vld [vmem:[%s7486_s3 + $0xa8] sm:$0xff]  }
 0x273   : > { %v2774_v21 = vmul.f32 0.044715, %v2740_v41  ;;  %v6122_v44 = vpop.f32.mrb[92].mxu0  ;;  %v2938_v22 = vmul.f32 0.5, %v2904_v31  ;;  %v2741_v62 = vmul.f32 %v2707_v43, %v6094_v60  ;;  %v6128_v4 = vadd.f32 %v2654_v18, %v5280_v50 }
 0x274   : > { %v6130_v3 = vpop.f32.mrb[93].mxu0  ;;  %4531 = vmatpush3.bf16.msra.mxu1 %v5017_v15  ;;  %v6139_v42 = vmul.f32 %v2937_v20, %v5907_v40  ;;  %v2807_v54 = vadd.f32 %v2773_v10, %v6030_v11  ;;  %v2709_v18 = vmul.f32 %v6120_v7, %v6120_v7  ;;  %v2742_v40 = vmul.f32 %v2708_v17, %v6108_v33 }
 0x275   : > { %v2808_v38 = vadd.f32 %v2774_v21, %v6040_v61  ;;  %v6145_v34 = vpop.f32.mrb[94].mxu0  ;;  %4532 = vmatprep.subr.bf16.mxu1 %v5018_v25  ;;  %v6151_v52 = vmul.f32 %v2938_v22, %v5910_v32  ;;  %v2775_v9 = vmul.f32 0.044715, %v2741_v62  ;;  %v2710_v63 = vmul.f32 %v6128_v4, %v6128_v4  ;;  %v413_v32 = vld [vmem:[%s7489_s6 + $0xe0] sm:$0xff]  ;;  %v4844_v21 = vld [vmem:[%s7488_s5 + $0x48] sm:$0xff]   ;;  %2229 = vperm.xlu1 %4779, %v414_v39   ;;  %v415_v22 = vld [vmem:[%s7489_s6 + $0xf0] sm:$0xff] }
 0x276   : > { %v6156_v46 = vpop.f32.mrb[95].mxu0  ;;  %v2841_v57 = vmul.f32 0.7978846, %v2807_v54  ;;  %v2743_v19 = vmul.f32 %v2709_v18, %v6120_v7  ;;  %v6161_v5 = vadd.f32 %v6066_v12, %v5278_v49  ;;  %v2776_v41 = vmul.f32 0.044715, %v2742_v40  ;;  %v5019_v12 = vld [vmem:[%s7486_s3 + $0xb0] sm:$0xff]   ;;  %2224 = vperm.xlu0 %4778, %v413_v32  }
 0x277   : > { %v4946_v2 = vpop.eup %4945  ;;  %v2842_v35 = vmul.f32 0.7978846, %v2808_v38  ;;  %4701 = vmatmul.mubr.bf16.gmra.mrb[44].mxu1 %v4842_v56  ;;  %v2809_v47 = vadd.f32 %v2775_v9, %v6094_v60  ;;  %v2744_v43 = vmul.f32 %v2710_v63, %v6128_v4  ;;  %v5020_v56 = vld [vmem:[%s7486_s3 + $0xf8] sm:$0xff]  }
 0x278   : > { %v4948_v26 = vpop.eup %4947  ;;  %v2905_v53 = vadd.f32 1.0, %v4946_v2  ;;  %4704 = vmatprep.mubr.bf16.mxu1 %v4843_v16  ;;  %4533 = vmatpush3.bf16.msra.mxu1 %v5019_v12  ;;  %4953 = vtanh.f32 %v2841_v57  ;;  %v2777_v31 = vmul.f32 0.044715, %v2743_v19  ;;  %v2810_v10 = vadd.f32 %v2776_v41, %v6108_v33  ;;  %v416_v18 = vld [vmem:[%s7489_s6 + $0xf8] sm:$0xff]  ;;  %v4845_v2 = vld [vmem:[%s7488_s5 + $0x50] sm:$0xff]  }
 0x279   : > { %v2906_v48 = vadd.f32 1.0, %v4948_v26  ;;  %4534 = vmatprep.subr.bf16.mxu1 %v5020_v56  ;;  %4955 = vtanh.f32 %v2842_v35  ;;  %v2843_v20 = vmul.f32 0.7978846, %v2809_v47  ;;  %v2778_v54 = vmul.f32 0.044715, %v2744_v43  ;;  %v5021_v57 = vld [vmem:[%s7486_s3 + $0xb8] sm:$0xff]   ;;  %2239 = vperm.xlu1 %4779, %v416_v18  }
 0x27a   : > { %v4950_v37 = vpop.eup %4949  ;;  %v2939_v8 = vmul.f32 0.5, %v2905_v53  ;;  %v2811_v15 = vadd.f32 %v2777_v31, %v6120_v7  ;;  %v2844_v40 = vmul.f32 0.7978846, %v2810_v10  ;;  %v2711_v53 = vmul.f32 %v6161_v5, %v6161_v5  ;;  %2234 = vperm.xlu0 %4778, %v415_v22  }
 0x27b   : > { %v4952_v62 = vpop.eup %4951  ;;  %v2940_v17 = vmul.f32 0.5, %v2906_v48  ;;  %v2907_v16 = vadd.f32 1.0, %v4950_v37  ;;  %v6185_v38 = vpop.f32.mrb[96].mxu0  ;;  %4957 = vtanh.f32 %v2843_v20  ;;  %v2812_v32 = vadd.f32 %v2778_v54, %v6128_v4 }
 0x27c   : > { %v6191_v25 = vmul.f32 %v2939_v8, %v5961_v55  ;;  %v2908_v9 = vadd.f32 1.0, %v4952_v62  ;;  %v6193_v63 = vpop.f32.mrb[97].mxu0  ;;  %4535 = vmatpush3.bf16.msra.mxu1 %v5021_v57  ;;  %v2845_v55 = vmul.f32 0.7978846, %v2811_v15  ;;  %4959 = vtanh.f32 %v2844_v40 }
 0x27d   : > { %v6202_v35 = vmul.f32 %v2940_v17, %v5973_v28  ;;  %v2941_v19 = vmul.f32 0.5, %v2907_v16  ;;  %v6205_v39 = vpop.f32.mrb[98].mxu0  ;;  %v6211_v47 = vadd.f32 %v6074_v23, %v5280_v50  ;;  %v2846_v12 = vmul.f32 0.7978846, %v2812_v32 }
 0x27e   : > { %v2942_v26 = vmul.f32 0.5, %v2908_v9  ;;  %v6213_v41 = vpop.f32.mrb[99].mxu0  ;;  %4961 = vtanh.f32 %v2845_v55  ;;  %v2745_v31 = vmul.f32 %v2711_v53, %v6161_v5  ;;  %v5055_v23 = vpack.c.bf16 %v5958_v36, %v5946_v51 }
 0x27f   : > { %v6216_v28 = vmul.f32 %v2941_v19, %v5982_v27  ;;  %4705 = vmatmul.mubr.bf16.gmra.mrb[48].mxu1 %v4844_v21  ;;  %v2712_v43 = vmul.f32 %v6211_v47, %v6211_v47  ;;  %4963 = vtanh.f32 %v2846_v12  ;;  %v5056_v27 = vpack.c.bf16 %v5969_v1, %v5952_v6 }
 0x280   : > { %v6219_v48 = vmul.f32 %v2942_v26, %v5997_v59  ;;  %4708 = vmatprep.mubr.bf16.mxu1 %v4845_v2  ;;  %v6230_v56 = vadd.f32 %v6122_v44, %v5278_v49  ;;  %v6234_v59 = vadd.f32 %v6130_v3, %v5280_v50  ;;  %v2779_v37 = vmul.f32 0.044715, %v2745_v31 }
 0x281   : > { %v2746_v8 = vmul.f32 %v2712_v43, %v6211_v47  ;;  %v6239_v20 = vadd.f32 %v6145_v34, %v5278_v49  ;;  %3579 = vmatprep.mubr.bf16.mxu0 %v5056_v27  ;;  %v6247_v1 = vadd.f32 %v6156_v46, %v5280_v50  ;;  %v6251_v44 = vpack.c.bf16 %v6072_v0, %v6036_v58  ;;  %v4846_v34 = vld [vmem:[%s7488_s5 + $0x58] sm:$0xff]   ;;  %v4847_v58 = vld [vmem:[%s7488_s5 + $0x60] sm:$0xff]  }
 0x282   : > { %v4954_v51 = vpop.eup %4953  ;;  %v2713_v6 = vmul.f32 %v6230_v56, %v6230_v56  ;;  %v2714_v36 = vmul.f32 %v6234_v59, %v6234_v59  ;;  %v2813_v22 = vadd.f32 %v2779_v37, %v6161_v5  ;;  %3580 = vmatmul.mubr.bf16.vlgmr.msra.gmra.mrb[104].mxu0 %v5055_v23 }
 0x283   : > { %v6253_v3 = vpop.f32.mrb[100].mxu0  ;;  %v4956_v10 = vpop.eup %4955  ;;  %v2909_v21 = vadd.f32 1.0, %v4954_v51  ;;  %v2780_v62 = vmul.f32 0.044715, %v2746_v8  ;;  %v2715_v46 = vmul.f32 %v6239_v20, %v6239_v20  ;;  %v2716_v54 = vmul.f32 %v6247_v1, %v6247_v1  ;;  %3587 = vmatprep.mubr.bf16.mxu0 %v6251_v44 }
 0x284   : > { %v6261_v17 = vpop.f32.mrb[101].mxu0  ;;  %v2910_v0 = vadd.f32 1.0, %v4956_v10  ;;  %v2747_v16 = vmul.f32 %v2713_v6, %v6230_v56  ;;  %v2748_v15 = vmul.f32 %v2714_v36, %v6234_v59  ;;  %v2847_v2 = vmul.f32 0.7978846, %v2813_v22 }
 0x285   : > { %v2686_v18 = vpop.f32.mrb[102].mxu0  ;;  %v4958_v9 = vpop.eup %4957  ;;  %v2943_v40 = vmul.f32 0.5, %v2909_v21  ;;  %v2814_v57 = vadd.f32 %v2780_v62, %v6211_v47  ;;  %v2749_v19 = vmul.f32 %v2715_v46, %v6239_v20 }
 0x286   : > { %v2687_v55 = vpop.f32.mrb[103].mxu0  ;;  %v2944_v32 = vmul.f32 0.5, %v2910_v0  ;;  %v2911_v26 = vadd.f32 1.0, %v4958_v9  ;;  %v2781_v53 = vmul.f32 0.044715, %v2747_v16  ;;  %v4960_v31 = vpop.eup %4959  ;;  %4965 = vtanh.f32 %v2847_v2 }
 0x287   : > { %v2782_v12 = vmul.f32 0.044715, %v2748_v15  ;;  %4709 = vmatmul.mubr.bf16.gmra.mrb[52].mxu1 %v4846_v34  ;;  %v6274_v43 = vmul.f32 %v2943_v40, %v6030_v11  ;;  %v2848_v23 = vmul.f32 0.7978846, %v2814_v57  ;;  %v2783_v27 = vmul.f32 0.044715, %v2749_v19 }
 0x288   : > { %4712 = vmatprep.mubr.bf16.mxu1 %v4847_v58  ;;  %v4962_v37 = vpop.eup %4961  ;;  %v6277_v8 = vmul.f32 %v2944_v32, %v6040_v61  ;;  %v2945_v51 = vmul.f32 0.5, %v2911_v26  ;;  %v2912_v6 = vadd.f32 1.0, %v4960_v31  ;;  %v2815_v36 = vadd.f32 %v2781_v53, %v6230_v56  ;;  %v4848_v61 = vld [vmem:[%s7488_s5 + $0x68] sm:$0xff]   ;;  %v4849_v58 = vld [vmem:[%s7488_s5 + $0x70] sm:$0xff]  }
 0x289   : > { %v2913_v10 = vadd.f32 1.0, %v4962_v37  ;;  %4967 = vtanh.f32 %v2848_v23  ;;  %v2816_v34 = vadd.f32 %v2782_v12, %v6234_v59  ;;  %v2817_v21 = vadd.f32 %v2783_v27, %v6239_v20  ;;  %v4964_v11 = vpop.eup %4963 }
 0x28a   : > { %v6283_v22 = vmul.f32 %v2945_v51, %v6094_v60  ;;  %v2946_v62 = vmul.f32 0.5, %v2912_v6  ;;  %v2849_v46 = vmul.f32 0.7978846, %v2815_v36  ;;  %v2914_v16 = vadd.f32 1.0, %v4964_v11 }
 0x28b   : > { %v2947_v0 = vmul.f32 0.5, %v2913_v10  ;;  %v2850_v15 = vmul.f32 0.7978846, %v2816_v34  ;;  %v2851_v18 = vmul.f32 0.7978846, %v2817_v21  ;;  %v2750_v60 = vmul.f32 %v2716_v54, %v6247_v1 }
 0x28c   : > { %v6292_v9 = vmul.f32 %v2946_v62, %v6108_v33  ;;  %4969 = vtanh.f32 %v2849_v46  ;;  %v6297_v40 = vpack.c.bf16 %v6063_v30, %v6022_v29  ;;  %v2948_v57 = vmul.f32 0.5, %v2914_v16 }
 0x28d   : > { %v6300_v2 = vmul.f32 %v2947_v0, %v6120_v7  ;;  %4971 = vtanh.f32 %v2850_v15  ;;  %v6304_v19 = vadd.f32 %v6185_v38, %v5278_v49  ;;  %v2784_v55 = vmul.f32 0.044715, %v2750_v60 }
 0x28e   : > { %4973 = vtanh.f32 %v2851_v18  ;;  %3588 = vmatmul.mubr.bf16.gmra.mrb[108].mxu0 %v6297_v40  ;;  %v6309_v33 = vadd.f32 %v6193_v63, %v5280_v50  ;;  %v6312_v29 = vmul.f32 %v2948_v57, %v6128_v4  ;;  %v6318_v7 = vadd.f32 %v6205_v39, %v5278_v49 }
 0x28f   : > { %4713 = vmatmul.mubr.bf16.gmra.mrb[56].mxu1 %v4848_v61  ;;  %v2717_v30 = vmul.f32 %v6304_v19, %v6304_v19  ;;  %v6322_v38 = vadd.f32 %v6213_v41, %v5280_v50  ;;  %v2818_v54 = vadd.f32 %v2784_v55, %v6247_v1  ;;  %v6329_v4 = vpack.c.bf16 %v6151_v52, %v6090_v24 }
 0x290   : > { %4716 = vmatprep.mubr.bf16.mxu1 %v4849_v58  ;;  %v2718_v63 = vmul.f32 %v6309_v33, %v6309_v33  ;;  %v6333_v32 = vpack.c.bf16 %v6139_v42, %v6080_v13  ;;  %v4966_v39 = vpop.eup %4965  ;;  %v2719_v41 = vmul.f32 %v6318_v7, %v6318_v7  ;;  %v6344_v24 = vadd.f32 %v6253_v3, %v5278_v49  ;;  %v4850_v13 = vld [vmem:[%s7488_s5 + $0x78] sm:$0xff]  }
 0x291   : > { %v2751_v26 = vmul.f32 %v2717_v30, %v6304_v19  ;;  %v2720_v53 = vmul.f32 %v6322_v38, %v6322_v38  ;;  %v2915_v12 = vadd.f32 1.0, %v4966_v39  ;;  %v2852_v31 = vmul.f32 0.7978846, %v2818_v54  ;;  %3595 = vmatprep.mubr.bf16.mxu0 %v6329_v4 }
 0x292   : > { %v2752_v23 = vmul.f32 %v2718_v63, %v6309_v33  ;;  %v2753_v27 = vmul.f32 %v2719_v41, %v6318_v7  ;;  %v6353_v51 = vadd.f32 %v6261_v17, %v5280_v50  ;;  %v2721_v21 = vmul.f32 %v6344_v24, %v6344_v24 }
 0x293   : > { %v4968_v42 = vpop.eup %4967  ;;  %v2785_v52 = vmul.f32 0.044715, %v2751_v26  ;;  %v2754_v37 = vmul.f32 %v2720_v53, %v6322_v38  ;;  %v2949_v6 = vmul.f32 0.5, %v2915_v12  ;;  %4975 = vtanh.f32 %v2852_v31  ;;  %v3132_v31 = vld [vmem:[#allocation2] sm:$0xff] }
 0x294   : > { %v2916_v36 = vadd.f32 1.0, %v4968_v42  ;;  %v2786_v10 = vmul.f32 0.044715, %v2752_v23  ;;  %v2787_v3 = vmul.f32 0.044715, %v2753_v27  ;;  %v2722_v50 = vmul.f32 %v6353_v51, %v6353_v51 }
 0x295   : > { %v2819_v49 = vadd.f32 %v2785_v52, %v6304_v19  ;;  %v2788_v34 = vmul.f32 0.044715, %v2754_v37  ;;  %v2983_v62 = vmul.f32 %v2949_v6, %v6161_v5  ;;  %v2755_v55 = vmul.f32 %v2721_v21, %v6344_v24 }
 0x296   : > { %v4970_v11 = vpop.eup %4969  ;;  %v2950_v46 = vmul.f32 0.5, %v2916_v36  ;;  %v2820_v61 = vadd.f32 %v2786_v10, %v6309_v33  ;;  %3596 = vmatmul.mubr.bf16.gmra.mrb[112].mxu0 %v6333_v32  ;;  %v2821_v16 = vadd.f32 %v2787_v3, %v6318_v7  ;;  %v2756_v23 = vmul.f32 %v2722_v50, %v6353_v51 }
 0x297   : > { %4717 = vmatmul.mubr.bf16.gmra.mrb[60].mxu1 %v4850_v13  ;;  %v4972_v17 = vpop.eup %4971  ;;  %v2917_v58 = vadd.f32 1.0, %v4970_v11  ;;  %v2853_v0 = vmul.f32 0.7978846, %v2819_v49  ;;  %v2822_v15 = vadd.f32 %v2788_v34, %v6322_v38  ;;  %v2789_v12 = vmul.f32 0.044715, %v2755_v55 }
 0x298   : > { %v4974_v18 = vpop.eup %4973  ;;  %v2984_v60 = vmul.f32 %v2950_v46, %v6211_v47  ;;  %v2918_v5 = vadd.f32 1.0, %v4972_v17  ;;  %v2854_v57 = vmul.f32 0.7978846, %v2820_v61  ;;  %v2855_v63 = vmul.f32 0.7978846, %v2821_v16 }
 0x299   : > { %v2951_v30 = vmul.f32 0.5, %v2917_v58  ;;  %v2919_v54 = vadd.f32 1.0, %v4974_v18  ;;  %4977 = vtanh.f32 %v2853_v0  ;;  %v2856_v26 = vmul.f32 0.7978846, %v2822_v15 }
 0x29a   : > { %v2952_v39 = vmul.f32 0.5, %v2918_v5  ;;  %4979 = vtanh.f32 %v2854_v57  ;;  %v6374_v13 = vpack.c.bf16 %v6219_v48, %v6202_v35  ;;  %v2823_v52 = vadd.f32 %v2789_v12, %v6344_v24 }
 0x29b   : > { %v6368_v41 = vmul.f32 %v2951_v30, %v6230_v56  ;;  %v2953_v53 = vmul.f32 0.5, %v2919_v54  ;;  %4981 = vtanh.f32 %v2855_v63  ;;  %v6380_v56 = vpack.c.bf16 %v6216_v28, %v6191_v25 }
 0x29c   : > { %v2986_v47 = vmul.f32 %v2952_v39, %v6234_v59  ;;  %4983 = vtanh.f32 %v2856_v26  ;;  %v6384_v27 = vpack.c.bf16 %v6292_v9, %v6277_v8  ;;  %v2790_v37 = vmul.f32 0.044715, %v2756_v23  ;;  %3603 = vmatprep.mubr.bf16.mxu0 %v6374_v13 }
 0x29d   : > { %v2987_v42 = vmul.f32 %v2953_v53, %v6239_v20  ;;  %v4976_v59 = vpop.eup %4975  ;;  %v6389_v35 = vpack.c.bf16 %v6283_v22, %v6274_v43  ;;  %v4297_v48 = vcombine.low %v3132_v31, %v5992_v14  ;;  %v2857_v6 = vmul.f32 0.7978846, %v2823_v52 }
 0x29e   : > { %v2920_v20 = vadd.f32 1.0, %v4976_v59  ;;  %3604 = vmatmul.mubr.bf16.gmra.mrb[116].mxu0 %v6380_v56  ;;  %v4298_v25 = vcombine.high %v3132_v31, %v5992_v14  ;;  %v3238_v28 = vshll.u32 %v6251_v44, 16  ;;  %v2824_v8 = vadd.f32 %v2790_v37, %v6353_v51 }
 0x29f   : > { %3611 = vmatprep.mubr.bf16.mxu0 %v6384_v27  ;;  %v6398_v9 = vpack.c.bf16 %v2984_v60, %v6312_v29  ;;  %v6401_v43 = vpack.c.bf16 %v2983_v62, %v6300_v2  ;;  %v3219_v22 = vshrl.u32 %v4297_v48, 16  ;;  %4985 = vtanh.f32 %v2857_v6 }
 0x2a0   : > { %v2954_v36 = vmul.f32 0.5, %v2920_v20  ;;  %v3231_v10 = vshrl.u32 %v4298_v25, 16  ;;  %v3233_v49 = vshll.u32 %v4298_v25, 16  ;;  %v2858_v3 = vmul.f32 0.7978846, %v2824_v8 }
 0x2a1   : > { %v3240_v34 = vrot.slane %v3238_v28, 1  ;;  %v3221_v14 = vshll.u32 %v4297_v48, 16  ;;  %v3226_v21 = vshll.u32 %v6297_v40, 16  ;;  %v3250_v29 = vshrl.u32 %v6251_v44, 16 }
 0x2a2   : > { %v2988_v46 = vmul.f32 %v2954_v36, %v6247_v1  ;;  %v3235_v61 = vrot.slane %v3233_v49, 1  ;;  %v3254_v50 = vshll.u32 %v6329_v4, 16  ;;  %4987 = vtanh.f32 %v2858_v3 }
 0x2a3   : > { %v4978_v11 = vpop.eup %4977  ;;  %v3223_v17 = vrot.slane %v3221_v14, 1  ;;  %v3228_v58 = vrot.slane %v3226_v21, 1  ;;  %v3252_v18 = vor.u32 %v3250_v29, %v3240_v34  ;;  %v6417_v52 = vpack.c.bf16 %v2987_v42, %v6368_v41 }
 0x2a4   : > { %v4980_v2 = vpop.eup %4979  ;;  %v2921_v62 = vadd.f32 1.0, %v4978_v11  ;;  %v3236_v15 = vor.u32 %v3235_v61, %v3231_v10  ;;  %v3256_v30 = vrot.slane %v3254_v50, 1  ;;  %v6409_v63 = vpack.c.bf16 %v2988_v46, %v2986_v47 }
 0x2a5   : > { %v4982_v0 = vpop.eup %4981  ;;  %v2922_v16 = vadd.f32 1.0, %v4980_v2  ;;  %v3224_v55 = vor.u32 %v3223_v17, %v3219_v22  ;;  %v3242_v47 = vshrl.u32 %v6297_v40, 16  ;;  %v3266_v37 = vshrl.u32 %v6329_v4, 16 }
 0x2a6   : > { %v4984_v60 = vpop.eup %4983  ;;  %v2955_v5 = vmul.f32 0.5, %v2921_v62  ;;  %v2923_v57 = vadd.f32 1.0, %v4982_v0  ;;  %3612 = vmatmul.mubr.bf16.gmra.mrb[120].mxu0 %v6389_v35  ;;  %v3241_v44 = vsel %vm1176_vm1, %v3236_v15, %v3240_v34  ;;  %v3257_v12 = vsel %vm1176_vm1, %v3252_v18, %v3256_v30 }
 0x2a7   : > { %v2956_v1 = vmul.f32 0.5, %v2922_v16  ;;  %v2924_v54 = vadd.f32 1.0, %v4984_v60  ;;  %3402 = vmatprep.mubr.bf16.mxu1 %v3241_v44  ;;  %3619 = vmatprep.mubr.bf16.mxu0 %v6398_v9  ;;  %v3229_v53 = vsel %vm1176_vm1, %v3224_v55, %v3228_v58  ;;  %v3270_v48 = vshll.u32 %v6374_v13, 16 }
 0x2a8   : > { %v2989_v39 = vmul.f32 %v2955_v5, %v6304_v19  ;;  %v2957_v26 = vmul.f32 0.5, %v2923_v57  ;;  %3403 = vmatmul.mubr.bf16.vlgmr.msra.gmra.mrb[64].mxu1 %v3229_v53  ;;  %v3246_v19 = vshll.u32 %v6333_v32, 16  ;;  %v3258_v25 = vshrl.u32 %v6333_v32, 16 }
 0x2a9   : > { %v2990_v31 = vmul.f32 %v2956_v1, %v6309_v33  ;;  %v2958_v23 = vmul.f32 0.5, %v2924_v54  ;;  %3410 = vmatprep.mubr.bf16.mxu1 %v3257_v12  ;;  %v4986_v20 = vpop.eup %4985  ;;  %v3244_v33 = vor.u32 %v3242_v47, %v3228_v58  ;;  %v3268_v42 = vor.u32 %v3266_v37, %v3256_v30 }
 0x2aa   : > { %v2991_v59 = vmul.f32 %v2957_v26, %v6318_v7  ;;  %v2925_v28 = vadd.f32 1.0, %v4986_v20  ;;  %v3248_v41 = vrot.slane %v3246_v19, 1  ;;  %v3272_v8 = vrot.slane %v3270_v48, 1 }
 0x2ab   : > { %v2992_v6 = vmul.f32 %v2958_v23, %v6322_v38  ;;  %v3262_v40 = vshll.u32 %v6380_v56, 16  ;;  %v3282_v7 = vshrl.u32 %v6374_v13, 16  ;;  %v3286_v22 = vshll.u32 %v6384_v27, 16 }
 0x2ac   : > { %v4988_v36 = vpop.eup %4987  ;;  %v2959_v4 = vmul.f32 0.5, %v2925_v28  ;;  %v3249_v10 = vsel %vm1176_vm1, %v3244_v33, %v3248_v41  ;;  %v3273_v49 = vsel %vm1176_vm1, %v3268_v42, %v3272_v8  ;;  %v3260_v38 = vor.u32 %v3258_v25, %v3248_v41 }
 0x2ad   : > { %v2926_v3 = vadd.f32 1.0, %v4988_v36  ;;  %v6432_v32 = vpack.c.bf16 %v2992_v6, %v2990_v31  ;;  %v6434_v34 = vpack.c.bf16 %v2991_v59, %v2989_v39  ;;  %v3264_v14 = vrot.slane %v3262_v40, 1 }
 0x2ae   : > { %3620 = vmatmul.mubr.bf16.gmra.mrb[124].mxu0 %v6401_v43  ;;  %v2993_v21 = vmul.f32 %v2959_v4, %v6344_v24  ;;  %v3284_v13 = vor.u32 %v3282_v7, %v3272_v8  ;;  %v3288_v11 = vrot.slane %v3286_v22, 1  ;;  %v3274_v46 = vshrl.u32 %v6380_v56, 16 }
 0x2af   : > { %3627 = vmatprep.mubr.bf16.mxu0 %v6409_v63  ;;  %v2960_v61 = vmul.f32 0.5, %v2926_v3  ;;  %v3265_v29 = vsel %vm1176_vm1, %v3260_v38, %v3264_v14  ;;  %v3278_v50 = vshll.u32 %v6389_v35, 16  ;;  %v3298_v2 = vshrl.u32 %v6384_v27, 16 }
 0x2b0   : > { %3411 = vmatmul.mubr.bf16.gmra.mrb[68].mxu1 %v3249_v10  ;;  %v3289_v62 = vsel %vm1176_vm1, %v3284_v13, %v3288_v11  ;;  %v3276_v17 = vor.u32 %v3274_v46, %v3264_v14  ;;  %v3302_v24 = vshll.u32 %v6398_v9, 16  ;;  %v3290_v58 = vshrl.u32 %v6389_v35, 16  ;;  %v5022_v10 = vld [vmem:[%s7488_s5] sm:$0xff]  }
 0x2b1   : > { %3418 = vmatprep.mubr.bf16.mxu1 %v3273_v49  ;;  %v2994_v0 = vmul.f32 %v2960_v61, %v6353_v51  ;;  %v3280_v16 = vrot.slane %v3278_v50, 1  ;;  %v3300_v56 = vor.u32 %v3298_v2, %v3288_v11  ;;  %v3294_v15 = vshll.u32 %v6401_v43, 16  ;;  %v6472_v49 = vpop.permute.xlu0 %2084 }
 0x2b2   : > { %v3304_v18 = vrot.slane %v3302_v24, 1  ;;  %v3314_v60 = vshrl.u32 %v6398_v9, 16  ;;  %v3318_v5 = vshll.u32 %v6409_v63, 16  ;;  %v3306_v27 = vshrl.u32 %v6401_v43, 16  ;;  %7551 = vst [vmem:[#allocation3_spill] sm:$0xff] %v6472_v49 }
 0x2b3   : > { %v4367_v57 = vpack.c.bf16 %v2994_v0, %v2993_v21  ;;  %v3281_v55 = vsel %vm1176_vm1, %v3276_v17, %v3280_v16  ;;  %v3292_v30 = vor.u32 %v3290_v58, %v3280_v16  ;;  %v3296_v1 = vrot.slane %v3294_v15, 1 }
 0x2b4   : > { %v3305_v35 = vsel %vm1176_vm1, %v3300_v56, %v3304_v18  ;;  %v3316_v54 = vor.u32 %v3314_v60, %v3304_v18  ;;  %v3320_v51 = vrot.slane %v3318_v5, 1  ;;  %v3310_v44 = vshll.u32 %v6417_v52, 16 }
 0x2b5   : > { %3115 = vst [vmem:[#allocation2 + $0x80] sm:$0xff] %v4367_v57  ;;  %v3297_v9 = vsel %vm1176_vm1, %v3292_v30, %v3296_v1  ;;  %v3308_v39 = vor.u32 %v3306_v27, %v3296_v1  ;;  %v3330_v26 = vshrl.u32 %v6409_v63, 16  ;;  %v3334_v43 = vshll.u32 %v6432_v32, 16  ;;  %v6476_v3 = vpop.permute.xlu0 %2089 }
 0x2b6   : > { %3628 = vmatmul.mubr.bf16.gmra.mrb[128].mxu0 %v6417_v52  ;;  %v3321_v53 = vsel %vm1176_vm1, %v3316_v54, %v3320_v51  ;;  %v3312_v12 = vrot.slane %v3310_v44, 1  ;;  %v3322_v31 = vshrl.u32 %v6417_v52, 16  ;;  %v3326_v23 = vshll.u32 %v6434_v34, 16  ;;  %7553 = vst [vmem:[#allocation5_spill] sm:$0xff] %v6476_v3 }
 0x2b7   : > { %3635 = vmatprep.mubr.bf16.mxu0 %v6432_v32  ;;  %v3332_v47 = vor.u32 %v3330_v26, %v3320_v51  ;;  %v3336_v59 = vrot.slane %v3334_v43, 1  ;;  %v3346_v25 = vshrl.u32 %v6432_v32, 16  ;;  %v3338_v7 = vshrl.u32 %v6434_v34, 16  ;;  %v6474_v38 = vpop.permute.xlu1 %2094 }
 0x2b8   : > { %3419 = vmatmul.mubr.bf16.gmra.mrb[72].mxu1 %v3265_v29  ;;  %v3313_v19 = vsel %vm1176_vm1, %v3308_v39, %v3312_v12  ;;  %v3324_v37 = vor.u32 %v3322_v31, %v3312_v12  ;;  %v3328_v48 = vrot.slane %v3326_v23, 1  ;;  %7552 = vst [vmem:[#allocation4_spill] sm:$0xff] %v6474_v38 }
 0x2b9   : > { %3426 = vmatprep.mubr.bf16.mxu1 %v3289_v62  ;;  %v3337_v63 = vsel %vm1176_vm1, %v3332_v47, %v3336_v59  ;;  %v3348_v42 = vor.u32 %v3346_v25, %v3336_v59  ;;  %v6480_v14 = vpop.permute.xlu0 %2104 }
 0x2ba   : > { %v3329_v20 = vsel %vm1176_vm1, %v3324_v37, %v3328_v48  ;;  %v3340_v36 = vor.u32 %v3338_v7, %v3328_v48  ;;  %7555 = vst [vmem:[#allocation7_spill] sm:$0xff] %v6480_v14 }
 0x2bb   : > { %v6478_v32 = vpop.permute.xlu1 %2099 }
 0x2bc   : > { %v3148_v52 = vld [vmem:[#allocation2 + $0x80] sm:$0x11]  ;;  %7554 = vst [vmem:[#allocation6_spill] sm:$0xff] %v6478_v32 }
 0x2bd   : > { %v4314_v6 = vcombine.high %v3148_v52, %v3148_v52  ;;  %v4313_v28 = vcombine.low %v3148_v52, %v3148_v52  ;;  %v6484_v21 = vpop.permute.xlu0 %2114 }
 0x2be   : > { %3636 = vmatmul.mubr.bf16.gmra.mrb[132].mxu0 %v6434_v34  ;;  %7557 = vst [vmem:[#allocation9_spill] sm:$0xff] %v6484_v21 }
 0x2bf   : > { %v3350_v33 = vshll.u32 %v4314_v6, 16  ;;  %v3342_v8 = vshll.u32 %v4313_v28, 16  ;;  %v6482_v34 = vpop.permute.xlu1 %2109 }
 0x2c0   : > { %3427 = vmatmul.mubr.bf16.gmra.mrb[76].mxu1 %v3281_v55  ;;  %7556 = vst [vmem:[#allocation8_spill] sm:$0xff] %v6482_v34 }
 0x2c1   : > { %3434 = vmatprep.mubr.bf16.mxu1 %v3305_v35  ;;  %v3352_v41 = vrot.slane %v3350_v33, 1  ;;  %v3344_v22 = vrot.slane %v3342_v8, 1  ;;  %v6488_v11 = vpop.permute.xlu0 %2124 }
 0x2c2   : > { %7559 = vst [vmem:[#allocation11_spill] sm:$0xff] %v6488_v11 }
 0x2c3   : > { %v3353_v40 = vsel %vm1176_vm1, %v3348_v42, %v3352_v41  ;;  %v3345_v4 = vsel %vm1176_vm1, %v3340_v36, %v3344_v22  ;;  %v6486_v13 = vpop.permute.xlu1 %2119 }
 0x2c4   : > { %7558 = vst [vmem:[#allocation10_spill] sm:$0xff] %v6486_v13 }
 0x2c7   : > { %v6490_v46 = vpop.permute.xlu1 %2129 }
 0x2c8   : > { %3435 = vmatmul.mubr.bf16.gmra.mrb[80].mxu1 %v3297_v9  ;;  %7560 = vst [vmem:[#allocation12_spill] sm:$0xff] %v6490_v46  ;;  %v6492_v61 = vpop.permute.xlu0 %2134 }
 0x2c9   : > { %3442 = vmatprep.mubr.bf16.mxu1 %v3321_v53  ;;  %7561 = vst [vmem:[#allocation13_spill] sm:$0xff] %v6492_v61 }
 0x2cb   : > { %v6494_v29 = vpop.permute.xlu1 %2139 }
 0x2cc   : > { %7562 = vst [vmem:[#allocation14_spill] sm:$0xff] %v6494_v29 }
 0x2cd   : > { %v6496_v50 = vpop.permute.xlu0 %2144 }
 0x2ce   : > { %7563 = vst [vmem:[#allocation15_spill] sm:$0xff] %v6496_v50 }
 0x2cf   : > { %v6498_v2 = vpop.permute.xlu1 %2149 }
 0x2d0   : > { %3443 = vmatmul.mubr.bf16.gmra.mrb[84].mxu1 %v3313_v19  ;;  %7564 = vst [vmem:[#allocation16_spill] sm:$0xff] %v6498_v2 }
 0x2d1   : > { %3450 = vmatprep.mubr.bf16.mxu1 %v3337_v63  ;;  %v6500_v0 = vpop.permute.xlu0 %2154 }
 0x2d2   : > { %7565 = vst [vmem:[#allocation17_spill] sm:$0xff] %v6500_v0 }
 0x2d3   : > { %v6502_v16 = vpop.permute.xlu1 %2159 }
 0x2d4   : > { %7566 = vst [vmem:[#allocation18_spill] sm:$0xff] %v6502_v16 }
 0x2d7   : > { %v6510_v5 = vpop.permute.xlu0 %2164 }
 0x2d8   : > { %3451 = vmatmul.mubr.bf16.gmra.mrb[88].mxu1 %v3329_v20  ;;  %7567 = vst [vmem:[#allocation19_spill] sm:$0xff] %v6510_v5  ;;  %v6526_v51 = vpop.permute.xlu1 %2169 }
 0x2d9   : > { %3458 = vmatprep.mubr.bf16.mxu1 %v3353_v40  ;;  %7568 = vst [vmem:[#allocation20_spill] sm:$0xff] %v6526_v51 }
 0x2dc   : > { %v6540_v53 = vpop.permute.xlu0 %2174 }
 0x2dd   : > { %7569 = vst [vmem:[#allocation21_spill] sm:$0xff] %v6540_v53  ;;  %v6545_v47 = vpop.permute.xlu1 %2179 }
 0x2de   : > { %7570 = vst [vmem:[#allocation22_spill] sm:$0xff] %v6545_v47 }
 0x2e0   : > { %3459 = vmatmul.mubr.bf16.gmra.mrb[92].mxu1 %v3345_v4  ;;  %v6559_v33 = vpop.permute.xlu0 %2184 }
 0x2e1   : > { %4736 = vmatprep.mubr.bf16.mxu1 %v5022_v10  ;;  %7571 = vst [vmem:[#allocation23_spill] sm:$0xff] %v6559_v33 }
 0x2e4   : > { %v6562_v28 = vpop.permute.xlu1 %2189 }
 0x2e5   : > { %7572 = vst [vmem:[#allocation24_spill] sm:$0xff] %v6562_v28  ;;  %v6574_v10 = vpop.permute.xlu0 %2194 }
 0x2e6   : > { %7573 = vst [vmem:[#allocation25_spill] sm:$0xff] %v6574_v10 }
 0x332   : > { %v4690_v62 = vpop.f32.mrb[32].mxu1 }
 0x333   : > { %v1955_v17 = vpop.f32.mrb[33].mxu1  ;;  %v6505_v15 = vadd.f32 %v4690_v62, %v6474_v38  ;;  %v6732_v38 = vadd.s32 144, %v5271_v45 }
 0x334   : > { %v4691_v24 = vpop.f32.mrb[34].mxu1  ;;  %v6513_v27 = vadd.f32 %v6472_v49, %v1955_v17  ;;  %v6726_v49 = vadd.s32 128, %v5271_v45 }
 0x335   : > { %v1958_v58 = vpop.f32.mrb[35].mxu1  ;;  %v6519_v30 = vadd.f32 %v4691_v24, %v6478_v32  ;;  %7604 = vst [vmem:[#allocation56_spill] sm:$0xff] %v6732_v38  ;;  %v6749_v38 = vadd.s32 184, %v5271_v45 }
 0x336   : > { %v6529_v44 = vadd.f32 %v6476_v3, %v1958_v58  ;;  %v6581_v58 = vpop.permute.xlu1 %2199  ;;  %7602 = vst [vmem:[#allocation54_spill] sm:$0xff] %v6726_v49 }
 0x337   : > { %7574 = vst [vmem:[#allocation26_spill] sm:$0xff] %v6581_v58  ;;  %7610 = vst [vmem:[#allocation62_spill] sm:$0xff] %v6749_v38  ;;  %v6768_v38 = vadd.s32 224, %v5271_v45 }
 0x339   : > { %7616 = vst [vmem:[#allocation68_spill] sm:$0xff] %v6768_v38 }
 0x33a   : > { %v4694_v56 = vpop.f32.mrb[36].mxu1 }
 0x33b   : > { %v6508_v18 = vadd.f32 %v4694_v56, %v6484_v21  ;;  %v1971_v60 = vpop.f32.mrb[37].mxu1  ;;  %v6729_v21 = vadd.s32 136, %v5271_v45 }
 0x33c   : > { %v6516_v57 = vadd.f32 %v6480_v14, %v1971_v60  ;;  %v4695_v55 = vpop.f32.mrb[38].mxu1 }
 0x33d   : > { %v2276_v1 = vmin.f32 %v6505_v15, %v6508_v18  ;;  %v6524_v35 = vadd.f32 %v4695_v55, %v6486_v13  ;;  %v1974_v54 = vpop.f32.mrb[39].mxu1  ;;  %v6723_v13 = vadd.s32 120, %v5271_v45  ;;  %7603 = vst [vmem:[#allocation55_spill] sm:$0xff] %v6729_v21 }
 0x33e   : > { %v2274_v9 = vmin.f32 %v6513_v27, %v6516_v57  ;;  %v6534_v39 = vadd.f32 %v6482_v34, %v1974_v54  ;;  %v6587_v54 = vpop.permute.xlu0 %2204 }
 0x33f   : > { %v2277_v26 = vmin.f32 %v6519_v30, %v6524_v35  ;;  %7575 = vst [vmem:[#allocation27_spill] sm:$0xff] %v6587_v54  ;;  %7601 = vst [vmem:[#allocation53_spill] sm:$0xff] %v6723_v13 }
 0x340   : > { %v2275_v43 = vmin.f32 %v6529_v44, %v6534_v39 }
 0x342   : > { %v4698_v12 = vpop.f32.mrb[40].mxu1 }
 0x343   : > { %v6543_v31 = vadd.f32 %v4698_v12, %v6492_v61  ;;  %v1987_v23 = vpop.f32.mrb[41].mxu1 }
 0x344   : > { %v6548_v59 = vadd.f32 %v6488_v11, %v1987_v23  ;;  %v4699_v19 = vpop.f32.mrb[42].mxu1 }
 0x345   : > { %v2280_v37 = vmin.f32 %v2276_v1, %v6543_v31  ;;  %v6552_v48 = vadd.f32 %v4699_v19, %v6494_v29  ;;  %v1990_v63 = vpop.f32.mrb[43].mxu1  ;;  %v6596_v19 = vpop.permute.xlu1 %2209 }
 0x346   : > { %v2278_v20 = vmin.f32 %v2274_v9, %v6548_v59  ;;  %v6556_v52 = vadd.f32 %v6490_v46, %v1990_v63  ;;  %7576 = vst [vmem:[#allocation28_spill] sm:$0xff] %v6596_v19 }
 0x347   : > { %v2281_v6 = vmin.f32 %v2277_v26, %v6552_v48 }
 0x348   : > { %v2279_v25 = vmin.f32 %v2275_v43, %v6556_v52 }
 0x34a   : > { %v4702_v41 = vpop.f32.mrb[44].mxu1 }
 0x34b   : > { %v6565_v42 = vadd.f32 %v4702_v41, %v6500_v0  ;;  %v2003_v8 = vpop.f32.mrb[45].mxu1 }
 0x34c   : > { %v6568_v40 = vadd.f32 %v6496_v50, %v2003_v8  ;;  %v4703_v7 = vpop.f32.mrb[46].mxu1 }
 0x34d   : > { %v2284_v22 = vmin.f32 %v2280_v37, %v6565_v42  ;;  %v6572_v36 = vadd.f32 %v4703_v7, %v6502_v16  ;;  %v2006_v4 = vpop.f32.mrb[47].mxu1 }
 0x34e   : > { %v2282_v62 = vmin.f32 %v2278_v20, %v6568_v40  ;;  %v6578_v17 = vadd.f32 %v6498_v2, %v2006_v4 }
 0x34f   : > { %v2285_v24 = vmin.f32 %v2281_v6, %v6572_v36 }
 0x350   : > { %v2283_v56 = vmin.f32 %v2279_v25, %v6578_v17 }
 0x352   : > { %v4706_v60 = vpop.f32.mrb[48].mxu1 }
 0x353   : > { %v6585_v55 = vadd.f32 %v4706_v60, %v6540_v53  ;;  %v2019_v1 = vpop.f32.mrb[49].mxu1 }
 0x354   : > { %v6590_v9 = vadd.f32 %v6510_v5, %v2019_v1  ;;  %v4707_v26 = vpop.f32.mrb[50].mxu1 }
 0x355   : > { %v2288_v43 = vmin.f32 %v2284_v22, %v6585_v55  ;;  %v6594_v12 = vadd.f32 %v4707_v26, %v6545_v47  ;;  %v2022_v23 = vpop.f32.mrb[51].mxu1  ;;  %v4600_v20 = vpop.f32.mrb[104].mxu0 }
 0x356   : > { %v2286_v37 = vmin.f32 %v2282_v62, %v6590_v9  ;;  %v6600_v63 = vadd.f32 %v6526_v51, %v2022_v23  ;;  %v4601_v25 = vpop.f32.mrb[105].mxu0  ;;  %v6606_v22 = vpop.permute.xlu0 %2214 }
 0x357   : > { %v2289_v6 = vmin.f32 %v2285_v24, %v6594_v12  ;;  %v6604_v8 = vadd.f32 %v4601_v25, %v4600_v20  ;;  %v4603_v7 = vpop.f32.mrb[106].mxu0  ;;  %7577 = vst [vmem:[#allocation29_spill] sm:$0xff] %v6606_v22  ;;  %v6613_v23 = vpop.permute.xlu1 %2219 }
 0x358   : > { %v2287_v41 = vmin.f32 %v2283_v56, %v6600_v63  ;;  %v4604_v4 = vpop.f32.mrb[107].mxu0  ;;  %7579 = vst [vmem:[#allocation31_spill] sm:$0xff] %v6613_v23 }
 0x359   : > { %v6608_v1 = vadd.f32 %v4604_v4, %v4603_v7 }
 0x35a   : > { %v4710_v60 = vpop.f32.mrb[52].mxu1 }
 0x35b   : > { %7578 = vst [vmem:[#allocation30_spill] sm:$0xff] %v6608_v1  ;;  %v6611_v62 = vadd.f32 %v4710_v60, %v6574_v10  ;;  %v2035_v26 = vpop.f32.mrb[53].mxu1  ;;  %v6628_v10 = vpop.permute.xlu0 %2224  ;;  %v6746_v1 = vadd.s32 176, %v5271_v45 }
 0x35c   : > { %v6616_v24 = vadd.f32 %v6559_v33, %v2035_v26  ;;  %v4711_v51 = vpop.f32.mrb[54].mxu1  ;;  %7580 = vst [vmem:[#allocation32_spill] sm:$0xff] %v6628_v10  ;;  %v6630_v26 = vpop.permute.xlu1 %2229 }
 0x35d   : > { %v2292_v56 = vmin.f32 %v2288_v43, %v6611_v62  ;;  %v6620_v20 = vadd.f32 %v4711_v51, %v6581_v58  ;;  %v2038_v25 = vpop.f32.mrb[55].mxu1  ;;  %7581 = vst [vmem:[#allocation33_spill] sm:$0xff] %v6630_v26  ;;  %7609 = vst [vmem:[#allocation61_spill] sm:$0xff] %v6746_v1  ;;  %v6765_v1 = vadd.s32 216, %v5271_v45 }
 0x35e   : > { %v2290_v47 = vmin.f32 %v2286_v37, %v6616_v24  ;;  %v6624_v7 = vadd.f32 %v6562_v28, %v2038_v25 }
 0x35f   : > { %v2293_v4 = vmin.f32 %v2289_v6, %v6620_v20  ;;  %7615 = vst [vmem:[#allocation67_spill] sm:$0xff] %v6765_v1 }
 0x360   : > { %v2291_v60 = vmin.f32 %v2287_v41, %v6624_v7 }
 0x361   : > { %v4606_v33 = vpop.f32.mrb[108].mxu0 }
 0x362   : > { %v4714_v5 = vpop.f32.mrb[56].mxu1  ;;  %v4607_v43 = vpop.f32.mrb[109].mxu0 }
 0x363   : > { %v6633_v51 = vadd.f32 %v4714_v5, %v6606_v22  ;;  %v2051_v58 = vpop.f32.mrb[57].mxu1  ;;  %v6635_v53 = vadd.f32 %v4607_v43, %v4606_v33  ;;  %v4609_v37 = vpop.f32.mrb[110].mxu0 }
 0x364   : > { %v6638_v25 = vadd.f32 %v6587_v54, %v2051_v58  ;;  %v4715_v6 = vpop.f32.mrb[58].mxu1  ;;  %v4610_v28 = vpop.f32.mrb[111].mxu0 }
 0x365   : > { %7582 = vst [vmem:[#allocation34_spill] sm:$0xff] %v6635_v53  ;;  %v2296_v41 = vmin.f32 %v2292_v56, %v6633_v51  ;;  %v6642_v2 = vadd.f32 %v4715_v6, %v6613_v23  ;;  %v2054_v16 = vpop.f32.mrb[59].mxu1  ;;  %v6644_v50 = vadd.f32 %v4610_v28, %v4609_v37  ;;  %v6652_v43 = vpop.permute.xlu0 %2234 }
 0x366   : > { %v2294_v5 = vmin.f32 %v2290_v47, %v6638_v25  ;;  %v6648_v22 = vadd.f32 %v6596_v19, %v2054_v16  ;;  %7584 = vst [vmem:[#allocation36_spill] sm:$0xff] %v6652_v43  ;;  %v6654_v54 = vpop.permute.xlu1 %2239 }
 0x367   : > { %7583 = vst [vmem:[#allocation35_spill] sm:$0xff] %v6644_v50  ;;  %v2297_v33 = vmin.f32 %v2293_v4, %v6642_v2  ;;  %7585 = vst [vmem:[#allocation37_spill] sm:$0xff] %v6654_v54 }
 0x368   : > { %v2295_v58 = vmin.f32 %v2291_v60, %v6648_v22 }
 0x369   : > { %v4612_v56 = vpop.f32.mrb[112].mxu0 }
 0x36a   : > { %v4718_v0 = vpop.f32.mrb[60].mxu1  ;;  %v4613_v6 = vpop.f32.mrb[113].mxu0 }
 0x36b   : > { %v6657_v23 = vadd.f32 %v4718_v0, %v6652_v43  ;;  %v2067_v28 = vpop.f32.mrb[61].mxu1  ;;  %v6659_v37 = vadd.f32 %v4613_v6, %v4612_v56  ;;  %v4615_v47 = vpop.f32.mrb[114].mxu0 }
 0x36c   : > { %v6662_v16 = vadd.f32 %v6628_v10, %v2067_v28  ;;  %v4719_v4 = vpop.f32.mrb[62].mxu1  ;;  %v4616_v19 = vpop.f32.mrb[115].mxu0 }
 0x36d   : > { %7586 = vst [vmem:[#allocation38_spill] sm:$0xff] %v6659_v37  ;;  %v2300_v60 = vmin.f32 %v2296_v41, %v6657_v23  ;;  %v6666_v46 = vadd.f32 %v4719_v4, %v6654_v54  ;;  %v2070_v29 = vpop.f32.mrb[63].mxu1  ;;  %v6668_v11 = vadd.f32 %v4616_v19, %v4615_v47  ;;  %v6740_v37 = vadd.s32 160, %v5271_v45 }
 0x36e   : > { %v2298_v0 = vmin.f32 %v2294_v5, %v6662_v16  ;;  %v6672_v43 = vadd.f32 %v6630_v26, %v2070_v29  ;;  %v6681_v5 = vadd.s32 8, %v5271_v45  ;;  %v6720_v26 = vadd.s32 112, %v5271_v45 }
 0x36f   : > { %7587 = vst [vmem:[#allocation39_spill] sm:$0xff] %v6668_v11  ;;  %v2301_v56 = vmin.f32 %v2297_v33, %v6666_v46  ;;  %v6684_v33 = vadd.s32 16, %v5271_v45  ;;  %v6737_v11 = vadd.s32 152, %v5271_v45  ;;  %7607 = vst [vmem:[#allocation59_spill] sm:$0xff] %v6740_v37  ;;  %v6757_v37 = vadd.s32 200, %v5271_v45 }
 0x370   : > { %v2299_v6 = vmin.f32 %v2295_v58, %v6672_v43  ;;  %v6687_v58 = vadd.s32 24, %v5271_v45  ;;  %7600 = vst [vmem:[#allocation52_spill] sm:$0xff] %v6720_v26 }
 0x371   : > { %v2303_v28 = vmin.f32 %v2300_v60, %v2301_v56  ;;  %v4618_v61 = vpop.f32.mrb[116].mxu0  ;;  %v6690_v60 = vadd.s32 32, %v5271_v45  ;;  %v6705_v56 = vadd.s32 72, %v5271_v45  ;;  %7606 = vst [vmem:[#allocation58_spill] sm:$0xff] %v6737_v11  ;;  %7613 = vst [vmem:[#allocation65_spill] sm:$0xff] %v6757_v37 }
 0x372   : > { %v2302_v10 = vmin.f32 %v2298_v0, %v2299_v6  ;;  %v4619_v34 = vpop.f32.mrb[117].mxu0  ;;  %7590 = vst [vmem:[#allocation42_spill] sm:$0xff] %v6687_v58  ;;  %v6708_v6 = vadd.s32 80, %v5271_v45 }
 0x373   : > { %v6676_v3 = vadd.f32 %v4619_v34, %v4618_v61  ;;  %v4621_v4 = vpop.f32.mrb[118].mxu0  ;;  %v6693_v34 = vadd.s32 40, %v5271_v45  ;;  %v6696_v61 = vadd.s32 48, %v5271_v45  ;;  %7595 = vst [vmem:[#allocation47_spill] sm:$0xff] %v6705_v56 }
 0x374   : > { %v2304_v41 = vmin.f32 %v2302_v10, %v2303_v28  ;;  %v4622_v54 = vpop.f32.mrb[119].mxu0  ;;  %v6699_v10 = vadd.s32 56, %v5271_v45  ;;  %7596 = vst [vmem:[#allocation48_spill] sm:$0xff] %v6708_v6  ;;  %v6711_v28 = vadd.s32 88, %v5271_v45 }
 0x375   : > { %7588 = vst [vmem:[#allocation40_spill] sm:$0xff] %v6676_v3  ;;  %v6678_v47 = vadd.f32 %v4622_v54, %v4621_v4  ;;  %7591 = vst [vmem:[#allocation43_spill] sm:$0xff] %v6693_v34  ;;  %v6702_v54 = vadd.s32 64, %v5271_v45  ;;  %v6714_v4 = vadd.s32 96, %v5271_v45 }
 0x376   : > { %v2305_v19 = vrot.slane %v2304_v41, 4  ;;  %7592 = vst [vmem:[#allocation44_spill] sm:$0xff] %v6696_v61  ;;  %7593 = vst [vmem:[#allocation45_spill] sm:$0xff] %v6699_v10 }
 0x377   : > { %7589 = vst [vmem:[#allocation41_spill] sm:$0xff] %v6678_v47  ;;  %7594 = vst [vmem:[#allocation46_spill] sm:$0xff] %v6702_v54 }
 0x378   : > { %v2306_v29 = vmin.f32 %v2304_v41, %v2305_v19  ;;  %7597 = vst [vmem:[#allocation49_spill] sm:$0xff] %v6711_v28  ;;  %7598 = vst [vmem:[#allocation50_spill] sm:$0xff] %v6714_v4  ;;  %v6717_v19 = vadd.s32 104, %v5271_v45 }
 0x379   : > { %v4624_v41 = vpop.f32.mrb[120].mxu0 }
 0x37a   : > { %v2307_v0 = vrot.slane %v2306_v29, 2  ;;  %7599 = vst [vmem:[#allocation51_spill] sm:$0xff] %v6717_v19  ;;  %v4625_v32 = vpop.f32.mrb[121].mxu0 }
 0x37b   : > { %v6734_v47 = vadd.f32 %v4625_v32, %v4624_v41  ;;  %v4627_v3 = vpop.f32.mrb[122].mxu0  ;;  %v6752_v32 = vadd.s32 192, %v5271_v45 }
 0x37c   : > { %v2308_v14 = vmin.f32 %v2306_v29, %v2307_v0  ;;  %v6743_v29 = vadd.s32 168, %v5271_v45  ;;  %v4536_v0 = vpop.f32.mrb[64].mxu1  ;;  %v4628_v50 = vpop.f32.mrb[123].mxu0 }
 0x37d   : > { %7605 = vst [vmem:[#allocation57_spill] sm:$0xff] %v6734_v47  ;;  %7611 = vst [vmem:[#allocation63_spill] sm:$0xff] %v6752_v32  ;;  %v4537_v41 = vpop.f32.mrb[65].mxu1  ;;  %v6754_v47 = vadd.f32 %v4628_v50, %v4627_v3  ;;  %v6771_v32 = vadd.s32 232, %v5271_v45  ;;  %v6774_v50 = vadd.s32 240, %v5271_v45 }
 0x37e   : > { %7608 = vst [vmem:[#allocation60_spill] sm:$0xff] %v6743_v29  ;;  %v2309_v53 = vrot.slane %v2308_v14, 1  ;;  %v6760_v29 = vadd.s32 208, %v5271_v45  ;;  %v4538_v11 = vadd.f32 %v4537_v41, %v4536_v0  ;;  %v4539_v21 = vpop.f32.mrb[66].mxu1 }
 0x37f   : > { %7612 = vst [vmem:[#allocation64_spill] sm:$0xff] %v6754_v47  ;;  %7617 = vst [vmem:[#allocation69_spill] sm:$0xff] %v6771_v32  ;;  %v4540_v3 = vpop.f32.mrb[67].mxu1  ;;  %v6777_v47 = vadd.s32 248, %v5271_v45 }
 0x380   : > { %7614 = vst [vmem:[#allocation66_spill] sm:$0xff] %v6760_v29  ;;  %v6762_v49 = vmin.f32 %v2308_v14, %v2309_v53  ;;  %7618 = vst [vmem:[#allocation70_spill] sm:$0xff] %v6774_v50  ;;  %v6780_v0 = vadd.f32 %v6604_v8, %v4538_v11  ;;  %v6782_v14 = vadd.f32 %v4540_v3, %v4539_v21 }
 0x381   : > { %7619 = vst [vmem:[#allocation71_spill] sm:$0xff] %v6777_v47  ;;  %v6800_v21 = vpop.f32.mrb[124].mxu0 }
 0x382   : > { %7620 = vst [vmem:[#allocation72_spill] sm:$0xff] %v6780_v0  ;;  %7621 = vst [vmem:[#allocation73_spill] sm:$0xff] %v6782_v14  ;;  %vm2344_vm2 = vcmp.le.f32.partialorder %v6513_v27, %v6762_v49  ;;  %vm2345_vm3 = vcmp.le.f32.partialorder %v6529_v44, %v6762_v49  ;;  %vm2346_vm4 = vcmp.le.f32.partialorder %v6505_v15, %v6762_v49  ;;  %v6810_v11 = vpop.f32.mrb[125].mxu0 }
 0x383   : > { %vm2347_vm5 = vcmp.le.f32.partialorder %v6519_v30, %v6762_v49  ;;  %vm2348_vm6 = vcmp.le.f32.partialorder %v6516_v57, %v6762_v49  ;;  %vm2349_vm7 = vcmp.le.f32.partialorder %v6534_v39, %v6762_v49  ;;  %vm2350_vm8 = vcmp.le.f32.partialorder %v6508_v18, %v6762_v49  ;;  %v6820_v53 = vpop.f32.mrb[126].mxu0  ;;  %v6822_v8 = vpop.f32.mrb[68].mxu1 }
 0x384   : > { %vm2351_vm9 = vcmp.le.f32.partialorder %v6524_v35, %v6762_v49  ;;  %vm2352_vm10 = vcmp.le.f32.partialorder %v6548_v59, %v6762_v49  ;;  %vm2353_vm11 = vcmp.le.f32.partialorder %v6556_v52, %v6762_v49  ;;  %7622 = vst [vmem:[#allocation74_spill] sm:$0xff] %v6822_v8  ;;  %v6832_v41 = vpop.f32.mrb[127].mxu0  ;;  %v6834_v3 = vpop.f32.mrb[69].mxu1  ;;  %vm2370_vm1 = vcmp.le.f32.partialorder %v6633_v51, %v6762_v49 }
 0x385   : > { %7623 = vst [vmem:[#allocation75_spill] sm:$0xff] %v6834_v3  ;;  %v6844_v8 = vpop.f32.mrb[70].mxu1  ;;  %vm2371_vm0 = vcmp.le.f32.partialorder %v6642_v2, %v6762_v49  ;;  %vm2372_vm13 = vcmp.le.f32.partialorder %v6662_v16, %v6762_v49  ;;  %vm2373_vm12 = vcmp.le.f32.partialorder %v6672_v43, %v6762_v49  ;;  %vm2374_vm15 = vcmp.le.f32.partialorder %v6657_v23, %v6762_v49 }
 0x386   : > { %7624 = vst [vmem:[#allocation76_spill] sm:$0xff] %v6844_v8  ;;  %v6854_v3 = vpop.f32.mrb[71].mxu1  ;;  %vm2375_vm14 = vcmp.le.f32.partialorder %v6666_v46, %v6762_v49  ;;  %v2376_v8 = vsel %vm2344_vm2, %v5271_v45, 256  ;;  %v2378_v14 = vsel %vm2346_vm4, %v6684_v33, 256  ;;  %v2379_v0 = vsel %vm2347_vm5, %v6687_v58, 256 }
 0x387   : > { %7625 = vst [vmem:[#allocation77_spill] sm:$0xff] %v6854_v3  ;;  %v2377_v3 = vsel %vm2345_vm3, %v6681_v5, 256  ;;  %v2380_v27 = vsel %vm2348_vm6, %v6690_v60, 256  ;;  %v2381_v44 = vsel %vm2349_vm7, %v6693_v34, 256  ;;  %v2382_v15 = vsel %vm2350_vm8, %v6696_v61, 256  ;;  %v7648_v34 = vld [vmem:[#allocation63_spill] sm:$0xff] }
 0x388   : > { %v2383_v30 = vsel %vm2351_vm9, %v6699_v10, 256  ;;  %v2384_v57 = vsel %vm2352_vm10, %v6702_v54, 256  ;;  %v2385_v39 = vsel %vm2353_vm11, %v6705_v56, 256  ;;  %vm7626_vm2 = vcmp.le.f32.partialorder %v6543_v31, %v6762_v49 }
 0x389   : > { %v6896_v58 = vpop.f32.mrb[128].mxu0  ;;  %v2386_v18 = vsel %vm7626_vm2, %v6708_v6, 256  ;;  %vm7627_vm3 = vcmp.le.f32.partialorder %v6552_v48, %v6762_v49  ;;  %vm7628_vm4 = vcmp.le.f32.partialorder %v6568_v40, %v6762_v49  ;;  %vm7629_vm5 = vcmp.le.f32.partialorder %v6578_v17, %v6762_v49  ;;  %v7632_v40 = vld [vmem:[#allocation54_spill] sm:$0xff] }
 0x38a   : > { %v2387_v35 = vsel %vm7627_vm3, %v6711_v28, 256  ;;  %v6914_v10 = vpop.f32.mrb[129].mxu0  ;;  %v2388_v59 = vsel %vm7628_vm4, %v6714_v4, 256  ;;  %v2389_v52 = vsel %vm7629_vm5, %v6717_v19, 256  ;;  %vm7630_vm6 = vcmp.le.f32.partialorder %v6565_v42, %v6762_v49  ;;  %v7634_v19 = vld [vmem:[#allocation55_spill] sm:$0xff] }
 0x38b   : > { %v2390_v31 = vsel %vm7630_vm6, %v6720_v26, 256  ;;  %vm7631_vm7 = vcmp.le.f32.partialorder %v6572_v36, %v6762_v49  ;;  %v6932_v28 = vpop.f32.mrb[130].mxu0  ;;  %v6934_v6 = vpop.f32.mrb[72].mxu1  ;;  %vm7633_vm8 = vcmp.le.f32.partialorder %v6590_v9, %v6762_v49  ;;  %vm7635_vm9 = vcmp.le.f32.partialorder %v6600_v63, %v6762_v49  ;;  %v7636_v26 = vld [vmem:[#allocation56_spill] sm:$0xff]  ;;  %v7640_v9 = vld [vmem:[#allocation59_spill] sm:$0xff] }
 0x38c   : > { %v2391_v48 = vsel %vm7631_vm7, %v6723_v13, 256  ;;  %v2392_v17 = vsel %vm7633_vm8, %v7632_v40, 256  ;;  %v2393_v42 = vsel %vm7635_vm9, %v7634_v19, 256  ;;  %vm7637_vm10 = vcmp.le.f32.partialorder %v6585_v55, %v6762_v49  ;;  %v7638_v13 = vld [vmem:[#allocation58_spill] sm:$0xff]  ;;  %v6952_v56 = vpop.f32.mrb[131].mxu0  ;;  %v6954_v54 = vpop.f32.mrb[73].mxu1 }
 0x38d   : > { %v2394_v36 = vsel %vm7637_vm10, %v7636_v26, 256  ;;  %vm7639_vm11 = vcmp.le.f32.partialorder %v6594_v12, %v6762_v49  ;;  %vm7641_vm2 = vcmp.le.f32.partialorder %v6616_v24, %v6762_v49  ;;  %v7642_v19 = vld [vmem:[#allocation60_spill] sm:$0xff]  ;;  %vm7643_vm3 = vcmp.le.f32.partialorder %v6624_v7, %v6762_v49  ;;  %v7644_v26 = vld [vmem:[#allocation61_spill] sm:$0xff]  ;;  %v6972_v61 = vpop.f32.mrb[74].mxu1 }
 0x38e   : > { %v2395_v4 = vsel %vm7639_vm11, %v7638_v13, 256  ;;  %v2396_v63 = vsel %vm7641_vm2, %v7640_v9, 256  ;;  %v2397_v55 = vsel %vm7643_vm3, %v7642_v19, 256  ;;  %vm7645_vm4 = vcmp.le.f32.partialorder %v6611_v62, %v6762_v49  ;;  %v7646_v13 = vld [vmem:[#allocation62_spill] sm:$0xff] }
 0x38f   : > { %v2398_v12 = vsel %vm7645_vm4, %v7644_v26, 256  ;;  %vm7647_vm5 = vcmp.le.f32.partialorder %v6620_v20, %v6762_v49  ;;  %vm7649_vm6 = vcmp.le.f32.partialorder %v6638_v25, %v6762_v49  ;;  %vm7650_vm7 = vcmp.le.f32.partialorder %v6648_v22, %v6762_v49 }
 0x390   : > { %v2399_v40 = vsel %vm7647_vm5, %v7646_v13, 256  ;;  %v2400_v24 = vsel %vm7649_vm6, %v7648_v34, 256  ;;  %v2401_v7 = vsel %vm7650_vm7, %v6757_v37, 256  ;;  %v2402_v62 = vsel %vm2370_vm1, %v6760_v29, 256  ;;  %v6990_v13 = vpop.f32.mrb[75].mxu1 }
 0x391   : > { %v2403_v20 = vsel %vm2371_vm0, %v6765_v1, 256  ;;  %v6996_v25 = vsel %vm2372_vm13, %v6768_v38, 256  ;;  %v7002_v22 = vsel %vm2373_vm12, %v6771_v32, 256  ;;  %v7008_v2 = vsel %vm2374_vm15, %v6774_v50, 256  ;;  %v7016_v1 = vpop.f32.mrb[132].mxu0 }
 0x392   : > { %v7014_v51 = vsel %vm2375_vm14, %v6777_v47, 256  ;;  %vm2408_vm13 = vcmp.lt.s32.totalorder %v2376_v8, %v2380_v27  ;;  %vm2410_vm0 = vcmp.lt.s32.totalorder %v2377_v3, %v2381_v44  ;;  %vm2412_vm1 = vcmp.lt.s32.totalorder %v2378_v14, %v2382_v15  ;;  %v7018_v23 = vpop.f32.mrb[133].mxu0 }
 0x393   : > { %vm2414_vm8 = vcmp.lt.s32.totalorder %v2379_v0, %v2383_v30  ;;  %v2409_v16 = vsel %vm2408_vm13, %v2376_v8, %v2380_v27  ;;  %v2411_v43 = vsel %vm2410_vm0, %v2377_v3, %v2381_v44  ;;  %v2413_v32 = vsel %vm2412_vm1, %v2378_v14, %v2382_v15  ;;  %v7020_v29 = vpop.f32.mrb[134].mxu0  ;;  %v7022_v37 = vpop.f32.mrb[76].mxu1 }
 0x394   : > { %v2415_v38 = vsel %vm2414_vm8, %v2379_v0, %v2383_v30  ;;  %vm2416_vm12 = vcmp.lt.s32.totalorder %v2409_v16, %v2384_v57  ;;  %vm2418_vm9 = vcmp.lt.s32.totalorder %v2411_v43, %v2385_v39  ;;  %vm2420_vm15 = vcmp.lt.s32.totalorder %v2413_v32, %v2386_v18  ;;  %v7024_v0 = vpop.f32.mrb[135].mxu0  ;;  %v7026_v14 = vpop.f32.mrb[77].mxu1 }
 0x395   : > { %vm2422_vm10 = vcmp.lt.s32.totalorder %v2415_v38, %v2387_v35  ;;  %v2417_v50 = vsel %vm2416_vm12, %v2409_v16, %v2384_v57  ;;  %v2419_v49 = vsel %vm2418_vm9, %v2411_v43, %v2385_v39  ;;  %v2421_v46 = vsel %vm2420_vm15, %v2413_v32, %v2386_v18  ;;  %v7028_v15 = vpop.f32.mrb[78].mxu1  ;;  %v7653_v16 = vld [vmem:[#allocation30_spill] sm:$0xff] }
 0x396   : > { %v2423_v47 = vsel %vm2422_vm10, %v2415_v38, %v2387_v35  ;;  %vm2424_vm14 = vcmp.lt.s32.totalorder %v2417_v50, %v2388_v59  ;;  %vm2426_vm11 = vcmp.lt.s32.totalorder %v2419_v49, %v2389_v52  ;;  %vm2428_vm2 = vcmp.lt.s32.totalorder %v2421_v46, %v2390_v31  ;;  %v4558_v38 = vpop.f32.mrb[79].mxu1 }
 0x397   : > { %vm2430_vm3 = vcmp.lt.s32.totalorder %v2423_v47, %v2391_v48  ;;  %v2425_v8 = vsel %vm2424_vm14, %v2417_v50, %v2388_v59  ;;  %v2427_v3 = vsel %vm2426_vm11, %v2419_v49, %v2389_v52  ;;  %v2429_v27 = vsel %vm2428_vm2, %v2421_v46, %v2390_v31 }
 0x398   : > { %v2431_v44 = vsel %vm2430_vm3, %v2423_v47, %v2391_v48  ;;  %vm2432_vm4 = vcmp.lt.s32.totalorder %v2425_v8, %v2392_v17  ;;  %vm2434_vm5 = vcmp.lt.s32.totalorder %v2427_v3, %v2393_v42  ;;  %vm2436_vm6 = vcmp.lt.s32.totalorder %v2429_v27, %v2394_v36 }
 0x399   : > { %vm2438_vm7 = vcmp.lt.s32.totalorder %v2431_v44, %v2395_v4  ;;  %v2433_v32 = vsel %vm2432_vm4, %v2425_v8, %v2392_v17  ;;  %v2435_v30 = vsel %vm2434_vm5, %v2427_v3, %v2393_v42  ;;  %v2437_v57 = vsel %vm2436_vm6, %v2429_v27, %v2394_v36  ;;  %v7656_v3 = vld [vmem:[#allocation76_spill] sm:$0xff]  ;;  %v7657_v27 = vld [vmem:[#allocation77_spill] sm:$0xff] }
 0x39a   : > { %v2439_v39 = vsel %vm2438_vm7, %v2431_v44, %v2395_v4  ;;  %vm2440_vm13 = vcmp.lt.s32.totalorder %v2433_v32, %v2396_v63  ;;  %vm2442_vm0 = vcmp.lt.s32.totalorder %v2435_v30, %v2397_v55  ;;  %vm2444_vm1 = vcmp.lt.s32.totalorder %v2437_v57, %v2398_v12 }
 0x39b   : > { %vm2446_vm8 = vcmp.lt.s32.totalorder %v2439_v39, %v2399_v40  ;;  %v2441_v18 = vsel %vm2440_vm13, %v2433_v32, %v2396_v63  ;;  %v2443_v50 = vsel %vm2442_vm0, %v2435_v30, %v2397_v55  ;;  %v2445_v35 = vsel %vm2444_vm1, %v2437_v57, %v2398_v12  ;;  %v4560_v17 = vpop.f32.mrb[80].mxu1  ;;  %v7659_v57 = vld [vmem:[#allocation35_spill] sm:$0xff] }
 0x39c   : > { %v2447_v59 = vsel %vm2446_vm8, %v2439_v39, %v2399_v40  ;;  %vm2448_vm12 = vcmp.lt.s32.totalorder %v2441_v18, %v2400_v24  ;;  %vm2450_vm9 = vcmp.lt.s32.totalorder %v2443_v50, %v2401_v7  ;;  %vm2452_vm15 = vcmp.lt.s32.totalorder %v2445_v35, %v2402_v62  ;;  %v4561_v4 = vpop.f32.mrb[81].mxu1 }
 0x39d   : > { %vm2454_vm10 = vcmp.lt.s32.totalorder %v2447_v59, %v2403_v20  ;;  %v2449_v47 = vsel %vm2448_vm12, %v2441_v18, %v2400_v24  ;;  %v2451_v52 = vsel %vm2450_vm9, %v2443_v50, %v2401_v7  ;;  %v2453_v31 = vsel %vm2452_vm15, %v2445_v35, %v2402_v62  ;;  %v4563_v55 = vpop.f32.mrb[82].mxu1 }
 0x39e   : > { %v2455_v48 = vsel %vm2454_vm10, %v2447_v59, %v2403_v20  ;;  %vm2456_vm14 = vcmp.lt.s32.totalorder %v2449_v47, %v6996_v25  ;;  %vm2458_vm11 = vcmp.lt.s32.totalorder %v2451_v52, %v7002_v22  ;;  %vm2460_vm2 = vcmp.lt.s32.totalorder %v2453_v31, %v7008_v2  ;;  %v4564_v7 = vpop.f32.mrb[83].mxu1  ;;  %v7660_v59 = vld [vmem:[#allocation38_spill] sm:$0xff] }
 0x39f   : > { %vm2462_vm3 = vcmp.lt.s32.totalorder %v2455_v48, %v7014_v51  ;;  %v2457_v40 = vsel %vm2456_vm14, %v2449_v47, %v6996_v25  ;;  %v2459_v42 = vsel %vm2458_vm11, %v2451_v52, %v7002_v22  ;;  %v2461_v36 = vsel %vm2460_vm2, %v2453_v31, %v7008_v2  ;;  %v7045_v25 = vld [vmem:[%s7487_s4] ss:$0 sm:$0xff]  ;;  %v7651_v22 = vld [vmem:[#allocation72_spill] sm:$0xff] }
 0x3a0   : > { %v2463_v63 = vsel %vm2462_vm3, %v2455_v48, %v7014_v51  ;;  %vm2464_vm4 = vcmp.lt.s32.totalorder %v2457_v40, %v2459_v42  ;;  %v4632_v12 = vadd.f32 %v6810_v11, %v6800_v21  ;;  %v4635_v24 = vadd.f32 %v6832_v41, %v6820_v53  ;;  %v7652_v51 = vld [vmem:[#allocation73_spill] sm:$0xff]  ;;  %v7654_v53 = vld [vmem:[#allocation74_spill] sm:$0xff]  ;;  %v7655_v41 = vld [vmem:[#allocation75_spill] sm:$0xff] }
 0x3a1   : > { %vm2466_vm5 = vcmp.lt.s32.totalorder %v2461_v36, %v2463_v63  ;;  %v2465_v62 = vsel %vm2464_vm4, %v2457_v40, %v2459_v42  ;;  %v3644_v2 = vadd.f32 %v7045_v25, %v7651_v22  ;;  %v3585_v43 = vadd.f32 %v7653_v16, %v7652_v51  ;;  %v7662_v48 = vld [vmem:[#allocation40_spill] sm:$0xff] }
 0x3a2   : > { %v2467_v20 = vsel %vm2466_vm5, %v2461_v36, %v2463_v63  ;;  %v7053_v21 = vadd.f32 %v6914_v10, %v6896_v58  ;;  %v7057_v11 = vadd.f32 %v6952_v56, %v6932_v28  ;;  %v4544_v49 = vadd.f32 %v7655_v41, %v7654_v53  ;;  %v7658_v58 = vld [vmem:[#allocation34_spill] sm:$0xff]  ;;  %v7665_v41 = vld [vmem:[#allocation64_spill] sm:$0xff] }
 0x3a3   : > { %vm2468_vm6 = vcmp.lt.s32.totalorder %v2465_v62, %v2467_v20  ;;  %v3645_v8 = vadd.f32 %v7045_v25, %v3585_v43  ;;  %v4547_v44 = vadd.f32 %v7657_v27, %v7656_v3  ;;  %v7066_v32 = vadd.f32 %v7018_v23, %v7016_v1  ;;  %v4566_v23 = vpop.f32.mrb[84].mxu1 }
 0x3a4   : > { %v2469_v46 = vsel %vm2468_vm6, %v2465_v62, %v2467_v20  ;;  %v3590_v10 = vadd.f32 %v7658_v58, %v4544_v49  ;;  %v7071_v56 = vadd.f32 %v7024_v0, %v7020_v29  ;;  %v4550_v28 = vadd.f32 %v6954_v54, %v6934_v6  ;;  %v4567_v0 = vpop.f32.mrb[85].mxu1  ;;  %v7661_v6 = vld [vmem:[#allocation39_spill] sm:$0xff] }
 0x3a5   : > { %v2470_v30 = vrot.slane %v2469_v46, 4  ;;  %v3593_v39 = vadd.f32 %v7659_v57, %v4547_v44  ;;  %v3660_v18 = vpack.c.bf16 %v3645_v8, %v3644_v2  ;;  %v4553_v50 = vadd.f32 %v6990_v13, %v6972_v61  ;;  %v4569_v61 = vpop.f32.mrb[86].mxu1  ;;  %v7664_v2 = vld [vmem:[#allocation57_spill] sm:$0xff] }
 0x3a6   : > { %v4556_v1 = vadd.f32 %v7026_v14, %v7022_v37  ;;  %v3646_v35 = vadd.f32 %v7045_v25, %v3590_v10  ;;  %v3598_v47 = vadd.f32 %v7660_v59, %v4550_v28  ;;  %v4559_v29 = vadd.f32 %v4558_v38, %v7028_v15  ;;  %v7663_v14 = vld [vmem:[#allocation41_spill] sm:$0xff]  ;;  %v4570_v63 = vpop.f32.mrb[87].mxu1 }
 0x3a7   : > { %vm2471_vm7 = vcmp.lt.s32.totalorder %v2469_v46, %v2470_v30  ;;  %v3647_v54 = vadd.f32 %v7045_v25, %v3593_v39  ;;  %4720 = vmatprep.subr.bf16.mxu1 %v3660_v18  ;;  %v3601_v31 = vadd.f32 %v7661_v6, %v4553_v50  ;;  %v4562_v36 = vadd.f32 %v4561_v4, %v4560_v17 }
 0x3a8   : > { %v2472_v52 = vsel %vm2471_vm7, %v2469_v46, %v2470_v30  ;;  %v3606_v13 = vadd.f32 %v7662_v48, %v4556_v1  ;;  %4721 = vmatpush3.bf16.xpose.msra.mxu1 %v3660_v18  ;;  %v3648_v37 = vadd.f32 %v7045_v25, %v3598_v47  ;;  %v3609_v42 = vadd.f32 %v7663_v14, %v4559_v29  ;;  %v5030_v14 = vld [vmem:[%s7488_s5 + $0x38] sm:$0xff]  }
 0x3a9   : > { %v2473_v40 = vrot.slane %v2472_v52, 2  ;;  %v3649_v15 = vadd.f32 %v7045_v25, %v3601_v31  ;;  %v3661_v38 = vpack.c.bf16 %v3647_v54, %v3646_v35  ;;  %v4565_v20 = vadd.f32 %v4564_v7, %v4563_v55 }
 0x3aa   : > { %v3650_v62 = vadd.f32 %v7045_v25, %v3606_v13  ;;  %v3651_v22 = vadd.f32 %v7045_v25, %v3609_v42  ;;  %v3614_v51 = vadd.f32 %v7664_v2, %v4562_v36  ;;  %v4568_v16 = vadd.f32 %v4567_v0, %v4566_v23  ;;  %v5031_v42 = vld [vmem:[%s7488_s5 + $0x40] sm:$0xff]   ;;  %v5032_v36 = vld [vmem:[%s7488_s5 + $0x48] sm:$0xff]  }
 0x3ab   : > { %vm2474_vm13 = vcmp.lt.s32.totalorder %v2472_v52, %v2473_v40  ;;  %4722 = vmatprep.subr.bf16.mxu1 %v3661_v38  ;;  %v3662_v53 = vpack.c.bf16 %v3649_v15, %v3648_v37  ;;  %v3617_v49 = vadd.f32 %v7665_v41, %v4565_v20  ;;  %v4571_v17 = vadd.f32 %v4570_v63, %v4569_v61  ;;  %v4572_v27 = vpop.f32.mrb[88].mxu1  ;;  %v5027_v61 = vld [vmem:[%s7488_s5 + $0x20] sm:$0xff]   ;;  %v5029_v37 = vld [vmem:[%s7488_s5 + $0x30] sm:$0xff]   ;;  %v5034_v15 = vld [vmem:[%s7488_s5 + $0x58] sm:$0xff]  }
 0x3ac   : > { %v2475_v43 = vsel %vm2474_vm13, %v2472_v52, %v2473_v40  ;;  %v3663_v46 = vpack.c.bf16 %v3651_v22, %v3650_v62  ;;  %v3622_v8 = vadd.f32 %v4632_v12, %v4568_v16  ;;  %v3652_v55 = vadd.f32 %v7045_v25, %v3614_v51  ;;  %v4573_v30 = vpop.f32.mrb[89].mxu1  ;;  %v5028_v40 = vld [vmem:[%s7488_s5 + $0x28] sm:$0xff]   ;;  %v5033_v63 = vld [vmem:[%s7488_s5 + $0x50] sm:$0xff]   ;;  %v5038_v22 = vld [vmem:[%s7488_s5 + $0x78] sm:$0xff]  }
 0x3ad   : > { %v2476_v4 = vrot.slane %v2475_v43, 1  ;;  %v3653_v7 = vadd.f32 %v7045_v25, %v3617_v49  ;;  %v3625_v3 = vadd.f32 %v4635_v24, %v4571_v17  ;;  %v4574_v28 = vadd.f32 %v4573_v30, %v4572_v27  ;;  %v4575_v57 = vpop.f32.mrb[90].mxu1  ;;  %v5036_v62 = vld [vmem:[%s7488_s5 + $0x68] sm:$0xff]   ;;  %v5037_v20 = vld [vmem:[%s7488_s5 + $0x70] sm:$0xff]   ;;  %v7667_v17 = vld [vmem:[#allocation9_spill] sm:$0xff] }
 0x3ae   : > { %v3654_v44 = vadd.f32 %v7045_v25, %v3622_v8  ;;  %v4576_v39 = vpop.f32.mrb[91].mxu1  ;;  %v7666_v41 = vld [vmem:[#allocation4_spill] sm:$0xff]  ;;  %v7668_v8 = vld [vmem:[#allocation3_spill] sm:$0xff] }
 0x3af   : > { %vm2477_vm0 = vcmp.lt.s32.totalorder %v2475_v43, %v2476_v4  ;;  %v3655_v10 = vadd.f32 %v7045_v25, %v3625_v3  ;;  %v3664_v12 = vpack.c.bf16 %v3653_v7, %v3652_v55  ;;  %v3630_v18 = vadd.f32 %v7053_v21, %v4574_v28  ;;  %v7669_v7 = vld [vmem:[#allocation7_spill] sm:$0xff] }
 0x3b0   : > { %v2478_v58 = vsel %vm2477_vm0, %v2475_v43, %v2476_v4  ;;  %4723 = vmatpush3.bf16.xpose.msra.mxu1 %v3661_v38  ;;  %v4577_v50 = vadd.f32 %v4576_v39, %v4575_v57  ;;  %v5035_v38 = vld [vmem:[%s7488_s5 + $0x60] sm:$0xff]   ;;  %v7672_v57 = vld [vmem:[#allocation5_spill] sm:$0xff] }
 0x3b1   : > { %2479 = vst [vmem:[%s7097_s21] sm:$0x1] %v2478_v58  ;;  %4724 = vmatprep.subr.bf16.mxu1 %v3662_v53  ;;  %v3665_v1 = vpack.c.bf16 %v3655_v10, %v3654_v44  ;;  %v3656_v23 = vadd.f32 %v7045_v25, %v3630_v18  ;;  %v7670_v44 = vld [vmem:[#allocation6_spill] sm:$0xff] }
 0x3b2   : > { %v3633_v24 = vadd.f32 %v7057_v11, %v4577_v50  ;;  %v7671_v10 = vld [vmem:[#allocation10_spill] sm:$0xff]  ;;  %v7673_v50 = vld [vmem:[#allocation8_spill] sm:$0xff] }
 0x3b3   : > { %v4578_v59 = vpop.f32.mrb[92].mxu1 }
 0x3b4   : > { %v3657_v35 = vadd.f32 %v7045_v25, %v3633_v24  ;;  %v4579_v47 = vpop.f32.mrb[93].mxu1 }
 0x3b5   : > { %v4580_v29 = vadd.f32 %v4579_v47, %v4578_v59  ;;  %v4581_v0 = vpop.f32.mrb[94].mxu1  ;;  %v7674_v59 = vld [vmem:[#allocation13_spill] sm:$0xff] }
 0x3b6   : > { %v3666_v52 = vpack.c.bf16 %v3657_v35, %v3656_v23  ;;  %v4582_v54 = vpop.f32.mrb[95].mxu1 }
 0x3b7   : > { %v3638_v6 = vadd.f32 %v7066_v32, %v4580_v29  ;;  %v4583_v31 = vadd.f32 %v4582_v54, %v4581_v0  ;;  %v5024_v32 = vld [vmem:[%s7488_s5 + $0x8] sm:$0xff]  }
 0x3b8   : > { %4725 = vmatpush3.bf16.xpose.msra.mxu1 %v3662_v53  ;;  %v7675_v0 = vld [vmem:[#allocation11_spill] sm:$0xff] }
 0x3b9   : > { %4726 = vmatprep.subr.bf16.mxu1 %v3663_v46  ;;  %v3641_v21 = vadd.f32 %v7071_v56, %v4583_v31  ;;  %v3658_v48 = vadd.f32 %v7045_v25, %v3638_v6  ;;  %v5025_v56 = vld [vmem:[%s7488_s5 + $0x10] sm:$0xff]   ;;  %v7676_v31 = vld [vmem:[#allocation14_spill] sm:$0xff] }
 0x3bb   : > { %v3659_v11 = vadd.f32 %v7045_v25, %v3641_v21  ;;  %v5026_v25 = vld [vmem:[%s7488_s5 + $0x18] sm:$0xff]  }
 0x3bd   : > { %v3667_v13 = vpack.c.bf16 %v3659_v11, %v3658_v48 }
 0x3c0   : > { %4727 = vmatpush3.bf16.xpose.msra.mxu1 %v3663_v46 }
 0x3c1   : > { %4728 = vmatprep.subr.bf16.mxu1 %v3664_v12 }
 0x3c8   : > { %4729 = vmatpush3.bf16.xpose.msra.mxu1 %v3664_v12 }
 0x3c9   : > { %4730 = vmatprep.subr.bf16.mxu1 %v3665_v1 }
 0x3d0   : > { %4731 = vmatpush3.bf16.xpose.msra.mxu1 %v3665_v1 }
 0x3d1   : > { %4732 = vmatprep.subr.bf16.mxu1 %v3666_v52 }
 0x3d8   : > { %4733 = vmatpush3.bf16.xpose.msra.mxu1 %v3666_v52 }
 0x3d9   : > { %4734 = vmatprep.subr.bf16.mxu1 %v3667_v13 }
 0x3e0   : > { %4735 = vmatpush3.bf16.xpose.msra.mxu1 %v3667_v13  ;;  %v7677_v13 = vld [vmem:[#allocation12_spill] sm:$0xff] }
 0x3e7   : > { %4737 = vmatmul.mubr.bf16.vlgmr.msra.gmra.mrb[96].mxu1 %v5024_v32 }
 0x3e8   : > { %4740 = vmatprep.mubr.bf16.mxu1 %v5025_v56 }
 0x3ef   : > { %4741 = vmatmul.mubr.bf16.gmra.mrb[100].mxu1 %v5026_v25 }
 0x3f0   : > { %4744 = vmatprep.mubr.bf16.mxu1 %v5027_v61 }
 0x3f7   : > { %4745 = vmatmul.mubr.bf16.gmra.mrb[104].mxu1 %v5028_v40  ;;  %v7678_v40 = vld [vmem:[#allocation17_spill] sm:$0xff] }
 0x3f8   : > { %4748 = vmatprep.mubr.bf16.mxu1 %v5029_v37 }
 0x3ff   : > { %4749 = vmatmul.mubr.bf16.gmra.mrb[108].mxu1 %v5030_v14 }
 0x400   : > { %4752 = vmatprep.mubr.bf16.mxu1 %v5031_v42  ;;  %v7679_v42 = vld [vmem:[#allocation15_spill] sm:$0xff] }
 0x407   : > { %4753 = vmatmul.mubr.bf16.gmra.mrb[112].mxu1 %v5032_v36 }
 0x408   : > { %4756 = vmatprep.mubr.bf16.mxu1 %v5033_v63 }
 0x40f   : > { %4757 = vmatmul.mubr.bf16.gmra.mrb[116].mxu1 %v5034_v15 }
 0x410   : > { %4760 = vmatprep.mubr.bf16.mxu1 %v5035_v38  ;;  %v7680_v38 = vld [vmem:[#allocation18_spill] sm:$0xff] }
 0x417   : > { %4761 = vmatmul.mubr.bf16.gmra.mrb[120].mxu1 %v5036_v62 }
 0x418   : > { %4764 = vmatprep.mubr.bf16.mxu1 %v5037_v20 }
 0x41f   : > { %4765 = vmatmul.mubr.bf16.gmra.mrb[124].mxu1 %v5038_v22 }
 0x4ba   : > { %v4738_v2 = vpop.f32.mrb[96].mxu1 }
 0x4bb   : > { %v3702_v51 = vpop.f32.mrb[97].mxu1  ;;  %v7158_v49 = vadd.f32 %v4738_v2, %v7666_v41  ;;  %v7681_v2 = vld [vmem:[#allocation16_spill] sm:$0xff]  ;;  %v7682_v41 = vld [vmem:[#allocation21_spill] sm:$0xff] }
 0x4bc   : > { %v4739_v16 = vpop.f32.mrb[98].mxu1  ;;  %v7164_v55 = vadd.f32 %v3702_v51, %v7668_v8  ;;  %v7683_v8 = vld [vmem:[#allocation19_spill] sm:$0xff] }
 0x4bd   : > { %v3705_v43 = vpop.f32.mrb[99].mxu1  ;;  %v7170_v30 = vadd.f32 %v4739_v16, %v7670_v44 }
 0x4be   : > { %v7178_v39 = vadd.f32 %v3705_v43, %v7672_v57 }
 0x4c2   : > { %v4742_v53 = vpop.f32.mrb[100].mxu1 }
 0x4c3   : > { %v7161_v4 = vadd.f32 %v4742_v53, %v7667_v17  ;;  %v3718_v46 = vpop.f32.mrb[101].mxu1 }
 0x4c4   : > { %v7167_v3 = vadd.f32 %v3718_v46, %v7669_v7  ;;  %v4743_v27 = vpop.f32.mrb[102].mxu1 }
 0x4c5   : > { %v3863_v58 = vmin.f32 %v7158_v49, %v7161_v4  ;;  %v7175_v12 = vadd.f32 %v4743_v27, %v7671_v10  ;;  %v3721_v28 = vpop.f32.mrb[103].mxu1 }
 0x4c6   : > { %v3861_v18 = vmin.f32 %v7164_v55, %v7167_v3  ;;  %v7183_v1 = vadd.f32 %v3721_v28, %v7673_v50 }
 0x4c7   : > { %v3864_v24 = vmin.f32 %v7170_v30, %v7175_v12 }
 0x4c8   : > { %v3862_v23 = vmin.f32 %v7178_v39, %v7183_v1 }
 0x4ca   : > { %v4746_v35 = vpop.f32.mrb[104].mxu1 }
 0x4cb   : > { %v7190_v47 = vadd.f32 %v4746_v35, %v7674_v59  ;;  %v3734_v29 = vpop.f32.mrb[105].mxu1  ;;  %v7686_v59 = vld [vmem:[#allocation25_spill] sm:$0xff] }
 0x4cc   : > { %v7193_v52 = vadd.f32 %v3734_v29, %v7675_v0  ;;  %v4747_v54 = vpop.f32.mrb[106].mxu1 }
 0x4cd   : > { %v3867_v6 = vmin.f32 %v3863_v58, %v7190_v47  ;;  %v7197_v21 = vadd.f32 %v4747_v54, %v7676_v31  ;;  %v3737_v48 = vpop.f32.mrb[107].mxu1  ;;  %v7684_v58 = vld [vmem:[#allocation22_spill] sm:$0xff]  ;;  %v7687_v54 = vld [vmem:[#allocation23_spill] sm:$0xff] }
 0x4ce   : > { %v3865_v11 = vmin.f32 %v3861_v18, %v7193_v52  ;;  %v7201_v32 = vadd.f32 %v3737_v48, %v7677_v13  ;;  %v7685_v18 = vld [vmem:[#allocation20_spill] sm:$0xff] }
 0x4cf   : > { %v3868_v56 = vmin.f32 %v3864_v24, %v7197_v21 }
 0x4d0   : > { %v3866_v25 = vmin.f32 %v3862_v23, %v7201_v32 }
 0x4d2   : > { %v4750_v61 = vpop.f32.mrb[108].mxu1 }
 0x4d3   : > { %v7206_v37 = vadd.f32 %v4750_v61, %v7678_v40  ;;  %v3750_v14 = vpop.f32.mrb[109].mxu1  ;;  %v7689_v61 = vld [vmem:[#allocation24_spill] sm:$0xff] }
 0x4d4   : > { %v7209_v36 = vadd.f32 %v3750_v14, %v7679_v42  ;;  %v4751_v63 = vpop.f32.mrb[110].mxu1 }
 0x4d5   : > { %v3871_v15 = vmin.f32 %v3867_v6, %v7206_v37  ;;  %v7213_v62 = vadd.f32 %v4751_v63, %v7680_v38  ;;  %v3753_v20 = vpop.f32.mrb[111].mxu1 }
 0x4d6   : > { %v3869_v22 = vmin.f32 %v3865_v11, %v7209_v36  ;;  %v7217_v51 = vadd.f32 %v3753_v20, %v7681_v2  ;;  %v7688_v11 = vld [vmem:[#allocation26_spill] sm:$0xff] }
 0x4d7   : > { %v3872_v16 = vmin.f32 %v3868_v56, %v7213_v62 }
 0x4d8   : > { %v3870_v43 = vmin.f32 %v3866_v25, %v7217_v51 }
 0x4da   : > { %v4754_v53 = vpop.f32.mrb[112].mxu1 }
 0x4db   : > { %v7222_v17 = vadd.f32 %v4754_v53, %v7682_v41  ;;  %v3766_v46 = vpop.f32.mrb[113].mxu1  ;;  %v7692_v53 = vld [vmem:[#allocation31_spill] sm:$0xff] }
 0x4dc   : > { %v7225_v7 = vadd.f32 %v3766_v46, %v7683_v8  ;;  %v4755_v27 = vpop.f32.mrb[114].mxu1 }
 0x4dd   : > { %v3875_v44 = vmin.f32 %v3871_v15, %v7222_v17  ;;  %v7229_v10 = vadd.f32 %v4755_v27, %v7684_v58  ;;  %v3769_v28 = vpop.f32.mrb[115].mxu1  ;;  %v7690_v15 = vld [vmem:[#allocation29_spill] sm:$0xff]  ;;  %v7693_v27 = vld [vmem:[#allocation28_spill] sm:$0xff] }
 0x4de   : > { %v3873_v57 = vmin.f32 %v3869_v22, %v7225_v7  ;;  %v7233_v50 = vadd.f32 %v3769_v28, %v7685_v18  ;;  %v7691_v22 = vld [vmem:[#allocation27_spill] sm:$0xff]  ;;  %v7694_v18 = vld [vmem:[#allocation36_spill] sm:$0xff] }
 0x4df   : > { %v3876_v24 = vmin.f32 %v3872_v16, %v7229_v10 }
 0x4e0   : > { %v3874_v23 = vmin.f32 %v3870_v43, %v7233_v50 }
 0x4e2   : > { %v4758_v35 = vpop.f32.mrb[116].mxu1 }
 0x4e3   : > { %v7238_v29 = vadd.f32 %v4758_v35, %v7686_v59  ;;  %v3782_v0 = vpop.f32.mrb[117].mxu1  ;;  %v7695_v35 = vld [vmem:[#allocation32_spill] sm:$0xff] }
 0x4e4   : > { %v7241_v6 = vadd.f32 %v3782_v0, %v7687_v54  ;;  %v4759_v31 = vpop.f32.mrb[118].mxu1 }
 0x4e5   : > { %v3879_v48 = vmin.f32 %v3875_v44, %v7238_v29  ;;  %v7245_v13 = vadd.f32 %v4759_v31, %v7688_v11  ;;  %v3785_v56 = vpop.f32.mrb[119].mxu1  ;;  %v7696_v31 = vld [vmem:[#allocation37_spill] sm:$0xff] }
 0x4e6   : > { %v3877_v25 = vmin.f32 %v3873_v57, %v7241_v6  ;;  %v7249_v40 = vadd.f32 %v3785_v56, %v7689_v61 }
 0x4e7   : > { %v3880_v14 = vmin.f32 %v3876_v24, %v7245_v13 }
 0x4e8   : > { %v3878_v42 = vmin.f32 %v3874_v23, %v7249_v40 }
 0x4ea   : > { %v4762_v63 = vpop.f32.mrb[120].mxu1 }
 0x4eb   : > { %v7254_v38 = vadd.f32 %v4762_v63, %v7690_v15  ;;  %v3798_v20 = vpop.f32.mrb[121].mxu1 }
 0x4ec   : > { %v7257_v2 = vadd.f32 %v3798_v20, %v7691_v22  ;;  %v4763_v16 = vpop.f32.mrb[122].mxu1 }
 0x4ed   : > { %v3883_v43 = vmin.f32 %v3879_v48, %v7254_v38  ;;  %v7261_v41 = vadd.f32 %v4763_v16, %v7692_v53  ;;  %v3801_v46 = vpop.f32.mrb[123].mxu1 }
 0x4ee   : > { %v3881_v8 = vmin.f32 %v3877_v25, %v7257_v2  ;;  %v7265_v44 = vadd.f32 %v3801_v46, %v7693_v27  ;;  %v7697_v25 = vld [vmem:[#allocation33_spill] sm:$0xff] }
 0x4ef   : > { %v3884_v58 = vmin.f32 %v3880_v14, %v7261_v41 }
 0x4f0   : > { %v3882_v28 = vmin.f32 %v3878_v42, %v7265_v44 }
 0x4f2   : > { %v4766_v57 = vpop.f32.mrb[124].mxu1 }
 0x4f3   : > { %v7270_v24 = vadd.f32 %v4766_v57, %v7694_v18  ;;  %v3814_v23 = vpop.f32.mrb[125].mxu1  ;;  %v7698_v57 = vld [vmem:[#allocation42_spill] sm:$0xff] }
 0x4f4   : > { %v7273_v59 = vadd.f32 %v3814_v23, %v7695_v35  ;;  %v4767_v0 = vpop.f32.mrb[126].mxu1  ;;  %v7702_v23 = vld [vmem:[#allocation46_spill] sm:$0xff]  ;;  %v7705_v35 = vld [vmem:[#allocation48_spill] sm:$0xff] }
 0x4f5   : > { %v3887_v54 = vmin.f32 %v3883_v43, %v7270_v24  ;;  %v7277_v48 = vadd.f32 %v4767_v0, %v7696_v31  ;;  %v3817_v11 = vpop.f32.mrb[127].mxu1  ;;  %v7707_v0 = vld [vmem:[#allocation49_spill] sm:$0xff]  ;;  %v7711_v31 = vld [vmem:[#allocation51_spill] sm:$0xff] }
 0x4f6   : > { %v3885_v56 = vmin.f32 %v3881_v8, %v7273_v59  ;;  %v7281_v61 = vadd.f32 %v3817_v11, %v7697_v25  ;;  %v7713_v11 = vld [vmem:[#allocation52_spill] sm:$0xff]  ;;  %v7717_v25 = vld [vmem:[#allocation54_spill] sm:$0xff] }
 0x4f7   : > { %v3888_v14 = vmin.f32 %v3884_v58, %v7277_v48 }
 0x4f8   : > { %v3886_v42 = vmin.f32 %v3882_v28, %v7281_v61 }
 0x4f9   : > { %v3890_v63 = vmin.f32 %v3887_v54, %v3888_v14  ;;  %v7709_v54 = vld [vmem:[#allocation50_spill] sm:$0xff]  ;;  %v7719_v14 = vld [vmem:[#allocation55_spill] sm:$0xff] }
 0x4fa   : > { %v3889_v15 = vmin.f32 %v3885_v56, %v3886_v42  ;;  %v7715_v56 = vld [vmem:[#allocation53_spill] sm:$0xff]  ;;  %v7721_v42 = vld [vmem:[#allocation56_spill] sm:$0xff] }
 0x4fc   : > { %v3891_v20 = vmin.f32 %v3889_v15, %v3890_v63  ;;  %v7723_v63 = vld [vmem:[#allocation58_spill] sm:$0xff] }
 0x4fd   : > { %v7728_v15 = vld [vmem:[#allocation62_spill] sm:$0xff] }
 0x4fe   : > { %v3892_v22 = vrot.slane %v3891_v20, 4 }
 0x500   : > { %v3893_v16 = vmin.f32 %v3891_v20, %v3892_v22  ;;  %v7734_v20 = vld [vmem:[#allocation68_spill] sm:$0xff]  ;;  %v7736_v22 = vld [vmem:[#allocation70_spill] sm:$0xff] }
 0x502   : > { %v3894_v53 = vrot.slane %v3893_v16, 2 }
 0x504   : > { %v3895_v43 = vmin.f32 %v3893_v16, %v3894_v53  ;;  %v7737_v16 = vld [vmem:[#allocation71_spill] sm:$0xff] }
 0x506   : > { %v3896_v46 = vrot.slane %v3895_v43, 1 }
 0x508   : > { %v7285_v27 = vmin.f32 %v3895_v43, %v3896_v46 }
 0x50a   : > { %vm3898_vm1 = vcmp.le.f32.partialorder %v7164_v55, %v7285_v27  ;;  %vm3899_vm8 = vcmp.le.f32.partialorder %v7178_v39, %v7285_v27  ;;  %vm3900_vm12 = vcmp.le.f32.partialorder %v7158_v49, %v7285_v27  ;;  %vm3901_vm9 = vcmp.le.f32.partialorder %v7170_v30, %v7285_v27  ;;  %v7699_v55 = vld [vmem:[#allocation43_spill] sm:$0xff]  ;;  %v7700_v39 = vld [vmem:[#allocation44_spill] sm:$0xff]  ;;  %v7701_v49 = vld [vmem:[#allocation45_spill] sm:$0xff] }
 0x50b   : > { %vm3902_vm15 = vcmp.le.f32.partialorder %v7167_v3, %v7285_v27  ;;  %vm3903_vm10 = vcmp.le.f32.partialorder %v7183_v1, %v7285_v27  ;;  %vm3904_vm14 = vcmp.le.f32.partialorder %v7161_v4, %v7285_v27  ;;  %vm3905_vm11 = vcmp.le.f32.partialorder %v7175_v12, %v7285_v27  ;;  %v7703_v3 = vld [vmem:[#allocation47_spill] sm:$0xff] }
 0x50c   : > { %vm3906_vm2 = vcmp.le.f32.partialorder %v7193_v52, %v7285_v27  ;;  %vm3923_vm5 = vcmp.le.f32.partialorder %v7265_v44, %v7285_v27  ;;  %vm3924_vm6 = vcmp.le.f32.partialorder %v7254_v38, %v7285_v27  ;;  %vm3925_vm7 = vcmp.le.f32.partialorder %v7261_v41, %v7285_v27 }
 0x50d   : > { %vm3926_vm13 = vcmp.le.f32.partialorder %v7273_v59, %v7285_v27  ;;  %vm3927_vm0 = vcmp.le.f32.partialorder %v7281_v61, %v7285_v27  ;;  %vm3928_vm3 = vcmp.le.f32.partialorder %v7270_v24, %v7285_v27  ;;  %vm3929_vm4 = vcmp.le.f32.partialorder %v7277_v48, %v7285_v27 }
 0x50e   : > { %v3930_v8 = vsel %vm3898_vm1, %v5271_v45, 256  ;;  %v3931_v58 = vsel %vm3899_vm8, %v6681_v5, 256  ;;  %v3932_v28 = vsel %vm3900_vm12, %v6684_v33, 256  ;;  %v3933_v18 = vsel %vm3901_vm9, %v7698_v57, 256 }
 0x50f   : > { %v3934_v45 = vsel %vm3902_vm15, %v6690_v60, 256  ;;  %v3935_v5 = vsel %vm3903_vm10, %v7699_v55, 256  ;;  %v3936_v33 = vsel %vm3904_vm14, %v7700_v39, 256  ;;  %v3937_v30 = vsel %vm3905_vm11, %v7701_v49, 256 }
 0x510   : > { %v3938_v60 = vsel %vm3906_vm2, %v7702_v23, 256  ;;  %vm7704_vm1 = vcmp.le.f32.partialorder %v7201_v32, %v7285_v27  ;;  %vm7706_vm8 = vcmp.le.f32.partialorder %v7190_v47, %v7285_v27  ;;  %vm7708_vm12 = vcmp.le.f32.partialorder %v7197_v21, %v7285_v27 }
 0x511   : > { %v3939_v1 = vsel %vm7704_vm1, %v7703_v3, 256  ;;  %v3940_v4 = vsel %vm7706_vm8, %v7705_v35, 256  ;;  %v3941_v12 = vsel %vm7708_vm12, %v7707_v0, 256  ;;  %vm7710_vm9 = vcmp.le.f32.partialorder %v7209_v36, %v7285_v27 }
 0x512   : > { %v3942_v52 = vsel %vm7710_vm9, %v7709_v54, 256  ;;  %vm7712_vm15 = vcmp.le.f32.partialorder %v7217_v51, %v7285_v27  ;;  %vm7714_vm10 = vcmp.le.f32.partialorder %v7206_v37, %v7285_v27  ;;  %vm7716_vm14 = vcmp.le.f32.partialorder %v7213_v62, %v7285_v27 }
 0x513   : > { %v3943_v32 = vsel %vm7712_vm15, %v7711_v31, 256  ;;  %v3944_v47 = vsel %vm7714_vm10, %v7713_v11, 256  ;;  %v3945_v21 = vsel %vm7716_vm14, %v7715_v56, 256  ;;  %vm7718_vm11 = vcmp.le.f32.partialorder %v7225_v7, %v7285_v27 }
 0x514   : > { %v3946_v36 = vsel %vm7718_vm11, %v7717_v25, 256  ;;  %vm7720_vm2 = vcmp.le.f32.partialorder %v7233_v50, %v7285_v27  ;;  %vm7722_vm1 = vcmp.le.f32.partialorder %v7222_v17, %v7285_v27  ;;  %vm7724_vm8 = vcmp.le.f32.partialorder %v7229_v10, %v7285_v27 }
 0x515   : > { %v3947_v51 = vsel %vm7720_vm2, %v7719_v14, 256  ;;  %v3948_v37 = vsel %vm7722_vm1, %v7721_v42, 256  ;;  %v3949_v62 = vsel %vm7724_vm8, %v7723_v63, 256  ;;  %vm7725_vm12 = vcmp.le.f32.partialorder %v7241_v6, %v7285_v27  ;;  %v7731_v6 = vld [vmem:[#allocation65_spill] sm:$0xff] }
 0x516   : > { %v3950_v7 = vsel %vm7725_vm12, %v7640_v9, 256  ;;  %vm7726_vm9 = vcmp.le.f32.partialorder %v7249_v40, %v7285_v27  ;;  %vm7727_vm15 = vcmp.le.f32.partialorder %v7238_v29, %v7285_v27  ;;  %vm7729_vm10 = vcmp.le.f32.partialorder %v7245_v13, %v7285_v27  ;;  %v7732_v40 = vld [vmem:[#allocation66_spill] sm:$0xff]  ;;  %v7733_v29 = vld [vmem:[#allocation67_spill] sm:$0xff] }
 0x517   : > { %v3951_v50 = vsel %vm7726_vm9, %v7642_v19, 256  ;;  %v3952_v17 = vsel %vm7727_vm15, %v7644_v26, 256  ;;  %v3953_v10 = vsel %vm7729_vm10, %v7728_v15, 256  ;;  %vm7730_vm14 = vcmp.le.f32.partialorder %v7257_v2, %v7285_v27  ;;  %v7735_v2 = vld [vmem:[#allocation69_spill] sm:$0xff] }
 0x518   : > { %v3954_v9 = vsel %vm7730_vm14, %v7648_v34, 256  ;;  %v3955_v19 = vsel %vm3923_vm5, %v7731_v6, 256  ;;  %v3956_v26 = vsel %vm3924_vm6, %v7732_v40, 256  ;;  %v3957_v13 = vsel %vm3925_vm7, %v7733_v29, 256 }
 0x519   : > { %v3958_v34 = vsel %vm3926_vm13, %v7734_v20, 256  ;;  %v3959_v44 = vsel %vm3927_vm0, %v7735_v2, 256  ;;  %v3960_v38 = vsel %vm3928_vm3, %v7736_v22, 256  ;;  %v3961_v41 = vsel %vm3929_vm4, %v7737_v16, 256 }
 0x51a   : > { %vm3962_vm5 = vcmp.lt.s32.totalorder %v3930_v8, %v3934_v45  ;;  %vm3964_vm6 = vcmp.lt.s32.totalorder %v3931_v58, %v3935_v5  ;;  %vm3966_vm7 = vcmp.lt.s32.totalorder %v3932_v28, %v3936_v33  ;;  %vm3968_vm11 = vcmp.lt.s32.totalorder %v3933_v18, %v3937_v30 }
 0x51b   : > { %v3963_v59 = vsel %vm3962_vm5, %v3930_v8, %v3934_v45  ;;  %v3965_v53 = vsel %vm3964_vm6, %v3931_v58, %v3935_v5  ;;  %v3967_v43 = vsel %vm3966_vm7, %v3932_v28, %v3936_v33  ;;  %v3969_v46 = vsel %vm3968_vm11, %v3933_v18, %v3937_v30 }
 0x51c   : > { %vm3970_vm13 = vcmp.lt.s32.totalorder %v3963_v59, %v3938_v60  ;;  %vm3972_vm0 = vcmp.lt.s32.totalorder %v3965_v53, %v3939_v1  ;;  %vm3974_vm2 = vcmp.lt.s32.totalorder %v3967_v43, %v3940_v4  ;;  %vm3976_vm1 = vcmp.lt.s32.totalorder %v3969_v46, %v3941_v12 }
 0x51d   : > { %v3971_v61 = vsel %vm3970_vm13, %v3963_v59, %v3938_v60  ;;  %v3973_v24 = vsel %vm3972_vm0, %v3965_v53, %v3939_v1  ;;  %v3975_v57 = vsel %vm3974_vm2, %v3967_v43, %v3940_v4  ;;  %v3977_v55 = vsel %vm3976_vm1, %v3969_v46, %v3941_v12 }
 0x51e   : > { %vm3978_vm3 = vcmp.lt.s32.totalorder %v3971_v61, %v3942_v52  ;;  %vm3980_vm8 = vcmp.lt.s32.totalorder %v3973_v24, %v3943_v32  ;;  %vm3982_vm12 = vcmp.lt.s32.totalorder %v3975_v57, %v3944_v47  ;;  %vm3984_vm4 = vcmp.lt.s32.totalorder %v3977_v55, %v3945_v21 }
 0x51f   : > { %v3979_v48 = vsel %vm3978_vm3, %v3971_v61, %v3942_v52  ;;  %v3981_v27 = vsel %vm3980_vm8, %v3973_v24, %v3943_v32  ;;  %v3983_v39 = vsel %vm3982_vm12, %v3975_v57, %v3944_v47  ;;  %v3985_v49 = vsel %vm3984_vm4, %v3977_v55, %v3945_v21 }
 0x520   : > { %vm3986_vm9 = vcmp.lt.s32.totalorder %v3979_v48, %v3946_v36  ;;  %vm3988_vm15 = vcmp.lt.s32.totalorder %v3981_v27, %v3947_v51  ;;  %vm3990_vm10 = vcmp.lt.s32.totalorder %v3983_v39, %v3948_v37  ;;  %vm3992_vm14 = vcmp.lt.s32.totalorder %v3985_v49, %v3949_v62 }
 0x521   : > { %v3987_v8 = vsel %vm3986_vm9, %v3979_v48, %v3946_v36  ;;  %v3989_v58 = vsel %vm3988_vm15, %v3981_v27, %v3947_v51  ;;  %v3991_v28 = vsel %vm3990_vm10, %v3983_v39, %v3948_v37  ;;  %v3993_v18 = vsel %vm3992_vm14, %v3985_v49, %v3949_v62 }
 0x522   : > { %vm3994_vm5 = vcmp.lt.s32.totalorder %v3987_v8, %v3950_v7  ;;  %vm3996_vm6 = vcmp.lt.s32.totalorder %v3989_v58, %v3951_v50  ;;  %vm3998_vm7 = vcmp.lt.s32.totalorder %v3991_v28, %v3952_v17  ;;  %vm4000_vm11 = vcmp.lt.s32.totalorder %v3993_v18, %v3953_v10 }
 0x523   : > { %v3995_v45 = vsel %vm3994_vm5, %v3987_v8, %v3950_v7  ;;  %v3997_v5 = vsel %vm3996_vm6, %v3989_v58, %v3951_v50  ;;  %v3999_v33 = vsel %vm3998_vm7, %v3991_v28, %v3952_v17  ;;  %v4001_v30 = vsel %vm4000_vm11, %v3993_v18, %v3953_v10 }
 0x524   : > { %vm4002_vm13 = vcmp.lt.s32.totalorder %v3995_v45, %v3954_v9  ;;  %vm4004_vm0 = vcmp.lt.s32.totalorder %v3997_v5, %v3955_v19  ;;  %vm4006_vm2 = vcmp.lt.s32.totalorder %v3999_v33, %v3956_v26  ;;  %vm4008_vm1 = vcmp.lt.s32.totalorder %v4001_v30, %v3957_v13 }
 0x525   : > { %v4003_v23 = vsel %vm4002_vm13, %v3995_v45, %v3954_v9  ;;  %v4005_v60 = vsel %vm4004_vm0, %v3997_v5, %v3955_v19  ;;  %v4007_v3 = vsel %vm4006_vm2, %v3999_v33, %v3956_v26  ;;  %v4009_v1 = vsel %vm4008_vm1, %v4001_v30, %v3957_v13 }
 0x526   : > { %vm4010_vm3 = vcmp.lt.s32.totalorder %v4003_v23, %v3958_v34  ;;  %vm4012_vm8 = vcmp.lt.s32.totalorder %v4005_v60, %v3959_v44  ;;  %vm4014_vm12 = vcmp.lt.s32.totalorder %v4007_v3, %v3960_v38  ;;  %vm4016_vm4 = vcmp.lt.s32.totalorder %v4009_v1, %v3961_v41 }
 0x527   : > { %v4011_v35 = vsel %vm4010_vm3, %v4003_v23, %v3958_v34  ;;  %v4013_v4 = vsel %vm4012_vm8, %v4005_v60, %v3959_v44  ;;  %v4015_v0 = vsel %vm4014_vm12, %v4007_v3, %v3960_v38  ;;  %v4017_v12 = vsel %vm4016_vm4, %v4009_v1, %v3961_v41 }
 0x528   : > { %vm4018_vm9 = vcmp.lt.s32.totalorder %v4011_v35, %v4013_v4  ;;  %vm4020_vm15 = vcmp.lt.s32.totalorder %v4015_v0, %v4017_v12 }
 0x529   : > { %v4019_v54 = vsel %vm4018_vm9, %v4011_v35, %v4013_v4  ;;  %v4021_v52 = vsel %vm4020_vm15, %v4015_v0, %v4017_v12 }
 0x52a   : > { %vm4022_vm10 = vcmp.lt.s32.totalorder %v4019_v54, %v4021_v52 }
 0x52b   : > { %v4023_v31 = vsel %vm4022_vm10, %v4019_v54, %v4021_v52 }
 0x52c   : > { %v4024_v32 = vrot.slane %v4023_v31, 4 }
 0x52e   : > { %vm4025_vm14 = vcmp.lt.s32.totalorder %v4023_v31, %v4024_v32 }
 0x52f   : > { %v4026_v11 = vsel %vm4025_vm14, %v4023_v31, %v4024_v32 }
 0x530   : > { %v4027_v47 = vrot.slane %v4026_v11, 2 }
 0x532   : > { %vm4028_vm5 = vcmp.lt.s32.totalorder %v4026_v11, %v4027_v47 }
 0x533   : > { %v4029_v56 = vsel %vm4028_vm5, %v4026_v11, %v4027_v47 }
 0x534   : > { %v4030_v21 = vrot.slane %v4029_v56, 1 }
 0x536   : > { %vm4031_vm6 = vcmp.lt.s32.totalorder %v4029_v56, %v4030_v21 }
 0x537   : > { %v4032_v25 = vsel %vm4031_vm6, %v4029_v56, %v4030_v21 }
 0x538   : > { %4331 = vst [vmem:[%s7097_s21 + $0x1] sm:$0x1] %v4032_v25 }
 0x539 PF: > { %s17_s24 = sadd.s32 1, %s5077_s24  }
 0x53a   : > { %p14_p4 = scmp.ge.s32.totalorder %s17_s24, 4  }
 0x53c   :  { %16 = sbr.rel (!%p14_p4) target bundleno = 1 (0x1), region = 81 }

</bundles_post_ra>
